<compile_context>
chip_gen: v7x
topology: tpu7x:2x2x1
jax: 0.10.0
libtpu: 0.0.40
codegen_flags: <defaults>
</compile_context>

<pallas_src>
import functools
import math

import jax
import jax.numpy as jnp
from jax.experimental import pallas as pl
from jax.experimental.pallas import tpu as pltpu


# ----------------------------------------------------------------------------
# helpers
# ----------------------------------------------------------------------------
def _layernorm_f32(v, gamma, beta, eps=1e-5):
    mu = jnp.mean(v, axis=-1, keepdims=True)
    var = jnp.mean((v - mu) ** 2, axis=-1, keepdims=True)
    return (v - mu) * jax.lax.rsqrt(var + eps) * gamma + beta


def _vmem_limit_bytes() -> int:
    """Derive a per-chip VMEM budget (leave headroom; ~40 MiB on v7x)."""
    try:
        cap = int(pltpu.get_tpu_info().vmem_capacity_bytes)
    except Exception:
        return 40 * 1024 * 1024
    return int(min(cap * 5 // 8, 100 * 1024 * 1024))


def _default_seq_tile() -> int:
    """256 feeds the 256-wide MXU on v6e/v7x; 128 is right for v5e."""
    try:
        info = pltpu.get_tpu_info()
        name = str(getattr(info, "chip_version", "")).lower()
        if any(tag in name for tag in ("v6", "v7", "6e", "7x")):
            return 256
    except Exception:
        pass
    return 128


@functools.cache
def _buffered_supported() -> bool:
    """Trace/compile-time feature probe for pl.Buffered(1) (single-buffered
    resident weights).  Never wraps the real kernel execution."""
    if not hasattr(pl, "Buffered"):
        return False
    try:
        def _probe(x_ref, o_ref):
            o_ref[...] = x_ref[...]

        fn = pl.pallas_call(
            _probe,
            out_shape=jax.ShapeDtypeStruct((8, 128), jnp.float32),
            grid=(1,),
            in_specs=[pl.BlockSpec((8, 128), lambda i: (0, 0),
                                   pipeline_mode=pl.Buffered(1))],
            out_specs=pl.BlockSpec((8, 128), lambda i: (0, 0)),
        )
        jax.jit(fn).lower(jnp.zeros((8, 128), jnp.float32)).compile()
        return True
    except Exception:
        return False


def _const_spec(shape, single_buffer):
    """BlockSpec for a weight resident in VMEM (constant index map)."""
    idx = lambda *_: (0,) * len(shape)
    if single_buffer:
        return pl.BlockSpec(shape, idx, pipeline_mode=pl.Buffered(1))
    return pl.BlockSpec(shape, idx)


def _fit_tile(n, cap):
    """Largest multiple of 8 that divides n and is <= cap."""
    assert n % 8 == 0, "sizes must be multiples of 8"
    t = min(cap, n)
    t -= t % 8
    while t > 8 and n % t:
        t -= 8
    return max(t, 8)


# ----------------------------------------------------------------------------
# kernel 1: fused QKV projection (runs once per row, never inside flash loop)
# ----------------------------------------------------------------------------
def qkv_proj_kernel(x_ref, wqkv_ref, bqkv_ref, q_ref, k_ref, v_ref):
    D = q_ref.shape[-1]
    x16 = x_ref[...].astype(jnp.bfloat16)                              # (tm, D)
    # Three MXU passes against the resident fused weight.  The 1/sqrt(D)
    # softmax scale is already folded into wqkv[:, :D] / bqkv[:, :D].
    q = jnp.dot(x16, wqkv_ref[:, :D], preferred_element_type=jnp.float32)
    q_ref[...] = (q + bqkv_ref[:, :D]).astype(jnp.bfloat16)
    k = jnp.dot(x16, wqkv_ref[:, D:2 * D], preferred_element_type=jnp.float32)
    k_ref[...] = (k + bqkv_ref[:, D:2 * D]).astype(jnp.bfloat16)
    v = jnp.dot(x16, wqkv_ref[:, 2 * D:], preferred_element_type=jnp.float32)
    v_ref[...] = (v + bqkv_ref[:, 2 * D:]).astype(jnp.bfloat16)


# ----------------------------------------------------------------------------
# kernel 2: flash attention (online softmax; scores never materialized beyond
#           one (tq, tkv) tile; q is pre-scaled bf16, k/v are bf16)
# ----------------------------------------------------------------------------
def flash_attn_kernel(q_ref, k_ref, v_ref, o_ref, m_sc, l_sc, acc_sc):
    ki = pl.program_id(2)

    @pl.when(ki == 0)
    def _():
        m_sc[...] = jnp.full(m_sc.shape, -jnp.inf, dtype=jnp.float32)
        l_sc[...] = jnp.zeros(l_sc.shape, jnp.float32)
        acc_sc[...] = jnp.zeros(acc_sc.shape, jnp.float32)

    q = q_ref[0]                                                       # (tq, D)
    k = k_ref[0]                                                       # (tkv, D)
    v = v_ref[0]                                                       # (tkv, D)
    # Contract last dims -> no explicit transpose of k.
    s = jax.lax.dot_general(q, k, (((1,), (1,)), ((), ())),
                            preferred_element_type=jnp.float32)        # (tq, tkv)
    m_new = jnp.maximum(m_sc[...], jnp.max(s, axis=-1, keepdims=True))
    alpha = jnp.exp(m_sc[...] - m_new)
    p = jnp.exp(s - m_new)
    l_sc[...] = alpha * l_sc[...] + jnp.sum(p, axis=-1, keepdims=True)
    acc_sc[...] = alpha * acc_sc[...] + jnp.dot(
        p.astype(jnp.bfloat16), v, preferred_element_type=jnp.float32)
    m_sc[...] = m_new

    @pl.when(ki == pl.num_programs(2) - 1)
    def _():
        o_ref[0] = (acc_sc[...] * pl.reciprocal(l_sc[...], approx=True)
                    ).astype(o_ref.dtype)


# ----------------------------------------------------------------------------
# kernel 3: epilogue (O-projection, residual + LN1, FFN, residual + LN2)
#           tiles over B*S rows with a large M tile
# ----------------------------------------------------------------------------
def epilogue_kernel(x_ref, ctx_ref, wo_ref, bo_ref, w1_ref, b1_ref,
                    w2_ref, b2_ref, g1_ref, be1_ref, g2_ref, be2_ref, o_ref):
    x = x_ref[...]                                                     # (tm, D) f32
    attn = jnp.dot(ctx_ref[...], wo_ref[...],
                   preferred_element_type=jnp.float32) + bo_ref[...]
    h = _layernorm_f32(x + attn, g1_ref[...], be1_ref[...])
    ff = jnp.dot(h.astype(jnp.bfloat16), w1_ref[...],
                 preferred_element_type=jnp.float32) + b1_ref[...]
    ff = jax.nn.gelu(ff)                                               # f32 VPU/EUP
    ff = jnp.dot(ff.astype(jnp.bfloat16), w2_ref[...],
                 preferred_element_type=jnp.float32) + b2_ref[...]
    o_ref[...] = _layernorm_f32(h + ff, g2_ref[...], be2_ref[...]).astype(o_ref.dtype)


# ----------------------------------------------------------------------------
# wrapper
# ----------------------------------------------------------------------------
@functools.partial(jax.jit, static_argnames=("tq", "tkv", "tm",
                                              "single_buffer", "vmem_limit"))
def _forward(x, p, *, tq, tkv, tm, single_buffer, vmem_limit):
    B, S, D = x.shape
    H = p["w1"].shape[1]
    nrows = B * S
    x2 = x.reshape(nrows, D)

    # ---- kernel 1: QKV projection ------------------------------------------
    qkv_call = pl.pallas_call(
        qkv_proj_kernel,
        out_shape=(jax.ShapeDtypeStruct((nrows, D), jnp.bfloat16),
                   jax.ShapeDtypeStruct((nrows, D), jnp.bfloat16),
                   jax.ShapeDtypeStruct((nrows, D), jnp.bfloat16)),
        grid_spec=pltpu.PrefetchScalarGridSpec(
            num_scalar_prefetch=0,
            grid=(nrows // tm,),
            in_specs=[
                pl.BlockSpec((tm, D), lambda i: (i, 0)),
                _const_spec((D, 3 * D), single_buffer),
                _const_spec((1, 3 * D), single_buffer),
            ],
            out_specs=(pl.BlockSpec((tm, D), lambda i: (i, 0)),
                       pl.BlockSpec((tm, D), lambda i: (i, 0)),
                       pl.BlockSpec((tm, D), lambda i: (i, 0))),
        ),
        compiler_params=pltpu.CompilerParams(
            dimension_semantics=("parallel",),
            vmem_limit_bytes=vmem_limit,
        ),
    )
    q2, k2, v2 = qkv_call(x2, p["wqkv"], p["bqkv"])
    q = q2.reshape(B, S, D)
    k = k2.reshape(B, S, D)
    v = v2.reshape(B, S, D)

    # ---- kernel 2: flash attention -----------------------------------------
    flash_call = pl.pallas_call(
        flash_attn_kernel,
        out_shape=jax.ShapeDtypeStruct((B, S, D), jnp.bfloat16),
        grid_spec=pltpu.PrefetchScalarGridSpec(
            num_scalar_prefetch=0,
            grid=(B, S // tq, S // tkv),
            in_specs=[
                pl.BlockSpec((1, tq, D), lambda b, qi, ki: (b, qi, 0)),
                pl.BlockSpec((1, tkv, D), lambda b, qi, ki: (b, ki, 0)),
                pl.BlockSpec((1, tkv, D), lambda b, qi, ki: (b, ki, 0)),
            ],
            out_specs=pl.BlockSpec((1, tq, D), lambda b, qi, ki: (b, qi, 0)),
            scratch_shapes=[
                pltpu.VMEM((tq, 1), jnp.float32),   # running max
                pltpu.VMEM((tq, 1), jnp.float32),   # running denominator
                pltpu.VMEM((tq, D), jnp.float32),   # attention accumulator
            ],
        ),
        compiler_params=pltpu.CompilerParams(
            dimension_semantics=("parallel", "parallel", "arbitrary"),
            vmem_limit_bytes=vmem_limit,
        ),
    )
    ctx = flash_call(q, k, v).reshape(nrows, D)

    # ---- kernel 3: epilogue (O-proj + LN1 + FFN + LN2) ----------------------
    epi_call = pl.pallas_call(
        epilogue_kernel,
        out_shape=jax.ShapeDtypeStruct((nrows, D), x.dtype),
        grid_spec=pltpu.PrefetchScalarGridSpec(
            num_scalar_prefetch=0,
            grid=(nrows // tm,),
            in_specs=[
                pl.BlockSpec((tm, D), lambda i: (i, 0)),   # x rows (f32 residual)
                pl.BlockSpec((tm, D), lambda i: (i, 0)),   # attention ctx (bf16)
                _const_spec((D, D), single_buffer), _const_spec((1, D), single_buffer),
                _const_spec((D, H), single_buffer), _const_spec((1, H), single_buffer),
                _const_spec((H, D), single_buffer), _const_spec((1, D), single_buffer),
                _const_spec((1, D), single_buffer), _const_spec((1, D), single_buffer),
                _const_spec((1, D), single_buffer), _const_spec((1, D), single_buffer),
            ],
            out_specs=pl.BlockSpec((tm, D), lambda i: (i, 0)),
        ),
        compiler_params=pltpu.CompilerParams(
            dimension_semantics=("parallel",),
            vmem_limit_bytes=vmem_limit,
        ),
    )
    out = epi_call(x2, ctx, p["wo"], p["bo"], p["w1"], p["b1"],
                   p["w2"], p["b2"], p["g1"], p["be1"], p["g2"], p["be2"])
    return out.reshape(B, S, D)


def prepare_params(params):
    """One-time weight prep (NOT per forward call): fuse Q/K/V, fold the
    1/sqrt(d_model) softmax scale into the Q slice, cast MXU weights to bf16."""
    D = params["wq"].shape[0]
    scale = 1.0 / math.sqrt(D)
    wqkv = jnp.concatenate([params["wq"] * scale, params["wk"], params["wv"]],
                           axis=1)
    bqkv = jnp.concatenate([params["bq"] * scale, params["bk"], params["bv"]],
                           axis=1)
    bf16 = jnp.bfloat16
    f32 = jnp.float32
    return {
        "wqkv": wqkv.astype(bf16), "bqkv": bqkv.astype(f32),
        "wo": params["wo"].astype(bf16), "bo": params["bo"].astype(f32),
        "w1": params["w1"].astype(bf16), "b1": params["b1"].astype(f32),
        "w2": params["w2"].astype(bf16), "b2": params["b2"].astype(f32),
        "g1": params["g1"].astype(f32), "be1": params["be1"].astype(f32),
        "g2": params["g2"].astype(f32), "be2": params["be2"].astype(f32),
    }


def transformer_block(x, prepped, *, tq=None, tkv=None, tm=None):
    """x: (B, S, D) float32.  prepped: output of prepare_params()."""
    B, S, D = x.shape
    H = prepped["w1"].shape[1]
    assert D % 128 == 0 and H % 128 == 0, "D and H must be lane-dense (x128)"
    assert S % 8 == 0, "S must be a multiple of 8"

    seq_default = _default_seq_tile()
    tq = _fit_tile(S, tq or seq_default)
    tkv = _fit_tile(S, tkv or seq_default)
    tm = _fit_tile(B * S, tm or 256)

    return _forward(x, prepped, tq=tq, tkv=tkv, tm=tm,
                    single_buffer=_buffered_supported(),
                    vmem_limit=_vmem_limit_bytes())


def init_params(key, d_model, d_ff):
    ks = jax.random.split(key, 8)
    std = 0.02
    return {
        "wq": jax.random.normal(ks[0], (d_model, d_model), jnp.float32) * std,
        "wk": jax.random.normal(ks[1], (d_model, d_model), jnp.float32) * std,
        "wv": jax.random.normal(ks[2], (d_model, d_model), jnp.float32) * std,
        "wo": jax.random.normal(ks[3], (d_model, d_model), jnp.float32) * std,
        "bq": jnp.zeros((1, d_model), jnp.float32),
        "bk": jnp.zeros((1, d_model), jnp.float32),
        "bv": jnp.zeros((1, d_model), jnp.float32),
        "bo": jnp.zeros((1, d_model), jnp.float32),
        "w1": jax.random.normal(ks[4], (d_model, d_ff), jnp.float32) * std,
        "b1": jnp.zeros((1, d_ff), jnp.float32),
        "w2": jax.random.normal(ks[5], (d_ff, d_model), jnp.float32) * std,
        "b2": jnp.zeros((1, d_model), jnp.float32),
        "g1": jnp.ones((1, d_model), jnp.float32),
        "be1": jnp.zeros((1, d_model), jnp.float32),
        "g2": jnp.ones((1, d_model), jnp.float32),
        "be2": jnp.zeros((1, d_model), jnp.float32),
    }


def _reference(x, p):
    """Pure-JAX f32 reference for correctness checking."""
    def ln(v, g, b):
        mu = jnp.mean(v, -1, keepdims=True)
        var = jnp.mean((v - mu) ** 2, -1, keepdims=True)
        return (v - mu) / jnp.sqrt(var + 1e-5) * g + b

    D = x.shape[-1]
    q = x @ p["wq"] + p["bq"][0]
    k = x @ p["wk"] + p["bk"][0]
    v = x @ p["wv"] + p["bv"][0]
    s = jnp.einsum("bqd,bkd->bqk", q, k) / math.sqrt(D)
    a = jax.nn.softmax(s, axis=-1)
    attn = jnp.einsum("bqk,bkd->bqd", a, v) @ p["wo"] + p["bo"][0]
    h = ln(x + attn, p["g1"][0], p["be1"][0])
    ff = jax.nn.gelu(h @ p["w1"] + p["b1"][0]) @ p["w2"] + p["b2"][0]
    return ln(h + ff, p["g2"][0], p["be2"][0])


if __name__ == "__main__":
    # Lane-dense demo shapes: D, H multiples of 128; parallel grid keeps >= 2
    # points (B=2) so both v7x TensorCores get work.
    B, S, D, H = 2, 128, 128, 256
    key = jax.random.PRNGKey(0)
    kx, kp = jax.random.split(key)
    x = jax.random.normal(kx, (B, S, D), jnp.float32)
    params = init_params(kp, D, H)
    prepped = prepare_params(params)

    out = transformer_block(x, prepped)
    out = jax.block_until_ready(out)

    ref = _reference(x, params)
    assert out.shape == (B, S, D)
    err = float(jnp.max(jnp.abs(out - ref)))
    # bf16 MXU operands + approx reciprocal -> looser tolerance than all-f32.
    assert jnp.allclose(out, ref, atol=2e-2, rtol=2e-2), err
    print("KERNEL_OK")
</pallas_src>

<mosaic_0001>
module attributes {stable_mosaic.version = 11 : i64} {
  func.func @qkv_proj_kernel(%arg0: i32, %arg1: memref<256x128xf32, #tpu.memory_space<vmem>>, %arg2: memref<128x384xbf16, #tpu.memory_space<vmem>>, %arg3: memref<1x384xf32, #tpu.memory_space<vmem>>, %arg4: memref<256x128xbf16, #tpu.memory_space<vmem>>, %arg5: memref<256x128xbf16, #tpu.memory_space<vmem>>, %arg6: memref<256x128xbf16, #tpu.memory_space<vmem>>) attributes {dimension_semantics = [#tpu.dimension_semantics<parallel>], iteration_bounds = array<i64: 1>, scalar_prefetch = 0 : i64, scratch_operands = 0 : i64, tpu.core_type = #tpu.core_type<tc>, window_params = [{transform_indices = @transform_0, window_bounds = array<i64: 256, 128>}, {pipeline_mode = #tpu.pipeline_mode<synchronous>, transform_indices = @transform_1, window_bounds = array<i64: 128, 384>}, {pipeline_mode = #tpu.pipeline_mode<synchronous>, transform_indices = @transform_2, window_bounds = array<i64: 1, 384>}, {transform_indices = @transform_3, window_bounds = array<i64: 256, 128>}, {transform_indices = @transform_4, window_bounds = array<i64: 256, 128>}, {transform_indices = @transform_5, window_bounds = array<i64: 256, 128>}]} {
    %c0 = arith.constant 0 : index
    %c0_0 = arith.constant 0 : index
    %0 = vector.load %arg1[%c0, %c0_0] : memref<256x128xf32, #tpu.memory_space<vmem>>, vector<256x128xf32>
    %1 = arith.truncf %0 : vector<256x128xf32> to vector<256x128xbf16>
    %c0_1 = arith.constant 0 : index
    %c0_2 = arith.constant 0 : index
    %2 = vector.load %arg2[%c0_1, %c0_2] : memref<128x384xbf16, #tpu.memory_space<vmem>>, vector<128x128xbf16>
    %cst = arith.constant dense<0.000000e+00> : vector<256x128xf32>
    %3 = tpu.matmul %1, %2, %cst {dimension_numbers = #tpu.dot_dimension_numbers<[1], [0], [0], [1], [0, 0, 1, 1], [], []>} : vector<256x128xbf16>, vector<128x128xbf16>, vector<256x128xf32> -> vector<256x128xf32>
    %c0_3 = arith.constant 0 : index
    %c0_4 = arith.constant 0 : index
    %4 = vector.load %arg3[%c0_3, %c0_4] : memref<1x384xf32, #tpu.memory_space<vmem>>, vector<1x128xf32>
    %5 = vector.broadcast %4 : vector<1x128xf32> to vector<256x128xf32>
    %6 = arith.addf %3, %5 : vector<256x128xf32>
    %7 = arith.truncf %6 : vector<256x128xf32> to vector<256x128xbf16>
    %c0_5 = arith.constant 0 : index
    %c0_6 = arith.constant 0 : index
    %8 = vector.load %arg4[%c0_5, %c0_6] : memref<256x128xbf16, #tpu.memory_space<vmem>>, vector<256x128xbf16>
    tpu.vector_store %arg4[%c0_5, %c0_6], %7 {strides = array<i32>} : memref<256x128xbf16, #tpu.memory_space<vmem>>, vector<256x128xbf16>,
    %c0_7 = arith.constant 0 : index
    %c128 = arith.constant 128 : index
    %9 = vector.load %arg2[%c0_7, %c128] : memref<128x384xbf16, #tpu.memory_space<vmem>>, vector<128x128xbf16>
    %cst_8 = arith.constant dense<0.000000e+00> : vector<256x128xf32>
    %10 = tpu.matmul %1, %9, %cst_8 {dimension_numbers = #tpu.dot_dimension_numbers<[1], [0], [0], [1], [0, 0, 1, 1], [], []>} : vector<256x128xbf16>, vector<128x128xbf16>, vector<256x128xf32> -> vector<256x128xf32>
    %c0_9 = arith.constant 0 : index
    %c128_10 = arith.constant 128 : index
    %11 = vector.load %arg3[%c0_9, %c128_10] : memref<1x384xf32, #tpu.memory_space<vmem>>, vector<1x128xf32>
    %12 = vector.broadcast %11 : vector<1x128xf32> to vector<256x128xf32>
    %13 = arith.addf %10, %12 : vector<256x128xf32>
    %14 = arith.truncf %13 : vector<256x128xf32> to vector<256x128xbf16>
    %c0_11 = arith.constant 0 : index
    %c0_12 = arith.constant 0 : index
    %15 = vector.load %arg5[%c0_11, %c0_12] : memref<256x128xbf16, #tpu.memory_space<vmem>>, vector<256x128xbf16>
    tpu.vector_store %arg5[%c0_11, %c0_12], %14 {strides = array<i32>} : memref<256x128xbf16, #tpu.memory_space<vmem>>, vector<256x128xbf16>,
    %c0_13 = arith.constant 0 : index
    %c256 = arith.constant 256 : index
    %16 = vector.load %arg2[%c0_13, %c256] : memref<128x384xbf16, #tpu.memory_space<vmem>>, vector<128x128xbf16>
    %cst_14 = arith.constant dense<0.000000e+00> : vector<256x128xf32>
    %17 = tpu.matmul %1, %16, %cst_14 {dimension_numbers = #tpu.dot_dimension_numbers<[1], [0], [0], [1], [0, 0, 1, 1], [], []>} : vector<256x128xbf16>, vector<128x128xbf16>, vector<256x128xf32> -> vector<256x128xf32>
    %c0_15 = arith.constant 0 : index
    %c256_16 = arith.constant 256 : index
    %18 = vector.load %arg3[%c0_15, %c256_16] : memref<1x384xf32, #tpu.memory_space<vmem>>, vector<1x128xf32>
    %19 = vector.broadcast %18 : vector<1x128xf32> to vector<256x128xf32>
    %20 = arith.addf %17, %19 : vector<256x128xf32>
    %21 = arith.truncf %20 : vector<256x128xf32> to vector<256x128xbf16>
    %c0_17 = arith.constant 0 : index
    %c0_18 = arith.constant 0 : index
    %22 = vector.load %arg6[%c0_17, %c0_18] : memref<256x128xbf16, #tpu.memory_space<vmem>>, vector<256x128xbf16>
    tpu.vector_store %arg6[%c0_17, %c0_18], %21 {strides = array<i32>} : memref<256x128xbf16, #tpu.memory_space<vmem>>, vector<256x128xbf16>,
    return
  }
  func.func @transform_0(%arg0: i32) -> (i32, i32) {
    %c0_i32 = arith.constant 0 : i32
    %c0_i32_0 = arith.constant 0 : i32
    return %arg0, %c0_i32 : i32, i32
  }
  func.func @transform_1(%arg0: i32) -> (i32, i32) {
    %c0_i32 = arith.constant 0 : i32
    %c0_i32_0 = arith.constant 0 : i32
    %c0_i32_1 = arith.constant 0 : i32
    return %c0_i32, %c0_i32_0 : i32, i32
  }
  func.func @transform_2(%arg0: i32) -> (i32, i32) {
    %c0_i32 = arith.constant 0 : i32
    %c0_i32_0 = arith.constant 0 : i32
    %c0_i32_1 = arith.constant 0 : i32
    return %c0_i32, %c0_i32_0 : i32, i32
  }
  func.func @transform_3(%arg0: i32) -> (i32, i32) {
    %c0_i32 = arith.constant 0 : i32
    %c0_i32_0 = arith.constant 0 : i32
    return %arg0, %c0_i32 : i32, i32
  }
  func.func @transform_4(%arg0: i32) -> (i32, i32) {
    %c0_i32 = arith.constant 0 : i32
    %c0_i32_0 = arith.constant 0 : i32
    return %arg0, %c0_i32 : i32, i32
  }
  func.func @transform_5(%arg0: i32) -> (i32, i32) {
    %c0_i32 = arith.constant 0 : i32
    %c0_i32_0 = arith.constant 0 : i32
    return %arg0, %c0_i32 : i32, i32
  }
}

module attributes {stable_mosaic.version = 11 : i64} {
  func.func @flash_attn_kernel(%arg0: i32, %arg1: i32, %arg2: i32, %arg3: memref<1x128x128xbf16, #tpu.memory_space<vmem>>, %arg4: memref<1x128x128xbf16, #tpu.memory_space<vmem>>, %arg5: memref<1x128x128xbf16, #tpu.memory_space<vmem>>, %arg6: memref<1x128x128xbf16, #tpu.memory_space<vmem>>, %arg7: memref<128x1xf32, #tpu.memory_space<vmem>>, %arg8: memref<128x1xf32, #tpu.memory_space<vmem>>, %arg9: memref<128x128xf32, #tpu.memory_space<vmem>>) attributes {dimension_semantics = [#tpu.dimension_semantics<parallel>, #tpu.dimension_semantics<parallel>, #tpu.dimension_semantics<arbitrary>], iteration_bounds = array<i64: 2, 1, 1>, scalar_prefetch = 0 : i64, scratch_operands = 3 : i64, tpu.core_type = #tpu.core_type<tc>, window_params = [{transform_indices = @transform_0, window_bounds = array<i64: 1, 128, 128>}, {transform_indices = @transform_1, window_bounds = array<i64: 1, 128, 128>}, {transform_indices = @transform_2, window_bounds = array<i64: 1, 128, 128>}, {transform_indices = @transform_3, window_bounds = array<i64: 1, 128, 128>}]} {
    %c0_i32 = arith.constant 0 : i32
    %0 = arith.cmpi eq, %arg2, %c0_i32 : i32
    %1 = arith.extui %0 : i1 to i32
    %c0_i32_0 = arith.constant 0 : i32
    %2 = arith.cmpi ne, %1, %c0_i32_0 : i32
    scf.if %2 {
      %cst_28 = arith.constant 0xFF800000 : f32
      %37 = vector.broadcast %cst_28 : f32 to vector<128x1xf32>
      %c0_29 = arith.constant 0 : index
      %c0_30 = arith.constant 0 : index
      %38 = vector.load %arg7[%c0_29, %c0_30] : memref<128x1xf32, #tpu.memory_space<vmem>>, vector<128x1xf32>
      tpu.vector_store %arg7[%c0_29, %c0_30], %37 {strides = array<i32>} : memref<128x1xf32, #tpu.memory_space<vmem>>, vector<128x1xf32>,
      %cst_31 = arith.constant 0.000000e+00 : f32
      %39 = vector.broadcast %cst_31 : f32 to vector<128x1xf32>
      %c0_32 = arith.constant 0 : index
      %c0_33 = arith.constant 0 : index
      %40 = vector.load %arg8[%c0_32, %c0_33] : memref<128x1xf32, #tpu.memory_space<vmem>>, vector<128x1xf32>
      tpu.vector_store %arg8[%c0_32, %c0_33], %39 {strides = array<i32>} : memref<128x1xf32, #tpu.memory_space<vmem>>, vector<128x1xf32>,
      %cst_34 = arith.constant 0.000000e+00 : f32
      %41 = vector.broadcast %cst_34 : f32 to vector<128x128xf32>
      %c0_35 = arith.constant 0 : index
      %c0_36 = arith.constant 0 : index
      %42 = vector.load %arg9[%c0_35, %c0_36] : memref<128x128xf32, #tpu.memory_space<vmem>>, vector<128x128xf32>
      tpu.vector_store %arg9[%c0_35, %c0_36], %41 {strides = array<i32>} : memref<128x128xf32, #tpu.memory_space<vmem>>, vector<128x128xf32>,
    } else {
    }
    %c0 = arith.constant 0 : index
    %c0_1 = arith.constant 0 : index
    %c0_2 = arith.constant 0 : index
    %3 = vector.load %arg3[%c0, %c0_1, %c0_2] : memref<1x128x128xbf16, #tpu.memory_space<vmem>>, vector<1x128x128xbf16>
    %4 = vector.shape_cast %3 : vector<1x128x128xbf16> to vector<128x128xbf16>
    %c0_3 = arith.constant 0 : index
    %c0_4 = arith.constant 0 : index
    %c0_5 = arith.constant 0 : index
    %5 = vector.load %arg4[%c0_3, %c0_4, %c0_5] : memref<1x128x128xbf16, #tpu.memory_space<vmem>>, vector<1x128x128xbf16>
    %6 = vector.shape_cast %5 : vector<1x128x128xbf16> to vector<128x128xbf16>
    %c0_6 = arith.constant 0 : index
    %c0_7 = arith.constant 0 : index
    %c0_8 = arith.constant 0 : index
    %7 = vector.load %arg5[%c0_6, %c0_7, %c0_8] : memref<1x128x128xbf16, #tpu.memory_space<vmem>>, vector<1x128x128xbf16>
    %8 = vector.shape_cast %7 : vector<1x128x128xbf16> to vector<128x128xbf16>
    %cst = arith.constant dense<0.000000e+00> : vector<128x128xf32>
    %9 = tpu.matmul %4, %6, %cst {dimension_numbers = #tpu.dot_dimension_numbers<[1], [1], [0], [0], [0, 0, 1, 0], [], []>} : vector<128x128xbf16>, vector<128x128xbf16>, vector<128x128xf32> -> vector<128x128xf32>
    %c0_9 = arith.constant 0 : index
    %c0_10 = arith.constant 0 : index
    %10 = vector.load %arg7[%c0_9, %c0_10] : memref<128x1xf32, #tpu.memory_space<vmem>>, vector<128x1xf32>
    %cst_11 = arith.constant dense<0xFF800000> : vector<128xf32>
    %11 = vector.multi_reduction <maximumf>, %9, %cst_11 [1] : vector<128x128xf32> to vector<128xf32>
    %12 = vector.shape_cast %11 : vector<128xf32> to vector<128x1xf32>
    %13 = arith.maximumf %10, %12 : vector<128x1xf32>
    %c0_12 = arith.constant 0 : index
    %c0_13 = arith.constant 0 : index
    %14 = vector.load %arg7[%c0_12, %c0_13] : memref<128x1xf32, #tpu.memory_space<vmem>>, vector<128x1xf32>
    %15 = arith.subf %14, %13 : vector<128x1xf32>
    %16 = math.exp %15 : vector<128x1xf32>
    %17 = vector.broadcast %13 : vector<128x1xf32> to vector<128x128xf32>
    %18 = arith.subf %9, %17 : vector<128x128xf32>
    %19 = math.exp %18 : vector<128x128xf32>
    %c0_14 = arith.constant 0 : index
    %c0_15 = arith.constant 0 : index
    %20 = vector.load %arg8[%c0_14, %c0_15] : memref<128x1xf32, #tpu.memory_space<vmem>>, vector<128x1xf32>
    %21 = arith.mulf %16, %20 : vector<128x1xf32>
    %cst_16 = arith.constant dense<0.000000e+00> : vector<128xf32>
    %22 = vector.multi_reduction <add>, %19, %cst_16 [1] : vector<128x128xf32> to vector<128xf32>
    %23 = vector.shape_cast %22 : vector<128xf32> to vector<128x1xf32>
    %24 = arith.addf %21, %23 : vector<128x1xf32>
    %c0_17 = arith.constant 0 : index
    %c0_18 = arith.constant 0 : index
    %25 = vector.load %arg8[%c0_17, %c0_18] : memref<128x1xf32, #tpu.memory_space<vmem>>, vector<128x1xf32>
    tpu.vector_store %arg8[%c0_17, %c0_18], %24 {strides = array<i32>} : memref<128x1xf32, #tpu.memory_space<vmem>>, vector<128x1xf32>,
    %c0_19 = arith.constant 0 : index
    %c0_20 = arith.constant 0 : index
    %26 = vector.load %arg9[%c0_19, %c0_20] : memref<128x128xf32, #tpu.memory_space<vmem>>, vector<128x128xf32>
    %27 = vector.broadcast %16 : vector<128x1xf32> to vector<128x128xf32>
    %28 = arith.mulf %27, %26 : vector<128x128xf32>
    %29 = arith.truncf %19 : vector<128x128xf32> to vector<128x128xbf16>
    %cst_21 = arith.constant dense<0.000000e+00> : vector<128x128xf32>
    %30 = tpu.matmul %29, %8, %cst_21 {dimension_numbers = #tpu.dot_dimension_numbers<[1], [0], [0], [1], [0, 0, 1, 1], [], []>} : vector<128x128xbf16>, vector<128x128xbf16>, vector<128x128xf32> -> vector<128x128xf32>
    %31 = arith.addf %28, %30 : vector<128x128xf32>
    %c0_22 = arith.constant 0 : index
    %c0_23 = arith.constant 0 : index
    %32 = vector.load %arg9[%c0_22, %c0_23] : memref<128x128xf32, #tpu.memory_space<vmem>>, vector<128x128xf32>
    tpu.vector_store %arg9[%c0_22, %c0_23], %31 {strides = array<i32>} : memref<128x128xf32, #tpu.memory_space<vmem>>, vector<128x128xf32>,
    %c0_24 = arith.constant 0 : index
    %c0_25 = arith.constant 0 : index
    %33 = vector.load %arg7[%c0_24, %c0_25] : memref<128x1xf32, #tpu.memory_space<vmem>>, vector<128x1xf32>
    tpu.vector_store %arg7[%c0_24, %c0_25], %13 {strides = array<i32>} : memref<128x1xf32, #tpu.memory_space<vmem>>, vector<128x1xf32>,
    %c0_i32_26 = arith.constant 0 : i32
    %34 = arith.cmpi eq, %arg2, %c0_i32_26 : i32
    %35 = arith.extui %34 : i1 to i32
    %c0_i32_27 = arith.constant 0 : i32
    %36 = arith.cmpi ne, %35, %c0_i32_27 : i32
    scf.if %36 {
      %c0_28 = arith.constant 0 : index
      %c0_29 = arith.constant 0 : index
      %37 = vector.load %arg9[%c0_28, %c0_29] : memref<128x128xf32, #tpu.memory_space<vmem>>, vector<128x128xf32>
      %c0_30 = arith.constant 0 : index
      %c0_31 = arith.constant 0 : index
      %38 = vector.load %arg8[%c0_30, %c0_31] : memref<128x1xf32, #tpu.memory_space<vmem>>, vector<128x1xf32>
      %39 = tpu.reciprocal %38 {approx = true} : vector<128x1xf32> -> vector<128x1xf32>
      %40 = vector.broadcast %39 : vector<128x1xf32> to vector<128x128xf32>
      %41 = arith.mulf %37, %40 : vector<128x128xf32>
      %42 = arith.truncf %41 : vector<128x128xf32> to vector<128x128xbf16>
      %c0_32 = arith.constant 0 : index
      %c0_33 = arith.constant 0 : index
      %c0_34 = arith.constant 0 : index
      %43 = vector.load %arg6[%c0_32, %c0_33, %c0_34] : memref<1x128x128xbf16, #tpu.memory_space<vmem>>, vector<1x128x128xbf16>
      %44 = vector.shape_cast %43 : vector<1x128x128xbf16> to vector<128x128xbf16>
      %45 = vector.shape_cast %42 : vector<128x128xbf16> to vector<1x128x128xbf16>
      tpu.vector_store %arg6[%c0_32, %c0_33, %c0_34], %45 {strides = array<i32>} : memref<1x128x128xbf16, #tpu.memory_space<vmem>>, vector<1x128x128xbf16>,
    } else {
    }
    return
  }
  func.func @transform_0(%arg0: i32, %arg1: i32, %arg2: i32) -> (i32, i32, i32) {
    %c0_i32 = arith.constant 0 : i32
    %c0_i32_0 = arith.constant 0 : i32
    return %arg0, %arg1, %c0_i32 : i32, i32, i32
  }
  func.func @transform_1(%arg0: i32, %arg1: i32, %arg2: i32) -> (i32, i32, i32) {
    %c0_i32 = arith.constant 0 : i32
    %c0_i32_0 = arith.constant 0 : i32
    return %arg0, %arg2, %c0_i32 : i32, i32, i32
  }
  func.func @transform_2(%arg0: i32, %arg1: i32, %arg2: i32) -> (i32, i32, i32) {
    %c0_i32 = arith.constant 0 : i32
    %c0_i32_0 = arith.constant 0 : i32
    return %arg0, %arg2, %c0_i32 : i32, i32, i32
  }
  func.func @transform_3(%arg0: i32, %arg1: i32, %arg2: i32) -> (i32, i32, i32) {
    %c0_i32 = arith.constant 0 : i32
    %c0_i32_0 = arith.constant 0 : i32
    return %arg0, %arg1, %c0_i32 : i32, i32, i32
  }
}

module attributes {stable_mosaic.version = 11 : i64} {
  func.func @epilogue_kernel(%arg0: i32, %arg1: memref<256x128xf32, #tpu.memory_space<vmem>>, %arg2: memref<256x128xbf16, #tpu.memory_space<vmem>>, %arg3: memref<128x128xbf16, #tpu.memory_space<vmem>>, %arg4: memref<1x128xf32, #tpu.memory_space<vmem>>, %arg5: memref<128x256xbf16, #tpu.memory_space<vmem>>, %arg6: memref<1x256xf32, #tpu.memory_space<vmem>>, %arg7: memref<256x128xbf16, #tpu.memory_space<vmem>>, %arg8: memref<1x128xf32, #tpu.memory_space<vmem>>, %arg9: memref<1x128xf32, #tpu.memory_space<vmem>>, %arg10: memref<1x128xf32, #tpu.memory_space<vmem>>, %arg11: memref<1x128xf32, #tpu.memory_space<vmem>>, %arg12: memref<1x128xf32, #tpu.memory_space<vmem>>, %arg13: memref<256x128xf32, #tpu.memory_space<vmem>>) attributes {dimension_semantics = [#tpu.dimension_semantics<parallel>], iteration_bounds = array<i64: 1>, scalar_prefetch = 0 : i64, scratch_operands = 0 : i64, tpu.core_type = #tpu.core_type<tc>, window_params = [{transform_indices = @transform_0, window_bounds = array<i64: 256, 128>}, {transform_indices = @transform_1, window_bounds = array<i64: 256, 128>}, {pipeline_mode = #tpu.pipeline_mode<synchronous>, transform_indices = @transform_2, window_bounds = array<i64: 128, 128>}, {pipeline_mode = #tpu.pipeline_mode<synchronous>, transform_indices = @transform_3, window_bounds = array<i64: 1, 128>}, {pipeline_mode = #tpu.pipeline_mode<synchronous>, transform_indices = @transform_4, window_bounds = array<i64: 128, 256>}, {pipeline_mode = #tpu.pipeline_mode<synchronous>, transform_indices = @transform_5, window_bounds = array<i64: 1, 256>}, {pipeline_mode = #tpu.pipeline_mode<synchronous>, transform_indices = @transform_6, window_bounds = array<i64: 256, 128>}, {pipeline_mode = #tpu.pipeline_mode<synchronous>, transform_indices = @transform_7, window_bounds = array<i64: 1, 128>}, {pipeline_mode = #tpu.pipeline_mode<synchronous>, transform_indices = @transform_8, window_bounds = array<i64: 1, 128>}, {pipeline_mode = #tpu.pipeline_mode<synchronous>, transform_indices = @transform_9, window_bounds = array<i64: 1, 128>}, {pipeline_mode = #tpu.pipeline_mode<synchronous>, transform_indices = @transform_10, window_bounds = array<i64: 1, 128>}, {pipeline_mode = #tpu.pipeline_mode<synchronous>, transform_indices = @transform_11, window_bounds = array<i64: 1, 128>}, {transform_indices = @transform_12, window_bounds = array<i64: 256, 128>}]} {
    %c0 = arith.constant 0 : index
    %c0_0 = arith.constant 0 : index
    %0 = vector.load %arg1[%c0, %c0_0] : memref<256x128xf32, #tpu.memory_space<vmem>>, vector<256x128xf32>
    %c0_1 = arith.constant 0 : index
    %c0_2 = arith.constant 0 : index
    %1 = vector.load %arg2[%c0_1, %c0_2] : memref<256x128xbf16, #tpu.memory_space<vmem>>, vector<256x128xbf16>
    %c0_3 = arith.constant 0 : index
    %c0_4 = arith.constant 0 : index
    %2 = vector.load %arg3[%c0_3, %c0_4] : memref<128x128xbf16, #tpu.memory_space<vmem>>, vector<128x128xbf16>
    %cst = arith.constant dense<0.000000e+00> : vector<256x128xf32>
    %3 = tpu.matmul %1, %2, %cst {dimension_numbers = #tpu.dot_dimension_numbers<[1], [0], [0], [1], [0, 0, 1, 1], [], []>} : vector<256x128xbf16>, vector<128x128xbf16>, vector<256x128xf32> -> vector<256x128xf32>
    %c0_5 = arith.constant 0 : index
    %c0_6 = arith.constant 0 : index
    %4 = vector.load %arg4[%c0_5, %c0_6] : memref<1x128xf32, #tpu.memory_space<vmem>>, vector<1x128xf32>
    %5 = vector.broadcast %4 : vector<1x128xf32> to vector<256x128xf32>
    %6 = arith.addf %3, %5 : vector<256x128xf32>
    %7 = arith.addf %0, %6 : vector<256x128xf32>
    %c0_7 = arith.constant 0 : index
    %c0_8 = arith.constant 0 : index
    %8 = vector.load %arg9[%c0_7, %c0_8] : memref<1x128xf32, #tpu.memory_space<vmem>>, vector<1x128xf32>
    %c0_9 = arith.constant 0 : index
    %c0_10 = arith.constant 0 : index
    %9 = vector.load %arg10[%c0_9, %c0_10] : memref<1x128xf32, #tpu.memory_space<vmem>>, vector<1x128xf32>
    %cst_11 = arith.constant dense<0.000000e+00> : vector<256xf32>
    %10 = vector.multi_reduction <add>, %7, %cst_11 [1] : vector<256x128xf32> to vector<256xf32>
    %11 = vector.shape_cast %10 : vector<256xf32> to vector<256x1xf32>
    %cst_12 = arith.constant 1.280000e+02 : f32
    %12 = vector.broadcast %cst_12 : f32 to vector<256x1xf32>
    %13 = arith.divf %11, %12 : vector<256x1xf32>
    %14 = vector.broadcast %13 : vector<256x1xf32> to vector<256x128xf32>
    %15 = arith.subf %7, %14 : vector<256x128xf32>
    %16 = arith.mulf %15, %15 : vector<256x128xf32>
    %cst_13 = arith.constant dense<0.000000e+00> : vector<256xf32>
    %17 = vector.multi_reduction <add>, %16, %cst_13 [1] : vector<256x128xf32> to vector<256xf32>
    %18 = vector.shape_cast %17 : vector<256xf32> to vector<256x1xf32>
    %cst_14 = arith.constant 1.280000e+02 : f32
    %19 = vector.broadcast %cst_14 : f32 to vector<256x1xf32>
    %20 = arith.divf %18, %19 : vector<256x1xf32>
    %21 = vector.broadcast %13 : vector<256x1xf32> to vector<256x128xf32>
    %22 = arith.subf %7, %21 : vector<256x128xf32>
    %cst_15 = arith.constant 9.99999974E-6 : f32
    %23 = vector.broadcast %cst_15 : f32 to vector<256x1xf32>
    %24 = arith.addf %20, %23 : vector<256x1xf32>
    %25 = math.rsqrt %24 : vector<256x1xf32>
    %26 = vector.broadcast %25 : vector<256x1xf32> to vector<256x128xf32>
    %27 = arith.mulf %22, %26 : vector<256x128xf32>
    %28 = vector.broadcast %8 : vector<1x128xf32> to vector<256x128xf32>
    %29 = arith.mulf %27, %28 : vector<256x128xf32>
    %30 = vector.broadcast %9 : vector<1x128xf32> to vector<256x128xf32>
    %31 = arith.addf %29, %30 : vector<256x128xf32>
    %32 = arith.truncf %31 : vector<256x128xf32> to vector<256x128xbf16>
    %c0_16 = arith.constant 0 : index
    %c0_17 = arith.constant 0 : index
    %33 = vector.load %arg5[%c0_16, %c0_17] : memref<128x256xbf16, #tpu.memory_space<vmem>>, vector<128x256xbf16>
    %cst_18 = arith.constant dense<0.000000e+00> : vector<256x256xf32>
    %34 = tpu.matmul %32, %33, %cst_18 {dimension_numbers = #tpu.dot_dimension_numbers<[1], [0], [0], [1], [0, 0, 1, 1], [], []>} : vector<256x128xbf16>, vector<128x256xbf16>, vector<256x256xf32> -> vector<256x256xf32>
    %c0_19 = arith.constant 0 : index
    %c0_20 = arith.constant 0 : index
    %35 = vector.load %arg6[%c0_19, %c0_20] : memref<1x256xf32, #tpu.memory_space<vmem>>, vector<1x256xf32>
    %36 = vector.broadcast %35 : vector<1x256xf32> to vector<256x256xf32>
    %37 = arith.addf %34, %36 : vector<256x256xf32>
    %38 = arith.mulf %37, %37 : vector<256x256xf32>
    %39 = arith.mulf %37, %38 : vector<256x256xf32>
    %cst_21 = arith.constant 4.471500e-02 : f32
    %40 = vector.broadcast %cst_21 : f32 to vector<256x256xf32>
    %41 = arith.mulf %40, %39 : vector<256x256xf32>
    %42 = arith.addf %37, %41 : vector<256x256xf32>
    %cst_22 = arith.constant 0.797884583 : f32
    %43 = vector.broadcast %cst_22 : f32 to vector<256x256xf32>
    %44 = arith.mulf %43, %42 : vector<256x256xf32>
    %45 = math.tanh %44 : vector<256x256xf32>
    %cst_23 = arith.constant 1.000000e+00 : f32
    %46 = vector.broadcast %cst_23 : f32 to vector<256x256xf32>
    %47 = arith.addf %46, %45 : vector<256x256xf32>
    %cst_24 = arith.constant 5.000000e-01 : f32
    %48 = vector.broadcast %cst_24 : f32 to vector<256x256xf32>
    %49 = arith.mulf %48, %47 : vector<256x256xf32>
    %50 = arith.mulf %37, %49 : vector<256x256xf32>
    %51 = arith.truncf %50 : vector<256x256xf32> to vector<256x256xbf16>
    %c0_25 = arith.constant 0 : index
    %c0_26 = arith.constant 0 : index
    %52 = vector.load %arg7[%c0_25, %c0_26] : memref<256x128xbf16, #tpu.memory_space<vmem>>, vector<256x128xbf16>
    %cst_27 = arith.constant dense<0.000000e+00> : vector<256x128xf32>
    %53 = tpu.matmul %51, %52, %cst_27 {dimension_numbers = #tpu.dot_dimension_numbers<[1], [0], [0], [1], [0, 0, 1, 1], [], []>} : vector<256x256xbf16>, vector<256x128xbf16>, vector<256x128xf32> -> vector<256x128xf32>
    %c0_28 = arith.constant 0 : index
    %c0_29 = arith.constant 0 : index
    %54 = vector.load %arg8[%c0_28, %c0_29] : memref<1x128xf32, #tpu.memory_space<vmem>>, vector<1x128xf32>
    %55 = vector.broadcast %54 : vector<1x128xf32> to vector<256x128xf32>
    %56 = arith.addf %53, %55 : vector<256x128xf32>
    %57 = arith.addf %31, %56 : vector<256x128xf32>
    %c0_30 = arith.constant 0 : index
    %c0_31 = arith.constant 0 : index
    %58 = vector.load %arg11[%c0_30, %c0_31] : memref<1x128xf32, #tpu.memory_space<vmem>>, vector<1x128xf32>
    %c0_32 = arith.constant 0 : index
    %c0_33 = arith.constant 0 : index
    %59 = vector.load %arg12[%c0_32, %c0_33] : memref<1x128xf32, #tpu.memory_space<vmem>>, vector<1x128xf32>
    %cst_34 = arith.constant dense<0.000000e+00> : vector<256xf32>
    %60 = vector.multi_reduction <add>, %57, %cst_34 [1] : vector<256x128xf32> to vector<256xf32>
    %61 = vector.shape_cast %60 : vector<256xf32> to vector<256x1xf32>
    %cst_35 = arith.constant 1.280000e+02 : f32
    %62 = vector.broadcast %cst_35 : f32 to vector<256x1xf32>
    %63 = arith.divf %61, %62 : vector<256x1xf32>
    %64 = vector.broadcast %63 : vector<256x1xf32> to vector<256x128xf32>
    %65 = arith.subf %57, %64 : vector<256x128xf32>
    %66 = arith.mulf %65, %65 : vector<256x128xf32>
    %cst_36 = arith.constant dense<0.000000e+00> : vector<256xf32>
    %67 = vector.multi_reduction <add>, %66, %cst_36 [1] : vector<256x128xf32> to vector<256xf32>
    %68 = vector.shape_cast %67 : vector<256xf32> to vector<256x1xf32>
    %cst_37 = arith.constant 1.280000e+02 : f32
    %69 = vector.broadcast %cst_37 : f32 to vector<256x1xf32>
    %70 = arith.divf %68, %69 : vector<256x1xf32>
    %71 = vector.broadcast %63 : vector<256x1xf32> to vector<256x128xf32>
    %72 = arith.subf %57, %71 : vector<256x128xf32>
    %cst_38 = arith.constant 9.99999974E-6 : f32
    %73 = vector.broadcast %cst_38 : f32 to vector<256x1xf32>
    %74 = arith.addf %70, %73 : vector<256x1xf32>
    %75 = math.rsqrt %74 : vector<256x1xf32>
    %76 = vector.broadcast %75 : vector<256x1xf32> to vector<256x128xf32>
    %77 = arith.mulf %72, %76 : vector<256x128xf32>
    %78 = vector.broadcast %58 : vector<1x128xf32> to vector<256x128xf32>
    %79 = arith.mulf %77, %78 : vector<256x128xf32>
    %80 = vector.broadcast %59 : vector<1x128xf32> to vector<256x128xf32>
    %81 = arith.addf %79, %80 : vector<256x128xf32>
    %c0_39 = arith.constant 0 : index
    %c0_40 = arith.constant 0 : index
    %82 = vector.load %arg13[%c0_39, %c0_40] : memref<256x128xf32, #tpu.memory_space<vmem>>, vector<256x128xf32>
    tpu.vector_store %arg13[%c0_39, %c0_40], %81 {strides = array<i32>} : memref<256x128xf32, #tpu.memory_space<vmem>>, vector<256x128xf32>,
    return
  }
  func.func @transform_0(%arg0: i32) -> (i32, i32) {
    %c0_i32 = arith.constant 0 : i32
    %c0_i32_0 = arith.constant 0 : i32
    return %arg0, %c0_i32 : i32, i32
  }
  func.func @transform_1(%arg0: i32) -> (i32, i32) {
    %c0_i32 = arith.constant 0 : i32
    %c0_i32_0 = arith.constant 0 : i32
    return %arg0, %c0_i32 : i32, i32
  }
  func.func @transform_2(%arg0: i32) -> (i32, i32) {
    %c0_i32 = arith.constant 0 : i32
    %c0_i32_0 = arith.constant 0 : i32
    %c0_i32_1 = arith.constant 0 : i32
    return %c0_i32, %c0_i32_0 : i32, i32
  }
  func.func @transform_3(%arg0: i32) -> (i32, i32) {
    %c0_i32 = arith.constant 0 : i32
    %c0_i32_0 = arith.constant 0 : i32
    %c0_i32_1 = arith.constant 0 : i32
    return %c0_i32, %c0_i32_0 : i32, i32
  }
  func.func @transform_4(%arg0: i32) -> (i32, i32) {
    %c0_i32 = arith.constant 0 : i32
    %c0_i32_0 = arith.constant 0 : i32
    %c0_i32_1 = arith.constant 0 : i32
    return %c0_i32, %c0_i32_0 : i32, i32
  }
  func.func @transform_5(%arg0: i32) -> (i32, i32) {
    %c0_i32 = arith.constant 0 : i32
    %c0_i32_0 = arith.constant 0 : i32
    %c0_i32_1 = arith.constant 0 : i32
    return %c0_i32, %c0_i32_0 : i32, i32
  }
  func.func @transform_6(%arg0: i32) -> (i32, i32) {
    %c0_i32 = arith.constant 0 : i32
    %c0_i32_0 = arith.constant 0 : i32
    %c0_i32_1 = arith.constant 0 : i32
    return %c0_i32, %c0_i32_0 : i32, i32
  }
  func.func @transform_7(%arg0: i32) -> (i32, i32) {
    %c0_i32 = arith.constant 0 : i32
    %c0_i32_0 = arith.constant 0 : i32
    %c0_i32_1 = arith.constant 0 : i32
    return %c0_i32, %c0_i32_0 : i32, i32
  }
  func.func @transform_8(%arg0: i32) -> (i32, i32) {
    %c0_i32 = arith.constant 0 : i32
    %c0_i32_0 = arith.constant 0 : i32
    %c0_i32_1 = arith.constant 0 : i32
    return %c0_i32, %c0_i32_0 : i32, i32
  }
  func.func @transform_9(%arg0: i32) -> (i32, i32) {
    %c0_i32 = arith.constant 0 : i32
    %c0_i32_0 = arith.constant 0 : i32
    %c0_i32_1 = arith.constant 0 : i32
    return %c0_i32, %c0_i32_0 : i32, i32
  }
  func.func @transform_10(%arg0: i32) -> (i32, i32) {
    %c0_i32 = arith.constant 0 : i32
    %c0_i32_0 = arith.constant 0 : i32
    %c0_i32_1 = arith.constant 0 : i32
    return %c0_i32, %c0_i32_0 : i32, i32
  }
  func.func @transform_11(%arg0: i32) -> (i32, i32) {
    %c0_i32 = arith.constant 0 : i32
    %c0_i32_0 = arith.constant 0 : i32
    %c0_i32_1 = arith.constant 0 : i32
    return %c0_i32, %c0_i32_0 : i32, i32
  }
  func.func @transform_12(%arg0: i32) -> (i32, i32) {
    %c0_i32 = arith.constant 0 : i32
    %c0_i32_0 = arith.constant 0 : i32
    return %arg0, %c0_i32 : i32, i32
  }
}

</mosaic_0001>

<bundles_post_ra>
// kernel: _forward.4
= control target key start
LH: loop header
LB: loop body
LE: loop exit
PB: predicated region body
PF: predicated region fallthrough
CT: control target
= control target key end

     0   :  { %s2001_s12 = smov 0   ;;  %s2003_s13 = smov 0   ;;  %s2480_s0 = inlined_call_operand.vmem [shape: bf16[2,128,128], index: 0, kind: input, shape index: {}]   ;;  %s2481_s1 = inlined_call_operand.vmem [shape: bf16[2,128,128], index: 1, kind: input, shape index: {}]   ;;  %s2482_s2 = inlined_call_operand.vmem [shape: bf16[2,128,128], index: 2, kind: input, shape index: {}]   ;;  %s2483_s3 = inlined_call_operand.vmem [shape: bf16[2,128,128], index: 3, kind: output, shape index: {}]  }
   0x1   :  { %s2005_s14 = smov 0  }
   0x2 LB: > { %s32_s15 = sadd.s32 1, %s1972_s13  ;;  %p1591_p0 = scmp.ge.s32.totalorder %s1976_s14, 1  ;;  %s1976_s14 = sphi %s2005_s14, %s13_s14   ;;  %s1972_s13 = sphi %s2003_s13, %s2499_s13   ;;  %s1968_s12 = sphi %s2001_s12, %s2498_s12  }
   0x3   : > { %p34_p1 = scmp.ge.s32.totalorder %s32_s15, 2  ;;  %p199_p2 = scmp.lt.s32.totalorder %s1976_s14, 3 }
   0x5   : > { %s2501_s15 = smov (%p34_p1, %s32_s15), 0  ;;  %p200_p3 = pnand %p1591_p0, %p199_p2 }
   0x6   : > { %p250_p4 = scmp.lt.s32.totalorder (!%p200_p3), %s1968_s12, 1  ;;  %vm294_vm0 = vcmask (!%p200_p3), 7168   ;;  %v1978_v16 = vmov (!%p200_p3), -inf   ;;  %v1979_v26 = vmov (!%p200_p3), 0   ;;  %v1980_v31 = vmov (!%p200_p3), 0.0  }
   0x7   : > { %203 = sbr.rel (%p200_p3) target bundleno = 927 (0x39f), region = 32  ;;  %297 = vst.msk [vmem:[#allocation2 + $0x10] sm:$0xff] (!%p200_p3), %vm294_vm0, %v1978_v16  ;;  %295 = vst.msk [vmem:[#allocation2] sm:$0xff] (!%p200_p3), %vm294_vm0, %v1978_v16  ;;  %1833 = vset.pattern.permute.xlu1 (!%p200_p3), %v1979_v26  ;;  %1832 = vset.pattern.permute.xlu0 (!%p200_p3), %v1979_v26 }
   0x8   : > { %296 = vst.msk [vmem:[#allocation2 + $0x8] sm:$0xff] (!%p200_p3), %vm294_vm0, %v1978_v16  ;;  %298 = vst.msk [vmem:[#allocation2 + $0x18] sm:$0xff] (!%p200_p3), %vm294_vm0, %v1978_v16 }
   0x9   : > { %299 = vst.msk [vmem:[#allocation2 + $0x20] sm:$0xff] (!%p200_p3), %vm294_vm0, %v1978_v16  ;;  %300 = vst.msk [vmem:[#allocation2 + $0x28] sm:$0xff] (!%p200_p3), %vm294_vm0, %v1978_v16 }
   0xa   : > { %301 = vst.msk [vmem:[#allocation2 + $0x30] sm:$0xff] (!%p200_p3), %vm294_vm0, %v1978_v16  ;;  %302 = vst.msk [vmem:[#allocation2 + $0x38] sm:$0xff] (!%p200_p3), %vm294_vm0, %v1978_v16 }
   0xb   : > { %303 = vst.msk [vmem:[#allocation2 + $0x40] sm:$0xff] (!%p200_p3), %vm294_vm0, %v1978_v16  ;;  %304 = vst.msk [vmem:[#allocation2 + $0x48] sm:$0xff] (!%p200_p3), %vm294_vm0, %v1978_v16 }
   0xc   : > { %305 = vst.msk [vmem:[#allocation2 + $0x50] sm:$0xff] (!%p200_p3), %vm294_vm0, %v1978_v16  ;;  %306 = vst.msk [vmem:[#allocation2 + $0x58] sm:$0xff] (!%p200_p3), %vm294_vm0, %v1978_v16 }
   0xd   : > { %307 = vst.msk [vmem:[#allocation2 + $0x60] sm:$0xff] (!%p200_p3), %vm294_vm0, %v1978_v16  ;;  %308 = vst.msk [vmem:[#allocation2 + $0x68] sm:$0xff] (!%p200_p3), %vm294_vm0, %v1978_v16 }
   0xe   : > { %s2503_s12 = smov (!%p250_p4, %s1968_s12), 1  ;;  %309 = vst.msk [vmem:[#allocation2 + $0x70] sm:$0xff] %vm294_vm0, %v1978_v16  ;;  %310 = vst.msk [vmem:[#allocation2 + $0x78] sm:$0xff] %vm294_vm0, %v1978_v16  ;;  %v2127_v37 = vld [vmem:[#allocation2 + $0x10] sm:$0xff]  ;;  %v2129_v38 = vld [vmem:[#allocation2] sm:$0xff] }
   0xf   : > { %s2019_s16 = sshll.u32 %s2503_s12, 6  ;;  %313 = vst.msk [vmem:[#allocation3 + $0x10] sm:$0xff] %vm294_vm0, %v1980_v31  ;;  %311 = vst.msk [vmem:[#allocation3] sm:$0xff] %vm294_vm0, %v1980_v31  ;;  %v2137_v43 = vld [vmem:[#allocation2 + $0x18] sm:$0xff]  ;;  %v2144_v45 = vld [vmem:[#allocation2 + $0x8] sm:$0xff] }
  0x10   : > { %s267_s19 = scalar_lea.vmem %s2481_s1, %s2019_s16  ;;  %s2029_s22 = scalar_lea.vmem %s2480_s0, %s2019_s16  ;;  %312 = vst.msk [vmem:[#allocation3 + $0x8] sm:$0xff] %vm294_vm0, %v1980_v31  ;;  %314 = vst.msk [vmem:[#allocation3 + $0x18] sm:$0xff] %vm294_vm0, %v1980_v31  ;;  %v2163_v53 = vld [vmem:[#allocation2 + $0x20] sm:$0xff] }
  0x11   : > { %v1834_v0 = vld [vmem:[%s267_s19] sm:$0xff]   ;;  %v1835_v1 = vld [vmem:[%s267_s19 + $0x8] sm:$0xff]   ;;  %v1836_v2 = vld [vmem:[%s267_s19 + $0x10] sm:$0xff]   ;;  %315 = vst.msk [vmem:[#allocation3 + $0x20] sm:$0xff] %vm294_vm0, %v1980_v31  ;;  %s2123_s25 = scalar_lea.vmem %s2482_s2, %s2019_s16  ;;  %s2449_s28 = scalar_lea.vmem %s2483_s3, %s2019_s16 }
  0x12   : > { %1741 = vmatprep.subr.bf16.mxu0 %v1834_v0  ;;  %v1842_v3 = vld [vmem:[%s2029_s22] sm:$0xff]   ;;  %v1837_v4 = vld [vmem:[%s267_s19 + $0x18] sm:$0xff]   ;;  %v1839_v6 = vld [vmem:[%s267_s19 + $0x28] sm:$0xff]   ;;  %316 = vst.msk [vmem:[#allocation3 + $0x28] sm:$0xff] %vm294_vm0, %v1980_v31 }
  0x13   : > { %1742 = vmatpush3.bf16.xpose.msra.mxu0 %v1834_v0  ;;  %1757 = vmatprep.mubr.bf16.mxu0 %v1842_v3  ;;  %v1838_v5 = vld [vmem:[%s267_s19 + $0x20] sm:$0xff]   ;;  %v1840_v7 = vld [vmem:[%s267_s19 + $0x30] sm:$0xff]   ;;  %v1841_v8 = vld [vmem:[%s267_s19 + $0x38] sm:$0xff]   ;;  %317 = vst.msk [vmem:[#allocation3 + $0x30] sm:$0xff] %vm294_vm0, %v1980_v31 }
  0x14   : > { %1743 = vmatprep.subr.bf16.mxu0 %v1835_v1  ;;  %v1843_v9 = vld [vmem:[%s2029_s22 + $0x8] sm:$0xff]   ;;  %v1844_v10 = vld [vmem:[%s2029_s22 + $0x10] sm:$0xff]   ;;  %v1845_v11 = vld [vmem:[%s2029_s22 + $0x18] sm:$0xff]   ;;  %318 = vst.msk [vmem:[#allocation3 + $0x38] sm:$0xff] %vm294_vm0, %v1980_v31 }
  0x15   : > { %v1846_v12 = vld [vmem:[%s2029_s22 + $0x20] sm:$0xff]   ;;  %v1847_v13 = vld [vmem:[%s2029_s22 + $0x28] sm:$0xff]   ;;  %v1848_v14 = vld [vmem:[%s2029_s22 + $0x30] sm:$0xff]   ;;  %319 = vst.msk [vmem:[#allocation3 + $0x40] sm:$0xff] %vm294_vm0, %v1980_v31 }
  0x16   : > { %v1849_v15 = vld [vmem:[%s2029_s22 + $0x38] sm:$0xff]   ;;  %320 = vst.msk [vmem:[#allocation3 + $0x48] sm:$0xff] %vm294_vm0, %v1980_v31  ;;  %321 = vst.msk [vmem:[#allocation3 + $0x50] sm:$0xff] %vm294_vm0, %v1980_v31  ;;  %v1850_v35 = vld [vmem:[%s2123_s25] sm:$0xff]  }
  0x17   : > { %322 = vst.msk [vmem:[#allocation3 + $0x58] sm:$0xff] %vm294_vm0, %v1980_v31  ;;  %323 = vst.msk [vmem:[#allocation3 + $0x60] sm:$0xff] %vm294_vm0, %v1980_v31  ;;  %v1851_v36 = vld [vmem:[%s2123_s25 + $0x8] sm:$0xff]   ;;  %1773 = vmatprep.subr.bf16.mxu1 %v1850_v35  ;;  %v1852_v46 = vld [vmem:[%s2123_s25 + $0x10] sm:$0xff]  }
  0x18   : > { %324 = vst.msk [vmem:[#allocation3 + $0x68] sm:$0xff] %vm294_vm0, %v1980_v31  ;;  %325 = vst.msk [vmem:[#allocation3 + $0x70] sm:$0xff] %vm294_vm0, %v1980_v31  ;;  %1774 = vmatpush3.bf16.msra.mxu1 %v1850_v35  ;;  %v1853_v54 = vld [vmem:[%s2123_s25 + $0x18] sm:$0xff]   ;;  %v2179_v61 = vld [vmem:[#allocation2 + $0x30] sm:$0xff] }
  0x19   : > { %326 = vst.msk [vmem:[#allocation3 + $0x78] sm:$0xff] %vm294_vm0, %v1980_v31  ;;  %1775 = vmatprep.subr.bf16.mxu1 %v1851_v36  ;;  %v2170_v56 = vld [vmem:[#allocation2 + $0x38] sm:$0xff]  ;;  %v1854_v62 = vld [vmem:[%s2123_s25 + $0x20] sm:$0xff]   ;;  %v2186_v0 = vld [vmem:[#allocation2 + $0x28] sm:$0xff] }
  0x1a   : > { %v1856_v16 = vld [vmem:[%s2123_s25 + $0x30] sm:$0xff]   ;;  %v2226_v31 = vld [vmem:[#allocation2 + $0x48] sm:$0xff] }
  0x1b   : > { %1744 = vmatpush3.bf16.xpose.msra.mxu0 %v1835_v1 }
  0x1c   : > { %1745 = vmatprep.subr.bf16.mxu0 %v1836_v2  ;;  %1776 = vmatpush3.bf16.msra.mxu1 %v1851_v36 }
  0x1d   : > { %1777 = vmatprep.subr.bf16.mxu1 %v1852_v46 }
  0x20   : > { %1778 = vmatpush3.bf16.msra.mxu1 %v1852_v46 }
  0x21   : > { %1779 = vmatprep.subr.bf16.mxu1 %v1853_v54 }
  0x23   : > { %1746 = vmatpush3.bf16.xpose.msra.mxu0 %v1836_v2 }
  0x24   : > { %1747 = vmatprep.subr.bf16.mxu0 %v1837_v4  ;;  %1780 = vmatpush3.bf16.msra.mxu1 %v1853_v54 }
  0x25   : > { %1781 = vmatprep.subr.bf16.mxu1 %v1854_v62 }
  0x28   : > { %1782 = vmatpush3.bf16.msra.mxu1 %v1854_v62 }
  0x2b   : > { %1748 = vmatpush3.bf16.xpose.msra.mxu0 %v1837_v4 }
  0x2c   : > { %1749 = vmatprep.subr.bf16.mxu0 %v1838_v5 }
  0x33   : > { %1750 = vmatpush3.bf16.xpose.msra.mxu0 %v1838_v5 }
  0x34   : > { %1751 = vmatprep.subr.bf16.mxu0 %v1839_v6 }
  0x3b   : > { %1752 = vmatpush3.bf16.xpose.msra.mxu0 %v1839_v6  ;;  %v2198_v6 = vld [vmem:[#allocation2 + $0x40] sm:$0xff] }
  0x3c   : > { %1753 = vmatprep.subr.bf16.mxu0 %v1840_v7 }
  0x43   : > { %1754 = vmatpush3.bf16.xpose.msra.mxu0 %v1840_v7  ;;  %v1855_v7 = vld [vmem:[%s2123_s25 + $0x28] sm:$0xff]  }
  0x44   : > { %1755 = vmatprep.subr.bf16.mxu0 %v1841_v8  ;;  %1783 = vmatprep.subr.bf16.mxu1 %v1855_v7 }
  0x45   : > { %1784 = vmatpush3.bf16.msra.mxu1 %v1855_v7 }
  0x46   : > { %1785 = vmatprep.subr.bf16.mxu1 %v1856_v16 }
  0x49   : > { %1786 = vmatpush3.bf16.msra.mxu1 %v1856_v16  ;;  %v2266_v16 = vld [vmem:[#allocation2 + $0x68] sm:$0xff] }
  0x4b   : > { %1756 = vmatpush3.bf16.xpose.msra.mxu0 %v1841_v8 }
  0x52   : > { %1758 = vmatmul.mubr.bf16.vlgmr.msra.gmra.mrb[0].mxu0 %v1843_v9  ;;  %v2206_v9 = vld [vmem:[#allocation2 + $0x58] sm:$0xff] }
  0x53   : > { %1761 = vmatprep.mubr.bf16.mxu0 %v1844_v10 }
  0x5a   : > { %1762 = vmatmul.mubr.bf16.gmra.mrb[4].mxu0 %v1845_v11 }
  0x5b   : > { %1765 = vmatprep.mubr.bf16.mxu0 %v1846_v12 }
  0x62   : > { %1766 = vmatmul.mubr.bf16.gmra.mrb[8].mxu0 %v1847_v13 }
  0x63   : > { %1769 = vmatprep.mubr.bf16.mxu0 %v1848_v14 }
  0x6a   : > { %1770 = vmatmul.mubr.bf16.gmra.mrb[12].mxu0 %v1849_v15  ;;  %v2218_v15 = vld [vmem:[#allocation2 + $0x50] sm:$0xff] }
 0x125   : > { %v2055_v17 = vpop.f32.mrb[0].mxu0 }
 0x126   : > { %604 = vmax.xlane.f32.xlu1 %v2055_v17  ;;  %v2058_v18 = vpop.f32.mrb[1].mxu0 }
 0x127   : > { %600 = vmax.xlane.f32.xlu0 %v2058_v18  ;;  %v2061_v19 = vpop.f32.mrb[2].mxu0 }
 0x128   : > { %v2063_v20 = vpop.f32.mrb[3].mxu0 }
 0x12a   : > { %606 = vmax.xlane.f32.xlu1 %v2061_v19 }
 0x12b   : > { %602 = vmax.xlane.f32.xlu0 %v2063_v20 }
 0x12d   : > { %v2067_v21 = vpop.f32.mrb[4].mxu0 }
 0x12e   : > { %v2069_v22 = vpop.f32.mrb[5].mxu0 }
 0x12f   : > { %608 = vmax.xlane.f32.xlu0 %v2069_v22  ;;  %v2072_v23 = vpop.f32.mrb[6].mxu0 }
 0x130   : > { %614 = vmax.xlane.f32.xlu1 %v2072_v23  ;;  %v2075_v24 = vpop.f32.mrb[7].mxu0 }
 0x133   : > { %612 = vmax.xlane.f32.xlu0 %v2067_v21 }
 0x134   : > { %610 = vmax.xlane.f32.xlu1 %v2075_v24 }
 0x135   : > { %v2079_v25 = vpop.f32.mrb[8].mxu0 }
 0x136   : > { %v2081_v27 = vpop.f32.mrb[9].mxu0 }
 0x137   : > { %v2083_v28 = vpop.f32.mrb[10].mxu0  ;;  %616 = vmax.xlane.f32.xlu0 %v2081_v27 }
 0x138   : > { %622 = vmax.xlane.f32.xlu1 %v2083_v28  ;;  %v2087_v29 = vpop.f32.mrb[11].mxu0 }
 0x13b   : > { %620 = vmax.xlane.f32.xlu0 %v2079_v25 }
 0x13c   : > { %618 = vmax.xlane.f32.xlu1 %v2087_v29 }
 0x13d   : > { %v2091_v30 = vpop.f32.mrb[12].mxu0 }
 0x13e   : > { %v2109_v32 = vpop.f32.mrb[13].mxu0 }
 0x13f   : > { %v2111_v33 = vpop.f32.mrb[14].mxu0  ;;  %624 = vmax.xlane.f32.xlu0 %v2109_v32 }
 0x140   : > { %630 = vmax.xlane.f32.xlu1 %v2111_v33  ;;  %v2115_v34 = vpop.f32.mrb[15].mxu0 }
 0x143   : > { %628 = vmax.xlane.f32.xlu0 %v2091_v30 }
 0x144   : > { %626 = vmax.xlane.f32.xlu1 %v2115_v34 }
 0x1b3   : > { %v605_v39 = vpop.xlane.xlu1 %604 }
 0x1b4   : > { %v2132_v40 = vmax.f32 %v2127_v37, %v605_v39  ;;  %v601_v41 = vpop.xlane.xlu0 %600 }
 0x1b5   : > { %v2135_v42 = vmax.f32 %v2129_v38, %v601_v41 }
 0x1b6   : > { %v650_v44 = vsub.f32 %v2127_v37, %v2132_v40  ;;  %1220 = vst.msk [vmem:[#allocation2 + $0x10] sm:$0xff] %vm294_vm0, %v2132_v40  ;;  %708 = vperm.xlu1 %1833, %v2132_v40  }
 0x1b7   : > { %1218 = vst.msk [vmem:[#allocation2] sm:$0xff] %vm294_vm0, %v2135_v42  ;;  %v607_v48 = vpop.xlane.xlu1 %606  ;;  %698 = vperm.xlu0 %1832, %v2135_v42  }
 0x1b8   : > { %v2153_v49 = vmax.f32 %v2137_v43, %v607_v48  ;;  %v603_v50 = vpop.xlane.xlu0 %602  ;;  %v2238_v48 = vld [vmem:[#allocation2 + $0x60] sm:$0xff] }
 0x1b9   : > { %v2156_v51 = vmax.f32 %v2144_v45, %v603_v50  ;;  %v1857_v50 = vld [vmem:[%s2123_s25 + $0x38] sm:$0xff]  }
 0x1ba   : > { %1221 = vst.msk [vmem:[#allocation2 + $0x18] sm:$0xff] %vm294_vm0, %v2153_v49  ;;  %713 = vperm.xlu1 %1833, %v2153_v49   ;;  %1787 = vmatprep.subr.bf16.mxu1 %v1857_v50 }
 0x1bb   : > { %v649_v55 = vsub.f32 %v2144_v45, %v2156_v51  ;;  %1219 = vst.msk [vmem:[#allocation2 + $0x8] sm:$0xff] %vm294_vm0, %v2156_v51  ;;  %1788 = vmatpush3.bf16.msra.mxu1 %v1857_v50 }
 0x1bc   : > { %v609_v57 = vpop.xlane.xlu0 %608 }
 0x1bd   : > { %v2173_v58 = vmax.f32 %v2163_v53, %v609_v57  ;;  %v615_v59 = vpop.xlane.xlu1 %614  ;;  %v2246_v57 = vld [vmem:[#allocation2 + $0x78] sm:$0xff] }
 0x1be   : > { %v2176_v60 = vmax.f32 %v2170_v56, %v615_v59  ;;  %703 = vperm.xlu1 %1833, %v2156_v51  }
 0x1bf   : > { %1222 = vst.msk [vmem:[#allocation2 + $0x20] sm:$0xff] %vm294_vm0, %v2173_v58 }
 0x1c0   : > { %1225 = vst.msk [vmem:[#allocation2 + $0x38] sm:$0xff] %vm294_vm0, %v2176_v60  ;;  %v613_v2 = vpop.xlane.xlu0 %612 }
 0x1c1   : > { %v2193_v3 = vmax.f32 %v2179_v61, %v613_v2  ;;  %v611_v4 = vpop.xlane.xlu1 %610 }
 0x1c2   : > { %v2196_v5 = vmax.f32 %v2186_v0, %v611_v4 }
 0x1c3   : > { %1224 = vst.msk [vmem:[#allocation2 + $0x30] sm:$0xff] %vm294_vm0, %v2193_v3  ;;  %728 = vperm.xlu1 %1833, %v2193_v3   ;;  %v2487_v37 = vsub.f32 %v2179_v61, %v2193_v3 }
 0x1c4   : > { %1223 = vst.msk [vmem:[#allocation2 + $0x28] sm:$0xff] %vm294_vm0, %v2196_v5  ;;  %v617_v11 = vpop.xlane.xlu0 %616 }
 0x1c5   : > { %v623_v12 = vpop.xlane.xlu1 %622  ;;  %v2213_v13 = vmax.f32 %v2198_v6, %v617_v11  ;;  %v2259_v11 = vld [vmem:[#allocation2 + $0x70] sm:$0xff]  ;;  %v676_v40 = vmul.f32 1.442695, %v2487_v37 }
 0x1c6   : > { %v2216_v14 = vmax.f32 %v2206_v9, %v623_v12 }
 0x1c7   : > { %1226 = vst.msk [vmem:[#allocation2 + $0x40] sm:$0xff] %vm294_vm0, %v2213_v13  ;;  %718 = vperm.xlu1 %1833, %v2173_v58   ;;  %v2489_v51 = vsub.f32 %v2198_v6, %v2213_v13 }
 0x1c8   : > { %1229 = vst.msk [vmem:[#allocation2 + $0x58] sm:$0xff] %vm294_vm0, %v2216_v14  ;;  %v621_v36 = vpop.xlane.xlu0 %620 }
 0x1c9   : > { %v619_v39 = vpop.xlane.xlu1 %618  ;;  %v2233_v41 = vmax.f32 %v2218_v15, %v621_v36 }
 0x1ca   : > { %v2236_v46 = vmax.f32 %v2226_v31, %v619_v39 }
 0x1cb   : > { %1228 = vst.msk [vmem:[#allocation2 + $0x50] sm:$0xff] %vm294_vm0, %v2233_v41  ;;  %723 = vperm.xlu1 %1833, %v2196_v5   ;;  %v2491_v61 = vsub.f32 %v2218_v15, %v2233_v41  ;;  %v2494_v15 = vsub.f32 %v2206_v9, %v2216_v14 }
 0x1cc   : > { %1227 = vst.msk [vmem:[#allocation2 + $0x48] sm:$0xff] %vm294_vm0, %v2236_v46  ;;  %743 = vperm.xlu0 %1832, %v2236_v46   ;;  %v625_v62 = vpop.xlane.xlu0 %624  ;;  %v2492_v3 = vsub.f32 %v2226_v31, %v2236_v46 }
 0x1cd   : > { %v631_v2 = vpop.xlane.xlu1 %630  ;;  %v2254_v4 = vmax.f32 %v2238_v48, %v625_v62 }
 0x1ce   : > { %v2257_v7 = vmax.f32 %v2246_v57, %v631_v2 }
 0x1cf   : > { %1230 = vst.msk [vmem:[#allocation2 + $0x60] sm:$0xff] %vm294_vm0, %v2254_v4  ;;  %733 = vperm.xlu1 %1833, %v2176_v60  }
 0x1d0   : > { %1233 = vst.msk [vmem:[#allocation2 + $0x78] sm:$0xff] %vm294_vm0, %v2257_v7  ;;  %753 = vperm.xlu0 %1832, %v2216_v14   ;;  %v629_v39 = vpop.xlane.xlu0 %628  ;;  %v2497_v14 = vsub.f32 %v2246_v57, %v2257_v7 }
 0x1d1   : > { %v627_v50 = vpop.xlane.xlu1 %626  ;;  %v2274_v62 = vmax.f32 %v2259_v11, %v629_v39 }
 0x1d2   : > { %v2277_v2 = vmax.f32 %v2266_v16, %v627_v50 }
 0x1d3   : > { %1232 = vst.msk [vmem:[#allocation2 + $0x70] sm:$0xff] %vm294_vm0, %v2274_v62  ;;  %738 = vperm.xlu1 %1833, %v2213_v13   ;;  %v2495_v31 = vsub.f32 %v2259_v11, %v2274_v62  ;;  %v694_v11 = vmul.f32 1.442695, %v2497_v14 }
 0x1d4   : > { %1231 = vst.msk [vmem:[#allocation2 + $0x68] sm:$0xff] %vm294_vm0, %v2277_v2  ;;  %763 = vperm.xlu0 %1832, %v2277_v2  }
 0x1d5   : > { %v692_v46 = vmul.f32 1.442695, %v2495_v31  ;;  %v832_v31 = vld [vmem:[#allocation3 + $0x40] sm:$0xff] }
 0x1d7   : > { %748 = vperm.xlu1 %1833, %v2233_v41   ;;  %v686_v41 = vmul.f32 1.442695, %v2494_v15 }
 0x1d8   : > { %773 = vperm.xlu0 %1832, %v2257_v7  }
 0x1db   : > { %758 = vperm.xlu1 %1833, %v2254_v4  }
 0x1df   : > { %768 = vperm.xlu1 %1833, %v2274_v62  }
 0x235   : > { %v709_v39 = vpop.permute.xlu1 %708 }
 0x236   : > { %v778_v50 = vsub.f32 %v2055_v17, %v709_v39  ;;  %v699_v35 = vpop.permute.xlu0 %698 }
 0x237   : > { %v776_v12 = vsub.f32 %v2058_v18, %v699_v35 }
 0x238   : > { %v796_v36 = vmul.f32 1.442695, %v778_v50 }
 0x239   : > { %v792_v59 = vmul.f32 1.442695, %v776_v12  ;;  %v714_v54 = vpop.permute.xlu1 %713 }
 0x23a   : > { %1858 = vpow2.f32 %v796_v36  ;;  %v779_v1 = vsub.f32 %v2061_v19, %v714_v54 }
 0x23b   : > { %1860 = vpow2.f32 %v792_v59 }
 0x23c   : > { %v798_v26 = vmul.f32 1.442695, %v779_v1 }
 0x23d   : > { %v704_v10 = vpop.permute.xlu1 %703 }
 0x23e   : > { %1862 = vpow2.f32 %v798_v26  ;;  %v777_v8 = vsub.f32 %v2063_v20, %v704_v10 }
 0x240   : > { %v794_v52 = vmul.f32 1.442695, %v777_v8 }
 0x242   : > { %1864 = vpow2.f32 %v794_v52  ;;  %v729_v63 = vpop.permute.xlu1 %728 }
 0x243   : > { %v782_v17 = vsub.f32 %v2067_v21, %v729_v63 }
 0x244   : > { %v1859_v39 = vpop.eup %1858 }
 0x245   : > { %v1861_v47 = vpop.eup %1860  ;;  %v804_v18 = vmul.f32 1.442695, %v782_v17  ;;  %860 = vadd.xlane.f32.xlu0 %v1859_v39 }
 0x246   : > { %856 = vadd.xlane.f32.xlu1 %v1861_v47  ;;  %v719_v35 = vpop.permute.xlu1 %718 }
 0x247   : > { %1866 = vpow2.f32 %v804_v18  ;;  %v780_v19 = vsub.f32 %v2069_v22, %v719_v35 }
 0x248   : > { %v1863_v54 = vpop.eup %1862 }
 0x249   : > { %v800_v1 = vmul.f32 1.442695, %v780_v19  ;;  %v1034_v59 = vpack.c.bf16 %v1863_v54, %v1859_v39 }
 0x24a   : > { %862 = vadd.xlane.f32.xlu1 %v1863_v54  ;;  %v724_v26 = vpop.permute.xlu1 %723 }
 0x24b   : > { %1868 = vpow2.f32 %v800_v1  ;;  %v781_v20 = vsub.f32 %v2075_v24, %v724_v26  ;;  %v744_v52 = vpop.permute.xlu0 %743 }
 0x24c   : > { %v1865_v8 = vpop.eup %1864  ;;  %v785_v10 = vsub.f32 %v2087_v29, %v744_v52 }
 0x24d   : > { %v802_v21 = vmul.f32 1.442695, %v781_v20  ;;  %858 = vadd.xlane.f32.xlu0 %v1865_v8  ;;  %v1033_v63 = vpack.c.bf16 %v1865_v8, %v1861_v47 }
 0x24e   : > { %v734_v12 = vpop.permute.xlu1 %733  ;;  %v810_v39 = vmul.f32 1.442695, %v785_v10 }
 0x24f   : > { %1870 = vpow2.f32 %v802_v21  ;;  %v783_v36 = vsub.f32 %v2072_v23, %v734_v12  ;;  %v754_v22 = vpop.permute.xlu0 %753  ;;  %1789 = vmatprep.mubr.bf16.mxu1 %v1033_v63 }
 0x250   : > { %1790 = vmatmul.mubr.bf16.vlgmr.msra.gmra.mrb[0].mxu1 %v1034_v59  ;;  %v787_v18 = vsub.f32 %v2083_v28, %v754_v22 }
 0x251   : > { %v1867_v50 = vpop.eup %1866  ;;  %v806_v17 = vmul.f32 1.442695, %v783_v36 }
 0x252   : > { %868 = vadd.xlane.f32.xlu0 %v1867_v50  ;;  %v739_v24 = vpop.permute.xlu1 %738  ;;  %v814_v54 = vmul.f32 1.442695, %v787_v18 }
 0x253   : > { %1872 = vpow2.f32 %v806_v17  ;;  %v784_v35 = vsub.f32 %v2081_v27, %v739_v24  ;;  %v764_v47 = vpop.permute.xlu0 %763 }
 0x254   : > { %1874 = vpow2.f32 %v810_v39  ;;  %v789_v23 = vsub.f32 %v2115_v34, %v764_v47 }
 0x255   : > { %v1869_v19 = vpop.eup %1868  ;;  %v808_v29 = vmul.f32 1.442695, %v784_v35 }
 0x256   : > { %864 = vadd.xlane.f32.xlu0 %v1869_v19  ;;  %v749_v1 = vpop.permute.xlu1 %748  ;;  %v818_v52 = vmul.f32 1.442695, %v789_v23  ;;  %v666_v23 = vmul.f32 1.442695, %v649_v55 }
 0x257   : > { %1876 = vpow2.f32 %v808_v29  ;;  %v786_v59 = vsub.f32 %v2079_v25, %v749_v1  ;;  %v774_v26 = vpop.permute.xlu0 %773  ;;  %v668_v1 = vmul.f32 1.442695, %v650_v44 }
 0x258   : > { %1878 = vpow2.f32 %v814_v54  ;;  %v791_v8 = vsub.f32 %v2111_v33, %v774_v26 }
 0x259   : > { %v1871_v20 = vpop.eup %1870  ;;  %v812_v28 = vmul.f32 1.442695, %v786_v59  ;;  %v2484_v59 = vsub.f32 %v2129_v38, %v2135_v42  ;;  %v2488_v38 = vsub.f32 %v2186_v0, %v2196_v5  ;;  %v684_v0 = vmul.f32 1.442695, %v2491_v61 }
 0x25a   : > { %v759_v27 = vpop.permute.xlu1 %758  ;;  %v1035_v21 = vpack.c.bf16 %v1871_v20, %v1869_v19  ;;  %v822_v12 = vmul.f32 1.442695, %v791_v8  ;;  %v682_v5 = vmul.f32 1.442695, %v2492_v3 }
 0x25b   : > { %1880 = vpow2.f32 %v812_v28  ;;  %v788_v63 = vsub.f32 %v2109_v32, %v759_v27  ;;  %v664_v26 = vmul.f32 1.442695, %v2484_v59  ;;  %v674_v42 = vmul.f32 1.442695, %v2488_v38 }
 0x25c   : > { %1793 = vmatprep.mubr.bf16.mxu1 %v1035_v21  ;;  %1882 = vpow2.f32 %v818_v52  ;;  %v2486_v52 = vsub.f32 %v2137_v43, %v2153_v49  ;;  %v680_v43 = vmul.f32 1.442695, %v2489_v51  ;;  %v2490_v49 = vsub.f32 %v2170_v56, %v2176_v60 }
 0x25d   : > { %v1873_v10 = vpop.eup %1872  ;;  %v816_v34 = vmul.f32 1.442695, %v788_v63  ;;  %v2493_v56 = vsub.f32 %v2238_v48, %v2254_v4  ;;  %v2496_v48 = vsub.f32 %v2266_v16, %v2277_v2 }
 0x25e   : > { %870 = vadd.xlane.f32.xlu1 %v1873_v10  ;;  %v769_v36 = vpop.permute.xlu1 %768  ;;  %v1036_v25 = vpack.c.bf16 %v1873_v10, %v1867_v50  ;;  %v1875_v17 = vpop.eup %1874  ;;  %v670_v45 = vmul.f32 1.442695, %v2486_v52 }
 0x25f   : > { %1884 = vpow2.f32 %v816_v34  ;;  %v790_v22 = vsub.f32 %v2091_v30, %v769_v36  ;;  %v688_v60 = vmul.f32 1.442695, %v2493_v56  ;;  %v690_v4 = vmul.f32 1.442695, %v2496_v48  ;;  %v826_v34 = vld [vmem:[#allocation3 + $0x10] sm:$0xff] }
 0x260   : > { %1794 = vmatmul.mubr.bf16.gmra.mrb[4].mxu1 %v1036_v25  ;;  %1886 = vpow2.f32 %v822_v12  ;;  %v824_v12 = vld [vmem:[#allocation3] sm:$0xff] }
 0x261   : > { %v1877_v39 = vpop.eup %1876  ;;  %v820_v33 = vmul.f32 1.442695, %v790_v22 }
 0x262   : > { %866 = vadd.xlane.f32.xlu1 %v1871_v20  ;;  %v1037_v18 = vpack.c.bf16 %v1875_v17, %v1877_v39  ;;  %v1879_v32 = vpop.eup %1878  ;;  %v2485_v20 = vsub.f32 %v2163_v53, %v2173_v58  ;;  %v678_v53 = vmul.f32 1.442695, %v2490_v49 }
 0x263   : > { %1888 = vpow2.f32 %v820_v33  ;;  %v827_v33 = vld [vmem:[#allocation3 + $0x18] sm:$0xff] }
 0x264   : > { %1797 = vmatprep.mubr.bf16.mxu1 %v1037_v18  ;;  %1890 = vpow2.f32 %v666_v23  ;;  %v672_v28 = vmul.f32 1.442695, %v2485_v20 }
 0x265   : > { %v1881_v24 = vpop.eup %1880  ;;  %1892 = vpow2.f32 %v668_v1 }
 0x266   : > { %878 = vadd.xlane.f32.xlu1 %v1879_v32  ;;  %876 = vadd.xlane.f32.xlu0 %v1881_v24  ;;  %v1038_v35 = vpack.c.bf16 %v1879_v32, %v1881_v24  ;;  %v1883_v47 = vpop.eup %1882  ;;  %1894 = vpow2.f32 %v664_v26  ;;  %v825_v24 = vld [vmem:[#allocation3 + $0x8] sm:$0xff]  ;;  %v828_v26 = vld [vmem:[#allocation3 + $0x20] sm:$0xff] }
 0x267   : > { %1896 = vpow2.f32 %v672_v28 }
 0x268   : > { %1798 = vmatmul.mubr.bf16.gmra.mrb[8].mxu1 %v1038_v35  ;;  %1898 = vpow2.f32 %v670_v45 }
 0x269   : > { %v1885_v50 = vpop.eup %1884  ;;  %1900 = vpow2.f32 %v676_v40 }
 0x26a   : > { %874 = vadd.xlane.f32.xlu1 %v1875_v17  ;;  %872 = vadd.xlane.f32.xlu0 %v1877_v39  ;;  %v1039_v30 = vpack.c.bf16 %v1883_v47, %v1885_v50  ;;  %v1887_v19 = vpop.eup %1886  ;;  %1902 = vpow2.f32 %v674_v42  ;;  %v831_v42 = vld [vmem:[#allocation3 + $0x38] sm:$0xff] }
 0x26b   : > { %1904 = vpow2.f32 %v680_v43 }
 0x26c   : > { %1801 = vmatprep.mubr.bf16.mxu1 %v1039_v30  ;;  %1906 = vpow2.f32 %v678_v53  ;;  %v829_v53 = vld [vmem:[#allocation3 + $0x28] sm:$0xff] }
 0x26d   : > { %v1889_v29 = vpop.eup %1888  ;;  %1908 = vpow2.f32 %v684_v0 }
 0x26e   : > { %886 = vadd.xlane.f32.xlu1 %v1887_v19  ;;  %880 = vadd.xlane.f32.xlu0 %v1885_v50  ;;  %v1040_v54 = vpack.c.bf16 %v1887_v19, %v1889_v29  ;;  %v2330_v44 = vpop.eup %1890  ;;  %1910 = vpow2.f32 %v682_v5 }
 0x26f   : > { %v1893_v55 = vpop.eup %1892  ;;  %1912 = vpow2.f32 %v688_v60  ;;  %v841_v50 = vmul.f32 %v2330_v44, %v825_v24 }
 0x270   : > { %1802 = vmatmul.mubr.bf16.gmra.mrb[12].mxu1 %v1040_v54  ;;  %v1895_v58 = vpop.eup %1894  ;;  %1914 = vpow2.f32 %v686_v41  ;;  %v842_v36 = vmul.f32 %v1893_v55, %v826_v34  ;;  %v836_v34 = vld [vmem:[#allocation3 + $0x60] sm:$0xff] }
 0x271   : > { %v2345_v6 = vpop.eup %1896  ;;  %1916 = vpow2.f32 %v692_v46  ;;  %v840_v22 = vmul.f32 %v1895_v58, %v824_v12  ;;  %v833_v46 = vld [vmem:[#allocation3 + $0x48] sm:$0xff]  ;;  %v839_v12 = vld [vmem:[#allocation3 + $0x78] sm:$0xff] }
 0x272   : > { %882 = vadd.xlane.f32.xlu1 %v1883_v47  ;;  %884 = vadd.xlane.f32.xlu0 %v1889_v29  ;;  %v1899_v13 = vpop.eup %1898  ;;  %1918 = vpow2.f32 %v690_v4  ;;  %v830_v29 = vld [vmem:[#allocation3 + $0x30] sm:$0xff]  ;;  %v844_v52 = vmul.f32 %v2345_v6, %v828_v26 }
 0x273   : > { %v1901_v8 = vpop.eup %1900  ;;  %1920 = vpow2.f32 %v694_v11  ;;  %v843_v32 = vmul.f32 %v1899_v13, %v827_v33 }
 0x274   : > { %v2354_v27 = vpop.eup %1902  ;;  %v846_v23 = vmul.f32 %v1901_v8, %v830_v29 }
 0x275   : > { %v2363_v21 = vpop.eup %1904  ;;  %v845_v0 = vmul.f32 %v2354_v27, %v829_v53 }
 0x276   : > { %v2365_v9 = vpop.eup %1906  ;;  %v848_v14 = vmul.f32 %v2363_v21, %v832_v31 }
 0x277   : > { %v2372_v62 = vpop.eup %1908  ;;  %v847_v51 = vmul.f32 %v2365_v9, %v831_v42 }
 0x278   : > { %v2374_v63 = vpop.eup %1910 }
 0x279   : > { %v2378_v16 = vpop.eup %1912  ;;  %v849_v11 = vmul.f32 %v2374_v63, %v833_v46 }
 0x27a   : > { %v2380_v2 = vpop.eup %1914 }
 0x27b   : > { %v2384_v57 = vpop.eup %1916 }
 0x27c   : > { %v2386_v7 = vpop.eup %1918 }
 0x27d   : > { %v2390_v10 = vpop.eup %1920 }
 0x283   : > { %944 = vperm.xlu1 %1833, %v2330_v44  }
 0x287   : > { %949 = vperm.xlu1 %1833, %v1893_v55  }
 0x288   : > { %939 = vperm.xlu0 %1832, %v1895_v58  }
 0x28b   : > { %959 = vperm.xlu1 %1833, %v2345_v6   ;;  %v834_v6 = vld [vmem:[#allocation3 + $0x50] sm:$0xff] }
 0x28c   : > { %954 = vperm.xlu0 %1832, %v1899_v13   ;;  %v835_v13 = vld [vmem:[#allocation3 + $0x58] sm:$0xff]  ;;  %v850_v60 = vmul.f32 %v2372_v62, %v834_v6 }
 0x28d   : > { %v851_v15 = vmul.f32 %v2380_v2, %v835_v13 }
 0x28f   : > { %969 = vperm.xlu1 %1833, %v1901_v8  }
 0x290   : > { %964 = vperm.xlu0 %1832, %v2354_v27  }
 0x293   : > { %979 = vperm.xlu1 %1833, %v2363_v21   ;;  %v855_v21 = vmul.f32 %v2390_v10, %v839_v12 }
 0x294   : > { %974 = vperm.xlu0 %1832, %v2365_v9  }
 0x297   : > { %989 = vperm.xlu1 %1833, %v2372_v62  }
 0x298   : > { %984 = vperm.xlu0 %1832, %v2374_v63  }
 0x29b   : > { %999 = vperm.xlu1 %1833, %v2378_v16  }
 0x29c   : > { %994 = vperm.xlu0 %1832, %v2380_v2  }
 0x29f   : > { %1009 = vperm.xlu1 %1833, %v2384_v57  }
 0x2a0   : > { %1004 = vperm.xlu0 %1832, %v2386_v7  }
 0x2a4   : > { %1014 = vperm.xlu0 %1832, %v2390_v10  }
 0x2d2   : > { %v861_v25 = vpop.xlane.xlu0 %860 }
 0x2d3   : > { %v890_v17 = vadd.f32 %v861_v25, %v842_v36  ;;  %v857_v39 = vpop.xlane.xlu1 %856 }
 0x2d4   : > { %v888_v18 = vadd.f32 %v857_v39, %v840_v22  ;;  %v852_v39 = vmul.f32 %v2378_v16, %v836_v34 }
 0x2d5   : > { %907 = vst.msk [vmem:[#allocation3 + $0x10] sm:$0xff] %vm294_vm0, %v890_v17 }
 0x2d6   : > { %905 = vst.msk [vmem:[#allocation3] sm:$0xff] %vm294_vm0, %v888_v18  ;;  %v838_v18 = vld [vmem:[#allocation3 + $0x70] sm:$0xff] }
 0x2d7   : > { %v863_v35 = vpop.xlane.xlu1 %862 }
 0x2d8   : > { %v891_v47 = vadd.f32 %v863_v35, %v843_v32  ;;  %v837_v32 = vld [vmem:[#allocation3 + $0x68] sm:$0xff] }
 0x2da   : > { %908 = vst.msk [vmem:[#allocation3 + $0x18] sm:$0xff] %vm294_vm0, %v891_v47  ;;  %v859_v30 = vpop.xlane.xlu0 %858 }
 0x2db   : > { %v889_v19 = vadd.f32 %v859_v30, %v841_v50  ;;  %v854_v30 = vmul.f32 %v2384_v57, %v838_v18 }
 0x2dc   : > { %v1255_v54 = vld [vmem:[#allocation3 + $0x10] sm:$0xff] }
 0x2dd   : > { %906 = vst.msk [vmem:[#allocation3 + $0x8] sm:$0xff] %vm294_vm0, %v889_v19  ;;  %1922 = vrcp.f32 %v1255_v54  ;;  %v1253_v1 = vld [vmem:[#allocation3] sm:$0xff]  ;;  %v853_v19 = vmul.f32 %v2386_v7, %v837_v32 }
 0x2de   : > { %1924 = vrcp.f32 %v1253_v1 }
 0x2df   : > { %v869_v59 = vpop.xlane.xlu0 %868 }
 0x2e0   : > { %v894_v20 = vadd.f32 %v869_v59, %v846_v23 }
 0x2e1   : > { %v1256_v28 = vld [vmem:[#allocation3 + $0x18] sm:$0xff] }
 0x2e2   : > { %911 = vst.msk [vmem:[#allocation3 + $0x30] sm:$0xff] %vm294_vm0, %v894_v20  ;;  %1926 = vrcp.f32 %v1256_v28 }
 0x2e3   : > { %v865_v45 = vpop.xlane.xlu0 %864 }
 0x2e4   : > { %v892_v37 = vadd.f32 %v865_v45, %v844_v52  ;;  %v1254_v40 = vld [vmem:[#allocation3 + $0x8] sm:$0xff] }
 0x2e5   : > { %1928 = vrcp.f32 %v1254_v40 }
 0x2e6   : > { %909 = vst.msk [vmem:[#allocation3 + $0x20] sm:$0xff] %vm294_vm0, %v892_v37 }
 0x2e7   : > { %v1923_v38 = vpop.eup %1922 }
 0x2e8   : > { %1297 = vperm.xlu1 %1833, %v1923_v38   ;;  %v1925_v43 = vpop.eup %1924 }
 0x2e9   : > { %v1259_v44 = vld [vmem:[#allocation3 + $0x30] sm:$0xff] }
 0x2ea   : > { %1930 = vrcp.f32 %v1259_v44 }
 0x2eb   : > { %v871_v49 = vpop.xlane.xlu1 %870 }
 0x2ec   : > { %v1927_v55 = vpop.eup %1926  ;;  %v895_v58 = vadd.f32 %v871_v49, %v847_v51  ;;  %1287 = vperm.xlu1 %1833, %v1925_v43  }
 0x2ed   : > { %1302 = vperm.xlu0 %1832, %v1927_v55   ;;  %v1257_v61 = vld [vmem:[#allocation3 + $0x20] sm:$0xff] }
 0x2ee   : > { %912 = vst.msk [vmem:[#allocation3 + $0x38] sm:$0xff] %vm294_vm0, %v895_v58  ;;  %1932 = vrcp.f32 %v1257_v61 }
 0x2ef   : > { %v1929_v3 = vpop.eup %1928  ;;  %v867_v5 = vpop.xlane.xlu1 %866 }
 0x2f0   : > { %v893_v56 = vadd.f32 %v867_v5, %v845_v0 }
 0x2f1   : > { %1292 = vperm.xlu0 %1832, %v1929_v3  }
 0x2f2   : > { %910 = vst.msk [vmem:[#allocation3 + $0x28] sm:$0xff] %vm294_vm0, %v893_v56 }
 0x2f3   : > { %v877_v41 = vpop.xlane.xlu0 %876  ;;  %v879_v8 = vpop.xlane.xlu1 %878 }
 0x2f4   : > { %v1931_v48 = vpop.eup %1930  ;;  %v898_v4 = vadd.f32 %v877_v41, %v850_v60  ;;  %v899_v27 = vadd.f32 %v879_v8, %v851_v15 }
 0x2f5   : > { %1317 = vperm.xlu1 %1833, %v1931_v48   ;;  %v1260_v9 = vld [vmem:[#allocation3 + $0x38] sm:$0xff] }
 0x2f6   : > { %915 = vst.msk [vmem:[#allocation3 + $0x50] sm:$0xff] %vm294_vm0, %v898_v4  ;;  %916 = vst.msk [vmem:[#allocation3 + $0x58] sm:$0xff] %vm294_vm0, %v899_v27  ;;  %1934 = vrcp.f32 %v1260_v9 }
 0x2f7   : > { %v873_v62 = vpop.xlane.xlu0 %872  ;;  %v875_v2 = vpop.xlane.xlu1 %874 }
 0x2f8   : > { %v1933_v36 = vpop.eup %1932  ;;  %v896_v25 = vadd.f32 %v873_v62, %v848_v14  ;;  %v897_v22 = vadd.f32 %v875_v2, %v849_v11 }
 0x2f9   : > { %1307 = vperm.xlu1 %1833, %v1933_v36   ;;  %v1258_v17 = vld [vmem:[#allocation3 + $0x28] sm:$0xff] }
 0x2fa   : > { %913 = vst.msk [vmem:[#allocation3 + $0x40] sm:$0xff] %vm294_vm0, %v896_v25  ;;  %914 = vst.msk [vmem:[#allocation3 + $0x48] sm:$0xff] %vm294_vm0, %v897_v22  ;;  %1936 = vrcp.f32 %v1258_v17 }
 0x2fb   : > { %v881_v63 = vpop.xlane.xlu0 %880  ;;  %v887_v33 = vpop.xlane.xlu1 %886 }
 0x2fc   : > { %v900_v24 = vadd.f32 %v881_v63, %v852_v39  ;;  %v903_v35 = vadd.f32 %v887_v33, %v855_v21 }
 0x2fd   : > { %v1263_v47 = vld [vmem:[#allocation3 + $0x50] sm:$0xff]  ;;  %v1264_v50 = vld [vmem:[#allocation3 + $0x58] sm:$0xff] }
 0x2fe   : > { %917 = vst.msk [vmem:[#allocation3 + $0x60] sm:$0xff] %vm294_vm0, %v900_v24  ;;  %920 = vst.msk [vmem:[#allocation3 + $0x78] sm:$0xff] %vm294_vm0, %v903_v35  ;;  %1938 = vrcp.f32 %v1263_v47 }
 0x2ff   : > { %v885_v16 = vpop.xlane.xlu0 %884  ;;  %v883_v10 = vpop.xlane.xlu1 %882  ;;  %1940 = vrcp.f32 %v1264_v50 }
 0x300   : > { %v1935_v29 = vpop.eup %1934  ;;  %v902_v54 = vadd.f32 %v885_v16, %v854_v30  ;;  %v901_v23 = vadd.f32 %v883_v10, %v853_v19 }
 0x301   : > { %1322 = vperm.xlu0 %1832, %v1935_v29   ;;  %v1261_v1 = vld [vmem:[#allocation3 + $0x40] sm:$0xff]  ;;  %v1262_v59 = vld [vmem:[#allocation3 + $0x48] sm:$0xff] }
 0x302   : > { %919 = vst.msk [vmem:[#allocation3 + $0x70] sm:$0xff] %vm294_vm0, %v902_v54  ;;  %918 = vst.msk [vmem:[#allocation3 + $0x68] sm:$0xff] %vm294_vm0, %v901_v23  ;;  %1942 = vrcp.f32 %v1261_v1 }
 0x303   : > { %1944 = vrcp.f32 %v1262_v59  ;;  %v945_v5 = vpop.permute.xlu1 %944 }
 0x304   : > { %v1937_v26 = vpop.eup %1936  ;;  %v1018_v24 = vmul.f32 0.0, %v945_v5 }
 0x305   : > { %1312 = vperm.xlu0 %1832, %v1937_v26   ;;  %v1265_v57 = vld [vmem:[#allocation3 + $0x60] sm:$0xff]  ;;  %v1268_v37 = vld [vmem:[#allocation3 + $0x78] sm:$0xff] }
 0x306   : > { %1946 = vrcp.f32 %v1265_v57 }
 0x307   : > { %v940_v60 = vpop.permute.xlu0 %939  ;;  %v950_v41 = vpop.permute.xlu1 %949 }
 0x308   : > { %v1939_v7 = vpop.eup %1938  ;;  %v1019_v21 = vmul.f32 0.0, %v950_v41  ;;  %v1017_v35 = vmul.f32 0.0, %v940_v60 }
 0x309   : > { %v1941_v20 = vpop.eup %1940  ;;  %1337 = vperm.xlu1 %1833, %v1939_v7   ;;  %v1267_v28 = vld [vmem:[#allocation3 + $0x70] sm:$0xff]  ;;  %v1266_v52 = vld [vmem:[#allocation3 + $0x68] sm:$0xff] }
 0x30a   : > { %1342 = vperm.xlu0 %1832, %v1941_v20   ;;  %1948 = vrcp.f32 %v1267_v28 }
 0x30b   : > { %1950 = vrcp.f32 %v1266_v52  ;;  %v955_v31 = vpop.permute.xlu0 %954  ;;  %v960_v4 = vpop.permute.xlu1 %959 }
 0x30c   : > { %v1943_v45 = vpop.eup %1942  ;;  %1952 = vrcp.f32 %v1268_v37  ;;  %v1020_v63 = vmul.f32 0.0, %v955_v31  ;;  %v1021_v52 = vmul.f32 0.0, %v960_v4 }
 0x30d   : > { %v1945_v40 = vpop.eup %1944  ;;  %1327 = vperm.xlu1 %1833, %v1943_v45  }
 0x30e   : > { %1332 = vperm.xlu0 %1832, %v1945_v40  }
 0x30f   : > { %v965_v9 = vpop.permute.xlu0 %964  ;;  %v970_v14 = vpop.permute.xlu1 %969 }
 0x310   : > { %v1947_v38 = vpop.eup %1946  ;;  %v1023_v26 = vmul.f32 0.0, %v970_v14  ;;  %v1022_v45 = vmul.f32 0.0, %v965_v9 }
 0x311   : > { %1347 = vperm.xlu1 %1833, %v1947_v38  }
 0x313   : > { %v975_v11 = vpop.permute.xlu0 %974  ;;  %v980_v62 = vpop.permute.xlu1 %979 }
 0x314   : > { %v1949_v42 = vpop.eup %1948  ;;  %v1024_v57 = vmul.f32 0.0, %v975_v11  ;;  %v1025_v31 = vmul.f32 0.0, %v980_v62 }
 0x315   : > { %v1951_v44 = vpop.eup %1950  ;;  %1357 = vperm.xlu1 %1833, %v1949_v42  }
 0x316   : > { %1352 = vperm.xlu0 %1832, %v1951_v44   ;;  %v1953_v51 = vpop.eup %1952 }
 0x317   : > { %v985_v2 = vpop.permute.xlu0 %984  ;;  %v990_v34 = vpop.permute.xlu1 %989 }
 0x31a   : > { %1362 = vperm.xlu0 %1832, %v1953_v51  }
 0x31b   : > { %v995_v12 = vpop.permute.xlu0 %994  ;;  %v2437_v36 = vpop.permute.xlu1 %999 }
 0x31c   : > { %v1028_v5 = vmul.f32 0.0, %v995_v12  ;;  %v1029_v62 = vmul.f32 0.0, %v2437_v36 }
 0x31f   : > { %v2439_v25 = vpop.permute.xlu0 %1004  ;;  %v2441_v22 = vpop.permute.xlu1 %1009 }
 0x323   : > { %v1791_v43 = vpop.f32.mrb[0].mxu1  ;;  %v2443_v17 = vpop.permute.xlu0 %1014 }
 0x324   : > { %v1123_v49 = vpop.f32.mrb[1].mxu1  ;;  %v1188_v33 = vadd.f32 %v1791_v43, %v1019_v21 }
 0x325   : > { %v1792_v53 = vpop.f32.mrb[2].mxu1  ;;  %v1186_v19 = vadd.f32 %v1123_v49, %v1017_v35  ;;  %v1027_v49 = vmul.f32 0.0, %v990_v34 }
 0x326   : > { %v1126_v55 = vpop.f32.mrb[3].mxu1  ;;  %v1189_v18 = vadd.f32 %v1792_v53, %v1020_v63 }
 0x327   : > { %v1187_v16 = vadd.f32 %v1126_v55, %v1018_v24 }
 0x333   : > { %v1795_v58 = vpop.f32.mrb[4].mxu1 }
 0x334   : > { %v1139_v61 = vpop.f32.mrb[5].mxu1  ;;  %v1192_v7 = vadd.f32 %v1795_v58, %v1023_v26 }
 0x335   : > { %v1796_v0 = vpop.f32.mrb[6].mxu1  ;;  %v1190_v42 = vadd.f32 %v1139_v61, %v1021_v52 }
 0x336   : > { %v1142_v3 = vpop.f32.mrb[7].mxu1  ;;  %v1193_v20 = vadd.f32 %v1796_v0, %v1024_v57 }
 0x337   : > { %v1191_v44 = vadd.f32 %v1142_v3, %v1022_v45  ;;  %v1026_v3 = vmul.f32 0.0, %v985_v2 }
 0x33b   : > { %v2421_v6 = vpop.f32.mrb[8].mxu1 }
 0x33c   : > { %v2423_v13 = vpop.f32.mrb[9].mxu1  ;;  %v1196_v60 = vadd.f32 %v2421_v6, %v1027_v49 }
 0x33d   : > { %v2425_v56 = vpop.f32.mrb[10].mxu1  ;;  %v1194_v14 = vadd.f32 %v2423_v13, %v1025_v31 }
 0x33e   : > { %v2427_v15 = vpop.f32.mrb[11].mxu1  ;;  %v1197_v0 = vadd.f32 %v2425_v56, %v1028_v5 }
 0x33f   : > { %v1195_v11 = vadd.f32 %v2427_v15, %v1026_v3 }
 0x343   : > { %v2429_v8 = vpop.f32.mrb[12].mxu1 }
 0x344   : > { %v2431_v46 = vpop.f32.mrb[13].mxu1 }
 0x345   : > { %v2433_v48 = vpop.f32.mrb[14].mxu1  ;;  %v1198_v2 = vadd.f32 %v2431_v46, %v1029_v62 }
 0x346   : > { %v2435_v27 = vpop.f32.mrb[15].mxu1 }
 0x367   : > { %v1298_v39 = vpop.permute.xlu1 %1297 }
 0x368   : > { %v1367_v47 = vmul.f32 %v1298_v39, %v1188_v33  ;;  %v1030_v33 = vmul.f32 0.0, %v2439_v25 }
 0x36a   : > { %v1199_v13 = vadd.f32 %v2435_v27, %v1030_v33 }
 0x36b   : > { %v1288_v30 = vpop.permute.xlu1 %1287 }
 0x36c   : > { %v1303_v32 = vpop.permute.xlu0 %1302  ;;  %v1365_v54 = vmul.f32 %v1288_v30, %v1186_v19 }
 0x36d   : > { %v1368_v50 = vmul.f32 %v1303_v32, %v1189_v18  ;;  %v1031_v18 = vmul.f32 0.0, %v2441_v22  ;;  %v1032_v32 = vmul.f32 0.0, %v2443_v17 }
 0x36f   : > { %v1670_v10 = vpack.c.bf16 %v1368_v50, %v1367_v47  ;;  %v1200_v50 = vadd.f32 %v2429_v8, %v1031_v18  ;;  %v1201_v36 = vadd.f32 %v2433_v48, %v1032_v32 }
 0x370   : > { %v1293_v29 = vpop.permute.xlu0 %1292 }
 0x371   : > { %1702 = vst [vmem:[%s2449_s28 + $0x8] sm:$0xff] %v1670_v10   ;;  %v1366_v23 = vmul.f32 %v1293_v29, %v1187_v16 }
 0x373   : > { %v1665_v1 = vpack.c.bf16 %v1366_v23, %v1365_v54 }
 0x374   : > { %v1318_v59 = vpop.permute.xlu1 %1317 }
 0x375   : > { %1666 = vst [vmem:[%s2449_s28] sm:$0xff] %v1665_v1   ;;  %v1371_v37 = vmul.f32 %v1318_v59, %v1192_v7 }
 0x378   : > { %v1308_v38 = vpop.permute.xlu1 %1307 }
 0x379   : > { %v1369_v53 = vmul.f32 %v1308_v38, %v1190_v42 }
 0x380   : > { %v1323_v28 = vpop.permute.xlu0 %1322 }
 0x381   : > { %v1372_v40 = vmul.f32 %v1323_v28, %v1193_v20 }
 0x383   : > { %v1680_v51 = vpack.c.bf16 %v1372_v40, %v1371_v37 }
 0x384   : > { %v1313_v43 = vpop.permute.xlu0 %1312 }
 0x385   : > { %1704 = vst [vmem:[%s2449_s28 + $0x18] sm:$0xff] %v1680_v51   ;;  %v1370_v55 = vmul.f32 %v1313_v43, %v1191_v44 }
 0x387   : > { %v1675_v58 = vpack.c.bf16 %v1370_v55, %v1369_v53 }
 0x388   : > { %v1338_v41 = vpop.permute.xlu1 %1337 }
 0x389   : > { %1703 = vst [vmem:[%s2449_s28 + $0x10] sm:$0xff] %v1675_v58   ;;  %v1343_v4 = vpop.permute.xlu0 %1342  ;;  %v1375_v61 = vmul.f32 %v1338_v41, %v1196_v60 }
 0x38a   : > { %v1376_v9 = vmul.f32 %v1343_v4, %v1197_v0 }
 0x38c   : > { %v1690_v34 = vpack.c.bf16 %v1376_v9, %v1375_v61  ;;  %v1328_v12 = vpop.permute.xlu1 %1327 }
 0x38d   : > { %v1333_v39 = vpop.permute.xlu0 %1332  ;;  %v1373_v6 = vmul.f32 %v1328_v12, %v1194_v14 }
 0x38e   : > { %1706 = vst [vmem:[%s2449_s28 + $0x28] sm:$0xff] %v1690_v34   ;;  %v1374_v21 = vmul.f32 %v1333_v39, %v1195_v11 }
 0x390   : > { %v1685_v63 = vpack.c.bf16 %v1374_v21, %v1373_v6  ;;  %v1348_v56 = vpop.permute.xlu1 %1347 }
 0x391   : > { %v1377_v24 = vmul.f32 %v1348_v56, %v1198_v2 }
 0x392   : > { %1705 = vst [vmem:[%s2449_s28 + $0x20] sm:$0xff] %v1685_v63  }
 0x394   : > { %v1358_v47 = vpop.permute.xlu1 %1357 }
 0x395   : > { %v1353_v15 = vpop.permute.xlu0 %1352  ;;  %v1379_v19 = vmul.f32 %v1358_v47, %v1200_v50 }
 0x396   : > { %v1378_v35 = vmul.f32 %v1353_v15, %v1199_v13 }
 0x398   : > { %v1695_v30 = vpack.c.bf16 %v1378_v35, %v1377_v24 }
 0x399   : > { %v1363_v25 = vpop.permute.xlu0 %1362 }
 0x39a   : > { %1707 = vst [vmem:[%s2449_s28 + $0x30] sm:$0xff] %v1695_v30   ;;  %v1380_v46 = vmul.f32 %v1363_v25, %v1201_v36 }
 0x39c   : > { %v1700_v16 = vpack.c.bf16 %v1380_v46, %v1379_v19 }
 0x39e   : > { %1708 = vst [vmem:[%s2449_s28 + $0x38] sm:$0xff] %v1700_v16  }
 0x39f PF: > { %s13_s14 = sadd.s32 1, %s1976_s14   ;;  %s2498_s12 = smov %s1972_s13 }
 0x3a0   : > { %p10_p5 = scmp.ge.s32.totalorder %s13_s14, 4   ;;  %s2499_s13 = smov %s2501_s15 }
 0x3a2   :  { %12 = sbr.rel (!%p10_p5) target bundleno = 2 (0x2), region = 76 }

// kernel: _forward.3
= control target key start
LH: loop header
LB: loop body
LE: loop exit
PB: predicated region body
PF: predicated region fallthrough
CT: control target
= control target key end

     0   :  { %11 = vsyncpa [#allocation3], 0  ;;  %s2468_s0 = inlined_call_operand.hbm [shape: f32[256,128], index: 0, kind: input, shape index: {}]   ;;  %s2469_s1 = inlined_call_operand.hbm [shape: bf16[128,384], index: 1, kind: input, shape index: {}]   ;;  %s2470_s2 = inlined_call_operand.vmem [shape: f32[1,384], index: 2, kind: input, shape index: {}]   ;;  %s2471_s3 = inlined_call_operand.vmem [shape: bf16[256,128], index: 3, kind: output, shape index: {0}]   ;;  %s2472_s4 = inlined_call_operand.vmem [shape: bf16[256,128], index: 4, kind: output, shape index: {1}]   ;;  %s2473_s5 = inlined_call_operand.vmem [shape: bf16[256,128], index: 5, kind: output, shape index: {2}]  }
   0x1   :  { %12 = vsyncpa [#allocation5], 0  ;;  %s2098_s18 = smov [#allocation2]   ;;  %s2050_s22 = scalar_lea.hbm %s2468_s0, 4096 }
   0x2   :  { %s18_s19 = sshll.u32 %s2098_s18, 4  ;;  %p2051_p0 = scmp.ne.s32.totalorder %s2468_s0, %s2050_s22  ;;  %s19_s19 = int_to_ptr.vmem [resolvable:$true] %s18_s19 }
   0x3   :  { %p2054_p1 = scmp.lt.u32.totalorder %s2050_s22, %s2468_s0 }
   0x5   :  { %p2056_p2 = pnand %p2054_p1, %p2051_p0 }
   0x7   :  { %2059 = shalt.err (!%p2056_p2)
}
   0x8   :  { %s2060_s27 = scalar_lea.vmem %s19_s19, 4096  ;;  %p2065_p4 = scmp.lt.s32.totalorder %s19_s19, %s19_s19 }
   0x9   :  { %p2061_p3 = scmp.ne.s32.totalorder %s19_s19, %s2060_s27  ;;  %p2066_p5 = scmp.lt.s32.totalorder %s2060_s27, %s2060_s27 }
   0xb   :  { %p2067_p6 = por %p2066_p5, %p2065_p4 }
   0xd   :  { %p2068_p7 = pnand %p2067_p6, %p2061_p3 }
   0xf   :  { %2071 = shalt.err (!%p2068_p7)
}
  0x10   :  { %s2099_s28 = smov 128   ;;  %s2100_s29 = smov 8  }
  0x11   :  { %24 = dma.hbm_to_vmem [thread:$0]  %s2468_s0, 4096, %s19_s19, [#allocation3], %s2099_s28, %s2099_s28, %s2100_s29  }
  0x12   :  { %s2101_s7 = smov [#allocation4]   ;;  %s2072_s11 = scalar_lea.hbm %s2469_s1, 3072 }
  0x13   :  { %s30_s8 = sshll.u32 %s2101_s7, 4  ;;  %p2073_p8 = scmp.ne.s32.totalorder %s2469_s1, %s2072_s11  ;;  %s31_s8 = int_to_ptr.vmem [resolvable:$true] %s30_s8 }
  0x14   :  { %p2076_p9 = scmp.lt.u32.totalorder %s2072_s11, %s2469_s1 }
  0x16   :  { %p2078_p10 = pnand %p2076_p9, %p2073_p8 }
  0x18   :  { %2081 = shalt.err (!%p2078_p10)
}
  0x19   :  { %s2082_s16 = scalar_lea.vmem %s31_s8, 3072  ;;  %p2087_p12 = scmp.lt.s32.totalorder %s31_s8, %s31_s8 }
  0x1a   :  { %p2083_p11 = scmp.ne.s32.totalorder %s31_s8, %s2082_s16  ;;  %p2088_p13 = scmp.lt.s32.totalorder %s2082_s16, %s2082_s16 }
  0x1c   :  { %p2089_p0 = por %p2088_p13, %p2087_p12 }
  0x1e   :  { %p2090_p1 = pnand %p2089_p0, %p2083_p11 }
  0x20   :  { %2093 = shalt.err (!%p2090_p1)
}
  0x21   :  { %s2102_s0 = smov 192   ;;  %s2103_s17 = smov 12  }
  0x22   :  { %36 = dma.hbm_to_vmem [thread:$0]  %s2469_s1, 3072, %s31_s8, [#allocation5], %s2102_s0, %s2102_s0, %s2103_s17  }
  0x23   :  { %2094 = dma.done.wait [#allocation3], 4096  }
  0x24   :  { %2095 = vsyncadd [#allocation3], 4294963200 }
  0x25   :  { %2096 = dma.done.wait [#allocation5], 3072  }
  0x26   :  { %2097 = vsyncadd [#allocation5], 4294964224  ;;  %v2026_v0 = vld [vmem:[#allocation4] ss:$12 sps:$4 sm:$0xff]   ;;  %v2027_v1 = vld [vmem:[#allocation4 + $0x18] ss:$12 sps:$4 sm:$0xff]  }
  0x27   :  { %1860 = vmatprep.subr.bf16.mxu0 %v2026_v0  ;;  %2004 = vmatprep.subr.bf16.mxu1 %v2026_v0  ;;  %v2028_v2 = vld [vmem:[#allocation4 + $0x30] ss:$12 sps:$4 sm:$0xff]   ;;  %v2029_v3 = vld [vmem:[#allocation4 + $0x48] ss:$12 sps:$4 sm:$0xff]   ;;  %v46_v4 = vld [vmem:[#allocation2] sm:$0xff] }
  0x28   :  { %1861 = vmatpush3.bf16.msra.mxu0 %v2026_v0  ;;  %2012 = vmatpush3.bf16.msra.mxu1 %v2026_v0  ;;  %v47_v5 = vld [vmem:[#allocation2 + $0x8] sm:$0xff]  ;;  %v62_v6 = vld [vmem:[#allocation2 + $0x80] sm:$0xff]  ;;  %v2032_v12 = vld [vmem:[#allocation4 + $0x90] ss:$12 sps:$4 sm:$0xff]  }
  0x29   :  { %1862 = vmatprep.subr.bf16.mxu0 %v2027_v1  ;;  %2005 = vmatprep.subr.bf16.mxu1 %v2027_v1  ;;  %v2158_v7 = vpack.c.bf16 %v47_v5, %v46_v4  ;;  %v63_v8 = vld [vmem:[#allocation2 + $0x88] sm:$0xff]  ;;  %v2031_v11 = vld [vmem:[#allocation4 + $0x78] ss:$12 sps:$4 sm:$0xff]   ;;  %v48_v14 = vld [vmem:[#allocation2 + $0x10] sm:$0xff] }
  0x2a   :  { %v2160_v9 = vpack.c.bf16 %v63_v8, %v62_v6  ;;  %v2030_v10 = vld [vmem:[#allocation4 + $0x60] ss:$12 sps:$4 sm:$0xff]   ;;  %v2033_v13 = vld [vmem:[#allocation4 + $0xa8] ss:$12 sps:$4 sm:$0xff]   ;;  %v49_v15 = vld [vmem:[#allocation2 + $0x18] sm:$0xff] }
  0x2b   :  { %1876 = vmatprep.mubr.bf16.mxu0 %v2158_v7  ;;  %v64_v16 = vld [vmem:[#allocation2 + $0x90] sm:$0xff]  ;;  %v65_v17 = vld [vmem:[#allocation2 + $0x98] sm:$0xff]  ;;  %v50_v20 = vld [vmem:[#allocation2 + $0x20] sm:$0xff]  ;;  %v2164_v22 = vpack.c.bf16 %v49_v15, %v48_v14 }
  0x2c   :  { %1863 = vmatpush3.bf16.msra.mxu0 %v2027_v1  ;;  %2013 = vmatpush3.bf16.msra.mxu1 %v2027_v1  ;;  %v2034_v18 = vld [vmem:[#allocation4 + $0x4] ss:$12 sps:$4 sm:$0xff]   ;;  %v2035_v19 = vld [vmem:[#allocation4 + $0x8] ss:$12 sps:$4 sm:$0xff]   ;;  %v2166_v23 = vpack.c.bf16 %v65_v17, %v64_v16  ;;  %v2037_v27 = vld [vmem:[#allocation4 + $0x20] ss:$12 sps:$4 sm:$0xff]  }
  0x2d   :  { %1864 = vmatprep.subr.bf16.mxu0 %v2028_v2  ;;  %2006 = vmatprep.subr.bf16.mxu1 %v2028_v2  ;;  %v51_v21 = vld [vmem:[#allocation2 + $0x28] sm:$0xff]  ;;  %v66_v24 = vld [vmem:[#allocation2 + $0xa0] sm:$0xff]  ;;  %v52_v30 = vld [vmem:[#allocation2 + $0x30] sm:$0xff] }
  0x2e   :  { %1892 = vmatprep.mubr.bf16.mxu1 %v2160_v9  ;;  %v67_v25 = vld [vmem:[#allocation2 + $0xa8] sm:$0xff]  ;;  %v2168_v28 = vpack.c.bf16 %v51_v21, %v50_v20  ;;  %v53_v31 = vld [vmem:[#allocation2 + $0x38] sm:$0xff]  ;;  %v68_v32 = vld [vmem:[#allocation2 + $0xb0] sm:$0xff] }
  0x2f   :  { %v2036_v26 = vld [vmem:[#allocation4 + $0x1c] ss:$12 sps:$4 sm:$0xff]   ;;  %v2170_v29 = vpack.c.bf16 %v67_v25, %v66_v24  ;;  %v2038_v34 = vld [vmem:[#allocation4 + $0x34] ss:$12 sps:$4 sm:$0xff]   ;;  %v2039_v35 = vld [vmem:[#allocation4 + $0x38] ss:$12 sps:$4 sm:$0xff]   ;;  %v2176_v37 = vpack.c.bf16 %v53_v31, %v52_v30 }
  0x30   :  { %1865 = vmatpush3.bf16.msra.mxu0 %v2028_v2  ;;  %2014 = vmatpush3.bf16.msra.mxu1 %v2028_v2  ;;  %v69_v33 = vld [vmem:[#allocation2 + $0xb8] sm:$0xff]  ;;  %v54_v36 = vld [vmem:[#allocation2 + $0x40] sm:$0xff]  ;;  %v55_v39 = vld [vmem:[#allocation2 + $0x48] sm:$0xff] }
  0x31   :  { %1866 = vmatprep.subr.bf16.mxu0 %v2029_v3  ;;  %2007 = vmatprep.subr.bf16.mxu1 %v2029_v3  ;;  %v2178_v38 = vpack.c.bf16 %v69_v33, %v68_v32  ;;  %v70_v40 = vld [vmem:[#allocation2 + $0xc0] sm:$0xff]  ;;  %v71_v41 = vld [vmem:[#allocation2 + $0xc8] sm:$0xff]  ;;  %v2041_v43 = vld [vmem:[#allocation4 + $0x50] ss:$12 sps:$4 sm:$0xff]   ;;  %v2180_v44 = vpack.c.bf16 %v55_v39, %v54_v36 }
  0x32   :  { %v2040_v42 = vld [vmem:[#allocation4 + $0x4c] ss:$12 sps:$4 sm:$0xff]   ;;  %v2182_v45 = vpack.c.bf16 %v71_v41, %v70_v40  ;;  %v56_v46 = vld [vmem:[#allocation2 + $0x50] sm:$0xff]  ;;  %v58_v52 = vld [vmem:[#allocation2 + $0x60] sm:$0xff] }
  0x33   :  { %v57_v47 = vld [vmem:[#allocation2 + $0x58] sm:$0xff]  ;;  %v72_v48 = vld [vmem:[#allocation2 + $0xd0] sm:$0xff]  ;;  %v59_v55 = vld [vmem:[#allocation2 + $0x68] sm:$0xff] }
  0x34   :  { %1867 = vmatpush3.bf16.msra.mxu0 %v2029_v3  ;;  %2015 = vmatpush3.bf16.msra.mxu1 %v2029_v3  ;;  %v73_v49 = vld [vmem:[#allocation2 + $0xd8] sm:$0xff]  ;;  %v2042_v50 = vld [vmem:[#allocation4 + $0x64] ss:$12 sps:$4 sm:$0xff]   ;;  %v2043_v51 = vld [vmem:[#allocation4 + $0x68] ss:$12 sps:$4 sm:$0xff]   ;;  %v83_v53 = vpack.c.bf16 %v57_v47, %v56_v46  ;;  %v84_v60 = vpack.c.bf16 %v59_v55, %v58_v52 }
  0x35   :  { %1868 = vmatprep.subr.bf16.mxu0 %v2030_v10  ;;  %2008 = vmatprep.subr.bf16.mxu1 %v2030_v10  ;;  %v2188_v54 = vpack.c.bf16 %v73_v49, %v72_v48  ;;  %v74_v56 = vld [vmem:[#allocation2 + $0xe0] sm:$0xff]  ;;  %v75_v57 = vld [vmem:[#allocation2 + $0xe8] sm:$0xff]  ;;  %v60_v62 = vld [vmem:[#allocation2 + $0x70] sm:$0xff] }
  0x36   :  { %v2044_v58 = vld [vmem:[#allocation4 + $0x7c] ss:$12 sps:$4 sm:$0xff]   ;;  %v2045_v59 = vld [vmem:[#allocation4 + $0x80] ss:$12 sps:$4 sm:$0xff]   ;;  %v92_v61 = vpack.c.bf16 %v75_v57, %v74_v56  ;;  %v76_v0 = vld [vmem:[#allocation2 + $0xf0] sm:$0xff] }
  0x37   :  { %v61_v63 = vld [vmem:[#allocation2 + $0x78] sm:$0xff]  ;;  %v2046_v2 = vld [vmem:[#allocation4 + $0x94] ss:$12 sps:$4 sm:$0xff]  }
  0x38   :  { %1869 = vmatpush3.bf16.msra.mxu0 %v2030_v10  ;;  %2016 = vmatpush3.bf16.msra.mxu1 %v2030_v10  ;;  %v77_v1 = vld [vmem:[#allocation2 + $0xf8] sm:$0xff]  ;;  %v85_v4 = vpack.c.bf16 %v61_v63, %v60_v62 }
  0x39   :  { %1870 = vmatprep.subr.bf16.mxu0 %v2031_v11  ;;  %2009 = vmatprep.subr.bf16.mxu1 %v2031_v11  ;;  %v2047_v3 = vld [vmem:[#allocation4 + $0x98] ss:$12 sps:$4 sm:$0xff]   ;;  %v93_v5 = vpack.c.bf16 %v77_v1, %v76_v0  ;;  %v2049_v8 = vld [vmem:[#allocation4 + $0xb0] ss:$12 sps:$4 sm:$0xff]  }
  0x3a   :  { %v2048_v6 = vld [vmem:[#allocation4 + $0xac] ss:$12 sps:$4 sm:$0xff]  }
  0x3c   :  { %1871 = vmatpush3.bf16.msra.mxu0 %v2031_v11  ;;  %2017 = vmatpush3.bf16.msra.mxu1 %v2031_v11 }
  0x3d   :  { %1872 = vmatprep.subr.bf16.mxu0 %v2032_v12  ;;  %2010 = vmatprep.subr.bf16.mxu1 %v2032_v12 }
  0x40   :  { %1873 = vmatpush3.bf16.msra.mxu0 %v2032_v12  ;;  %2018 = vmatpush3.bf16.msra.mxu1 %v2032_v12 }
  0x41   :  { %1874 = vmatprep.subr.bf16.mxu0 %v2033_v13  ;;  %2011 = vmatprep.subr.bf16.mxu1 %v2033_v13 }
  0x44   :  { %1875 = vmatpush3.bf16.msra.mxu0 %v2033_v13  ;;  %2019 = vmatpush3.bf16.msra.mxu1 %v2033_v13 }
  0x45   :  { %1908 = vmatprep.subr.bf16.mxu1 %v2034_v18  ;;  %1956 = vmatprep.subr.bf16.mxu0 %v2035_v19 }
  0x47   :  { %1877 = vmatmul.mubr.bf16.vlgmr.msra.gmra.mrb[0].mxu0 %v2164_v22  ;;  %1893 = vmatmul.mubr.bf16.vlgmr.msra.gmra.mrb[0].mxu1 %v2166_v23 }
  0x48   :  { %1909 = vmatpush3.bf16.msra.mxu1 %v2034_v18  ;;  %1957 = vmatpush3.bf16.msra.mxu0 %v2035_v19 }
  0x49   :  { %1910 = vmatprep.subr.bf16.mxu1 %v2036_v26  ;;  %1958 = vmatprep.subr.bf16.mxu0 %v2037_v27 }
  0x4a   :  { %1880 = vmatprep.mubr.bf16.mxu0 %v2168_v28  ;;  %1896 = vmatprep.mubr.bf16.mxu1 %v2170_v29 }
  0x4c   :  { %1911 = vmatpush3.bf16.msra.mxu1 %v2036_v26  ;;  %1959 = vmatpush3.bf16.msra.mxu0 %v2037_v27 }
  0x4d   :  { %1912 = vmatprep.subr.bf16.mxu1 %v2038_v34  ;;  %1960 = vmatprep.subr.bf16.mxu0 %v2039_v35 }
  0x4f   :  { %1881 = vmatmul.mubr.bf16.gmra.mrb[4].mxu0 %v2176_v37  ;;  %1897 = vmatmul.mubr.bf16.gmra.mrb[4].mxu1 %v2178_v38 }
  0x50   :  { %1913 = vmatpush3.bf16.msra.mxu1 %v2038_v34  ;;  %1961 = vmatpush3.bf16.msra.mxu0 %v2039_v35 }
  0x51   :  { %1914 = vmatprep.subr.bf16.mxu1 %v2040_v42  ;;  %1962 = vmatprep.subr.bf16.mxu0 %v2041_v43 }
  0x52   :  { %1884 = vmatprep.mubr.bf16.mxu0 %v2180_v44  ;;  %1900 = vmatprep.mubr.bf16.mxu1 %v2182_v45 }
  0x54   :  { %1915 = vmatpush3.bf16.msra.mxu1 %v2040_v42  ;;  %1963 = vmatpush3.bf16.msra.mxu0 %v2041_v43 }
  0x55   :  { %1916 = vmatprep.subr.bf16.mxu1 %v2042_v50  ;;  %1964 = vmatprep.subr.bf16.mxu0 %v2043_v51 }
  0x57   :  { %1885 = vmatmul.mubr.bf16.gmra.mrb[8].mxu0 %v83_v53  ;;  %1901 = vmatmul.mubr.bf16.gmra.mrb[8].mxu1 %v2188_v54 }
  0x58   :  { %1917 = vmatpush3.bf16.msra.mxu1 %v2042_v50  ;;  %1965 = vmatpush3.bf16.msra.mxu0 %v2043_v51 }
  0x59   :  { %1918 = vmatprep.subr.bf16.mxu1 %v2044_v58  ;;  %1966 = vmatprep.subr.bf16.mxu0 %v2045_v59 }
  0x5a   :  { %1888 = vmatprep.mubr.bf16.mxu0 %v84_v60  ;;  %1904 = vmatprep.mubr.bf16.mxu1 %v92_v61 }
  0x5c   :  { %1919 = vmatpush3.bf16.msra.mxu1 %v2044_v58  ;;  %1967 = vmatpush3.bf16.msra.mxu0 %v2045_v59 }
  0x5d   :  { %1920 = vmatprep.subr.bf16.mxu1 %v2046_v2  ;;  %1968 = vmatprep.subr.bf16.mxu0 %v2047_v3 }
  0x5f   :  { %1889 = vmatmul.mubr.bf16.gmra.mrb[12].mxu0 %v85_v4  ;;  %1905 = vmatmul.mubr.bf16.gmra.mrb[12].mxu1 %v93_v5 }
  0x60   :  { %1921 = vmatpush3.bf16.msra.mxu1 %v2046_v2  ;;  %1969 = vmatpush3.bf16.msra.mxu0 %v2047_v3 }
  0x61   :  { %1922 = vmatprep.subr.bf16.mxu1 %v2048_v6  ;;  %1970 = vmatprep.subr.bf16.mxu0 %v2049_v8 }
  0x62   :  { %1924 = vmatprep.mubr.bf16.mxu1 %v2158_v7  ;;  %1972 = vmatprep.mubr.bf16.mxu0 %v2158_v7 }
  0x64   :  { %1923 = vmatpush3.bf16.msra.mxu1 %v2048_v6  ;;  %1971 = vmatpush3.bf16.msra.mxu0 %v2049_v8 }
  0x67   :  { %1925 = vmatmul.mubr.bf16.vlgmr.msra.gmra.mrb[16].mxu1 %v2164_v22  ;;  %1973 = vmatmul.mubr.bf16.vlgmr.msra.gmra.mrb[16].mxu0 %v2164_v22 }
  0x68   :  { %1928 = vmatprep.mubr.bf16.mxu1 %v2168_v28  ;;  %1976 = vmatprep.mubr.bf16.mxu0 %v2168_v28 }
  0x6f   :  { %1929 = vmatmul.mubr.bf16.gmra.mrb[20].mxu1 %v2176_v37  ;;  %1977 = vmatmul.mubr.bf16.gmra.mrb[20].mxu0 %v2176_v37 }
  0x70   :  { %1932 = vmatprep.mubr.bf16.mxu1 %v2180_v44  ;;  %1980 = vmatprep.mubr.bf16.mxu0 %v2180_v44 }
  0x77   :  { %1933 = vmatmul.mubr.bf16.gmra.mrb[24].mxu1 %v83_v53  ;;  %1981 = vmatmul.mubr.bf16.gmra.mrb[24].mxu0 %v83_v53 }
  0x78   :  { %1936 = vmatprep.mubr.bf16.mxu1 %v84_v60  ;;  %1984 = vmatprep.mubr.bf16.mxu0 %v84_v60 }
  0x7f   :  { %1937 = vmatmul.mubr.bf16.gmra.mrb[28].mxu1 %v85_v4  ;;  %1985 = vmatmul.mubr.bf16.gmra.mrb[28].mxu0 %v85_v4 }
  0x80   :  { %1940 = vmatprep.mubr.bf16.mxu1 %v2160_v9  ;;  %1988 = vmatprep.mubr.bf16.mxu0 %v2160_v9  ;;  %v2216_v9 = vld [vmem:[%s2470_s2] ss:$0 sm:$0xff] }
  0x87   :  { %1941 = vmatmul.mubr.bf16.gmra.mrb[32].mxu1 %v2166_v23  ;;  %1989 = vmatmul.mubr.bf16.gmra.mrb[32].mxu0 %v2166_v23 }
  0x88   :  { %1944 = vmatprep.mubr.bf16.mxu1 %v2170_v29  ;;  %1992 = vmatprep.mubr.bf16.mxu0 %v2170_v29 }
  0x8f   :  { %1945 = vmatmul.mubr.bf16.gmra.mrb[36].mxu1 %v2178_v38  ;;  %1993 = vmatmul.mubr.bf16.gmra.mrb[36].mxu0 %v2178_v38 }
  0x90   :  { %1948 = vmatprep.mubr.bf16.mxu1 %v2182_v45  ;;  %1996 = vmatprep.mubr.bf16.mxu0 %v2182_v45 }
  0x97   :  { %1949 = vmatmul.mubr.bf16.gmra.mrb[40].mxu1 %v2188_v54  ;;  %1997 = vmatmul.mubr.bf16.gmra.mrb[40].mxu0 %v2188_v54 }
  0x98   :  { %1952 = vmatprep.mubr.bf16.mxu1 %v92_v61  ;;  %2000 = vmatprep.mubr.bf16.mxu0 %v92_v61 }
  0x9f   :  { %1953 = vmatmul.mubr.bf16.gmra.mrb[44].mxu1 %v93_v5  ;;  %2001 = vmatmul.mubr.bf16.gmra.mrb[44].mxu0 %v93_v5 }
 0x11a   :  { %v1878_v7 = vpop.f32.mrb[0].mxu0  ;;  %v1894_v10 = vpop.f32.mrb[0].mxu1 }
 0x11b   :  { %v199_v11 = vpop.f32.mrb[1].mxu0  ;;  %v263_v12 = vpop.f32.mrb[1].mxu1  ;;  %v208_v15 = vadd.f32 %v1878_v7, %v2216_v9  ;;  %v272_v16 = vadd.f32 %v1894_v10, %v2216_v9 }
 0x11c   :  { %v1879_v13 = vpop.f32.mrb[2].mxu0  ;;  %v1895_v14 = vpop.f32.mrb[2].mxu1  ;;  %v200_v21 = vadd.f32 %v2216_v9, %v199_v11  ;;  %v264_v22 = vadd.f32 %v2216_v9, %v263_v12 }
 0x11d   :  { %v211_v17 = vadd.f32 %v1879_v13, %v2216_v9  ;;  %v275_v18 = vadd.f32 %v1895_v14, %v2216_v9  ;;  %v202_v19 = vpop.f32.mrb[3].mxu0  ;;  %v266_v20 = vpop.f32.mrb[3].mxu1 }
 0x11e   :  { %v203_v23 = vadd.f32 %v2216_v9, %v202_v19  ;;  %v267_v24 = vadd.f32 %v2216_v9, %v266_v20 }
 0x11f   :  { %v1511_v25 = vpack.c.bf16 %v211_v17, %v208_v15  ;;  %v1551_v26 = vpack.c.bf16 %v275_v18, %v272_v16 }
 0x120   :  { %v1506_v27 = vpack.c.bf16 %v203_v23, %v200_v21  ;;  %v1546_v28 = vpack.c.bf16 %v267_v24, %v264_v22 }
 0x121   :  { %1743 = vst [vmem:[%s2471_s3 + $0x8] sm:$0xff] %v1511_v25   ;;  %1751 = vst [vmem:[%s2471_s3 + $0x48] sm:$0xff] %v1551_v26   ;;  %v2301_v26 = vld [vmem:[%s2470_s2 + $0x1] ss:$0 sm:$0xff] }
 0x122   :  { %1507 = vst [vmem:[%s2471_s3] sm:$0xff] %v1506_v27   ;;  %1750 = vst [vmem:[%s2471_s3 + $0x40] sm:$0xff] %v1546_v28   ;;  %v1882_v29 = vpop.f32.mrb[4].mxu0  ;;  %v1898_v30 = vpop.f32.mrb[4].mxu1  ;;  %v2306_v28 = vld [vmem:[%s2470_s2 + $0x2] ss:$0 sm:$0xff] }
 0x123   :  { %v215_v31 = vpop.f32.mrb[5].mxu0  ;;  %v279_v32 = vpop.f32.mrb[5].mxu1  ;;  %v224_v35 = vadd.f32 %v1882_v29, %v2216_v9  ;;  %v288_v36 = vadd.f32 %v1898_v30, %v2216_v9 }
 0x124   :  { %v1883_v33 = vpop.f32.mrb[6].mxu0  ;;  %v1899_v34 = vpop.f32.mrb[6].mxu1  ;;  %v216_v41 = vadd.f32 %v2216_v9, %v215_v31  ;;  %v280_v42 = vadd.f32 %v2216_v9, %v279_v32 }
 0x125   :  { %v227_v37 = vadd.f32 %v1883_v33, %v2216_v9  ;;  %v291_v38 = vadd.f32 %v1899_v34, %v2216_v9  ;;  %v218_v39 = vpop.f32.mrb[7].mxu0  ;;  %v282_v40 = vpop.f32.mrb[7].mxu1 }
 0x126   :  { %v219_v43 = vadd.f32 %v2216_v9, %v218_v39  ;;  %v283_v44 = vadd.f32 %v2216_v9, %v282_v40 }
 0x127   :  { %v1521_v45 = vpack.c.bf16 %v227_v37, %v224_v35  ;;  %v1561_v46 = vpack.c.bf16 %v291_v38, %v288_v36 }
 0x128   :  { %v1516_v47 = vpack.c.bf16 %v219_v43, %v216_v41  ;;  %v1556_v48 = vpack.c.bf16 %v283_v44, %v280_v42 }
 0x129   :  { %1745 = vst [vmem:[%s2471_s3 + $0x18] sm:$0xff] %v1521_v45   ;;  %1753 = vst [vmem:[%s2471_s3 + $0x58] sm:$0xff] %v1561_v46  }
 0x12a   :  { %1744 = vst [vmem:[%s2471_s3 + $0x10] sm:$0xff] %v1516_v47   ;;  %1752 = vst [vmem:[%s2471_s3 + $0x50] sm:$0xff] %v1556_v48   ;;  %v1886_v49 = vpop.f32.mrb[8].mxu0  ;;  %v1902_v50 = vpop.f32.mrb[8].mxu1 }
 0x12b   :  { %v231_v51 = vpop.f32.mrb[9].mxu0  ;;  %v295_v52 = vpop.f32.mrb[9].mxu1  ;;  %v240_v55 = vadd.f32 %v1886_v49, %v2216_v9  ;;  %v304_v56 = vadd.f32 %v1902_v50, %v2216_v9 }
 0x12c   :  { %v1887_v53 = vpop.f32.mrb[10].mxu0  ;;  %v1903_v54 = vpop.f32.mrb[10].mxu1  ;;  %v232_v61 = vadd.f32 %v2216_v9, %v231_v51  ;;  %v296_v62 = vadd.f32 %v2216_v9, %v295_v52 }
 0x12d   :  { %v243_v57 = vadd.f32 %v1887_v53, %v2216_v9  ;;  %v307_v58 = vadd.f32 %v1903_v54, %v2216_v9  ;;  %v234_v59 = vpop.f32.mrb[11].mxu0  ;;  %v298_v60 = vpop.f32.mrb[11].mxu1 }
 0x12e   :  { %v235_v63 = vadd.f32 %v2216_v9, %v234_v59  ;;  %v299_v0 = vadd.f32 %v2216_v9, %v298_v60 }
 0x12f   :  { %v1531_v1 = vpack.c.bf16 %v243_v57, %v240_v55  ;;  %v1571_v2 = vpack.c.bf16 %v307_v58, %v304_v56 }
 0x130   :  { %v1526_v3 = vpack.c.bf16 %v235_v63, %v232_v61  ;;  %v1566_v4 = vpack.c.bf16 %v299_v0, %v296_v62 }
 0x131   :  { %1747 = vst [vmem:[%s2471_s3 + $0x28] sm:$0xff] %v1531_v1   ;;  %1755 = vst [vmem:[%s2471_s3 + $0x68] sm:$0xff] %v1571_v2  }
 0x132   :  { %1746 = vst [vmem:[%s2471_s3 + $0x20] sm:$0xff] %v1526_v3   ;;  %1754 = vst [vmem:[%s2471_s3 + $0x60] sm:$0xff] %v1566_v4   ;;  %v1890_v5 = vpop.f32.mrb[12].mxu0  ;;  %v1906_v6 = vpop.f32.mrb[12].mxu1 }
 0x133   :  { %v247_v8 = vpop.f32.mrb[13].mxu0  ;;  %v311_v7 = vpop.f32.mrb[13].mxu1  ;;  %v256_v12 = vadd.f32 %v1890_v5, %v2216_v9  ;;  %v320_v13 = vadd.f32 %v1906_v6, %v2216_v9 }
 0x134   :  { %v1891_v10 = vpop.f32.mrb[14].mxu0  ;;  %v1907_v11 = vpop.f32.mrb[14].mxu1  ;;  %v248_v18 = vadd.f32 %v2216_v9, %v247_v8  ;;  %v312_v19 = vadd.f32 %v2216_v9, %v311_v7 }
 0x135   :  { %v259_v14 = vadd.f32 %v1891_v10, %v2216_v9  ;;  %v323_v15 = vadd.f32 %v1907_v11, %v2216_v9  ;;  %v250_v16 = vpop.f32.mrb[15].mxu0  ;;  %v314_v17 = vpop.f32.mrb[15].mxu1 }
 0x136   :  { %v251_v20 = vadd.f32 %v2216_v9, %v250_v16  ;;  %v315_v21 = vadd.f32 %v2216_v9, %v314_v17 }
 0x137   :  { %v1541_v22 = vpack.c.bf16 %v259_v14, %v256_v12  ;;  %v1581_v23 = vpack.c.bf16 %v323_v15, %v320_v13 }
 0x138   :  { %v1536_v24 = vpack.c.bf16 %v251_v20, %v248_v18  ;;  %v1576_v25 = vpack.c.bf16 %v315_v21, %v312_v19 }
 0x139   :  { %1749 = vst [vmem:[%s2471_s3 + $0x38] sm:$0xff] %v1541_v22   ;;  %1757 = vst [vmem:[%s2471_s3 + $0x78] sm:$0xff] %v1581_v23  }
 0x13a   :  { %1748 = vst [vmem:[%s2471_s3 + $0x30] sm:$0xff] %v1536_v24   ;;  %1756 = vst [vmem:[%s2471_s3 + $0x70] sm:$0xff] %v1576_v25   ;;  %v1926_v9 = vpop.f32.mrb[16].mxu1  ;;  %v1974_v27 = vpop.f32.mrb[16].mxu0 }
 0x13b   :  { %v591_v29 = vpop.f32.mrb[17].mxu1  ;;  %v983_v30 = vpop.f32.mrb[17].mxu0  ;;  %v600_v33 = vadd.f32 %v1926_v9, %v2301_v26  ;;  %v992_v34 = vadd.f32 %v1974_v27, %v2306_v28 }
 0x13c   :  { %v1927_v31 = vpop.f32.mrb[18].mxu1  ;;  %v1975_v32 = vpop.f32.mrb[18].mxu0  ;;  %v592_v39 = vadd.f32 %v2301_v26, %v591_v29  ;;  %v984_v40 = vadd.f32 %v2306_v28, %v983_v30 }
 0x13d   :  { %v603_v35 = vadd.f32 %v1927_v31, %v2301_v26  ;;  %v995_v36 = vadd.f32 %v1975_v32, %v2306_v28  ;;  %v594_v37 = vpop.f32.mrb[19].mxu1  ;;  %v986_v38 = vpop.f32.mrb[19].mxu0 }
 0x13e   :  { %v595_v41 = vadd.f32 %v2301_v26, %v594_v37  ;;  %v987_v42 = vadd.f32 %v2306_v28, %v986_v38 }
 0x13f   :  { %v1591_v43 = vpack.c.bf16 %v603_v35, %v600_v33  ;;  %v1671_v44 = vpack.c.bf16 %v995_v36, %v992_v34 }
 0x140   :  { %v1586_v45 = vpack.c.bf16 %v595_v41, %v592_v39  ;;  %v1666_v46 = vpack.c.bf16 %v987_v42, %v984_v40 }
 0x141   :  { %1758 = vst [vmem:[%s2472_s4 + $0x8] sm:$0xff] %v1591_v43   ;;  %1773 = vst [vmem:[%s2473_s5 + $0x8] sm:$0xff] %v1671_v44  }
 0x142   :  { %1587 = vst [vmem:[%s2472_s4] sm:$0xff] %v1586_v45   ;;  %1667 = vst [vmem:[%s2473_s5] sm:$0xff] %v1666_v46   ;;  %v1930_v47 = vpop.f32.mrb[20].mxu1  ;;  %v1978_v48 = vpop.f32.mrb[20].mxu0 }
 0x143   :  { %v607_v49 = vpop.f32.mrb[21].mxu1  ;;  %v999_v50 = vpop.f32.mrb[21].mxu0  ;;  %v616_v53 = vadd.f32 %v1930_v47, %v2301_v26  ;;  %v1008_v54 = vadd.f32 %v1978_v48, %v2306_v28 }
 0x144   :  { %v1931_v51 = vpop.f32.mrb[22].mxu1  ;;  %v1979_v52 = vpop.f32.mrb[22].mxu0  ;;  %v608_v59 = vadd.f32 %v2301_v26, %v607_v49  ;;  %v1000_v60 = vadd.f32 %v2306_v28, %v999_v50 }
 0x145   :  { %v619_v55 = vadd.f32 %v1931_v51, %v2301_v26  ;;  %v1011_v56 = vadd.f32 %v1979_v52, %v2306_v28  ;;  %v610_v57 = vpop.f32.mrb[23].mxu1  ;;  %v1002_v58 = vpop.f32.mrb[23].mxu0 }
 0x146   :  { %v611_v61 = vadd.f32 %v2301_v26, %v610_v57  ;;  %v1003_v62 = vadd.f32 %v2306_v28, %v1002_v58 }
 0x147   :  { %v1601_v63 = vpack.c.bf16 %v619_v55, %v616_v53  ;;  %v1681_v0 = vpack.c.bf16 %v1011_v56, %v1008_v54 }
 0x148   :  { %v1596_v1 = vpack.c.bf16 %v611_v61, %v608_v59  ;;  %v1676_v2 = vpack.c.bf16 %v1003_v62, %v1000_v60 }
 0x149   :  { %1760 = vst [vmem:[%s2472_s4 + $0x18] sm:$0xff] %v1601_v63   ;;  %1775 = vst [vmem:[%s2473_s5 + $0x18] sm:$0xff] %v1681_v0  }
 0x14a   :  { %1759 = vst [vmem:[%s2472_s4 + $0x10] sm:$0xff] %v1596_v1   ;;  %1774 = vst [vmem:[%s2473_s5 + $0x10] sm:$0xff] %v1676_v2   ;;  %v1934_v3 = vpop.f32.mrb[24].mxu1  ;;  %v1982_v4 = vpop.f32.mrb[24].mxu0 }
 0x14b   :  { %v623_v5 = vpop.f32.mrb[25].mxu1  ;;  %v1015_v6 = vpop.f32.mrb[25].mxu0  ;;  %v632_v10 = vadd.f32 %v1934_v3, %v2301_v26  ;;  %v1024_v11 = vadd.f32 %v1982_v4, %v2306_v28 }
 0x14c   :  { %v1935_v8 = vpop.f32.mrb[26].mxu1  ;;  %v1983_v7 = vpop.f32.mrb[26].mxu0  ;;  %v624_v16 = vadd.f32 %v2301_v26, %v623_v5  ;;  %v1016_v17 = vadd.f32 %v2306_v28, %v1015_v6 }
 0x14d   :  { %v635_v12 = vadd.f32 %v1935_v8, %v2301_v26  ;;  %v1027_v13 = vadd.f32 %v1983_v7, %v2306_v28  ;;  %v626_v14 = vpop.f32.mrb[27].mxu1  ;;  %v1018_v15 = vpop.f32.mrb[27].mxu0 }
 0x14e   :  { %v627_v18 = vadd.f32 %v2301_v26, %v626_v14  ;;  %v1019_v19 = vadd.f32 %v2306_v28, %v1018_v15 }
 0x14f   :  { %v1611_v20 = vpack.c.bf16 %v635_v12, %v632_v10  ;;  %v1691_v21 = vpack.c.bf16 %v1027_v13, %v1024_v11 }
 0x150   :  { %v1606_v22 = vpack.c.bf16 %v627_v18, %v624_v16  ;;  %v1686_v23 = vpack.c.bf16 %v1019_v19, %v1016_v17 }
 0x151   :  { %1762 = vst [vmem:[%s2472_s4 + $0x28] sm:$0xff] %v1611_v20   ;;  %1777 = vst [vmem:[%s2473_s5 + $0x28] sm:$0xff] %v1691_v21  }
 0x152   :  { %1761 = vst [vmem:[%s2472_s4 + $0x20] sm:$0xff] %v1606_v22   ;;  %1776 = vst [vmem:[%s2473_s5 + $0x20] sm:$0xff] %v1686_v23   ;;  %v1938_v24 = vpop.f32.mrb[28].mxu1  ;;  %v1986_v25 = vpop.f32.mrb[28].mxu0 }
 0x153   :  { %v639_v9 = vpop.f32.mrb[29].mxu1  ;;  %v1031_v27 = vpop.f32.mrb[29].mxu0  ;;  %v648_v31 = vadd.f32 %v1938_v24, %v2301_v26  ;;  %v1040_v32 = vadd.f32 %v1986_v25, %v2306_v28 }
 0x154   :  { %v1939_v29 = vpop.f32.mrb[30].mxu1  ;;  %v1987_v30 = vpop.f32.mrb[30].mxu0  ;;  %v640_v37 = vadd.f32 %v2301_v26, %v639_v9  ;;  %v1032_v38 = vadd.f32 %v2306_v28, %v1031_v27 }
 0x155   :  { %v651_v33 = vadd.f32 %v1939_v29, %v2301_v26  ;;  %v1043_v34 = vadd.f32 %v1987_v30, %v2306_v28  ;;  %v642_v35 = vpop.f32.mrb[31].mxu1  ;;  %v1034_v36 = vpop.f32.mrb[31].mxu0 }
 0x156   :  { %v643_v39 = vadd.f32 %v2301_v26, %v642_v35  ;;  %v1035_v40 = vadd.f32 %v2306_v28, %v1034_v36 }
 0x157   :  { %v1621_v41 = vpack.c.bf16 %v651_v33, %v648_v31  ;;  %v1701_v42 = vpack.c.bf16 %v1043_v34, %v1040_v32 }
 0x158   :  { %v1616_v43 = vpack.c.bf16 %v643_v39, %v640_v37  ;;  %v1696_v44 = vpack.c.bf16 %v1035_v40, %v1032_v38 }
 0x159   :  { %1764 = vst [vmem:[%s2472_s4 + $0x38] sm:$0xff] %v1621_v41   ;;  %1779 = vst [vmem:[%s2473_s5 + $0x38] sm:$0xff] %v1701_v42  }
 0x15a   :  { %1763 = vst [vmem:[%s2472_s4 + $0x30] sm:$0xff] %v1616_v43   ;;  %1778 = vst [vmem:[%s2473_s5 + $0x30] sm:$0xff] %v1696_v44   ;;  %v1942_v45 = vpop.f32.mrb[32].mxu1  ;;  %v1990_v46 = vpop.f32.mrb[32].mxu0 }
 0x15b   :  { %v655_v47 = vpop.f32.mrb[33].mxu1  ;;  %v1047_v48 = vpop.f32.mrb[33].mxu0  ;;  %v664_v51 = vadd.f32 %v1942_v45, %v2301_v26  ;;  %v1056_v52 = vadd.f32 %v1990_v46, %v2306_v28 }
 0x15c   :  { %v1943_v49 = vpop.f32.mrb[34].mxu1  ;;  %v1991_v50 = vpop.f32.mrb[34].mxu0  ;;  %v656_v57 = vadd.f32 %v2301_v26, %v655_v47  ;;  %v1048_v58 = vadd.f32 %v2306_v28, %v1047_v48 }
 0x15d   :  { %v667_v53 = vadd.f32 %v1943_v49, %v2301_v26  ;;  %v1059_v54 = vadd.f32 %v1991_v50, %v2306_v28  ;;  %v658_v55 = vpop.f32.mrb[35].mxu1  ;;  %v1050_v56 = vpop.f32.mrb[35].mxu0 }
 0x15e   :  { %v659_v59 = vadd.f32 %v2301_v26, %v658_v55  ;;  %v1051_v60 = vadd.f32 %v2306_v28, %v1050_v56 }
 0x15f   :  { %v1631_v61 = vpack.c.bf16 %v667_v53, %v664_v51  ;;  %v1711_v62 = vpack.c.bf16 %v1059_v54, %v1056_v52 }
 0x160   :  { %v1626_v63 = vpack.c.bf16 %v659_v59, %v656_v57  ;;  %v1706_v0 = vpack.c.bf16 %v1051_v60, %v1048_v58 }
 0x161   :  { %1766 = vst [vmem:[%s2472_s4 + $0x48] sm:$0xff] %v1631_v61   ;;  %1781 = vst [vmem:[%s2473_s5 + $0x48] sm:$0xff] %v1711_v62  }
 0x162   :  { %1765 = vst [vmem:[%s2472_s4 + $0x40] sm:$0xff] %v1626_v63   ;;  %1780 = vst [vmem:[%s2473_s5 + $0x40] sm:$0xff] %v1706_v0   ;;  %v1946_v1 = vpop.f32.mrb[36].mxu1  ;;  %v1994_v2 = vpop.f32.mrb[36].mxu0 }
 0x163   :  { %v671_v3 = vpop.f32.mrb[37].mxu1  ;;  %v1063_v4 = vpop.f32.mrb[37].mxu0  ;;  %v680_v8 = vadd.f32 %v1946_v1, %v2301_v26  ;;  %v1072_v7 = vadd.f32 %v1994_v2, %v2306_v28 }
 0x164   :  { %v1947_v5 = vpop.f32.mrb[38].mxu1  ;;  %v1995_v6 = vpop.f32.mrb[38].mxu0  ;;  %v672_v14 = vadd.f32 %v2301_v26, %v671_v3  ;;  %v1064_v15 = vadd.f32 %v2306_v28, %v1063_v4 }
 0x165   :  { %v683_v10 = vadd.f32 %v1947_v5, %v2301_v26  ;;  %v1075_v11 = vadd.f32 %v1995_v6, %v2306_v28  ;;  %v674_v12 = vpop.f32.mrb[39].mxu1  ;;  %v1066_v13 = vpop.f32.mrb[39].mxu0 }
 0x166   :  { %v675_v16 = vadd.f32 %v2301_v26, %v674_v12  ;;  %v1067_v17 = vadd.f32 %v2306_v28, %v1066_v13 }
 0x167   :  { %v1641_v18 = vpack.c.bf16 %v683_v10, %v680_v8  ;;  %v1721_v19 = vpack.c.bf16 %v1075_v11, %v1072_v7 }
 0x168   :  { %v1636_v20 = vpack.c.bf16 %v675_v16, %v672_v14  ;;  %v1716_v21 = vpack.c.bf16 %v1067_v17, %v1064_v15 }
 0x169   :  { %1768 = vst [vmem:[%s2472_s4 + $0x58] sm:$0xff] %v1641_v18   ;;  %1783 = vst [vmem:[%s2473_s5 + $0x58] sm:$0xff] %v1721_v19  }
 0x16a   :  { %1767 = vst [vmem:[%s2472_s4 + $0x50] sm:$0xff] %v1636_v20   ;;  %1782 = vst [vmem:[%s2473_s5 + $0x50] sm:$0xff] %v1716_v21   ;;  %v1950_v22 = vpop.f32.mrb[40].mxu1  ;;  %v1998_v23 = vpop.f32.mrb[40].mxu0 }
 0x16b   :  { %v687_v24 = vpop.f32.mrb[41].mxu1  ;;  %v1079_v25 = vpop.f32.mrb[41].mxu0  ;;  %v696_v29 = vadd.f32 %v1950_v22, %v2301_v26  ;;  %v1088_v30 = vadd.f32 %v1998_v23, %v2306_v28 }
 0x16c   :  { %v1951_v9 = vpop.f32.mrb[42].mxu1  ;;  %v1999_v27 = vpop.f32.mrb[42].mxu0  ;;  %v688_v35 = vadd.f32 %v2301_v26, %v687_v24  ;;  %v1080_v36 = vadd.f32 %v2306_v28, %v1079_v25 }
 0x16d   :  { %v699_v31 = vadd.f32 %v1951_v9, %v2301_v26  ;;  %v1091_v32 = vadd.f32 %v1999_v27, %v2306_v28  ;;  %v690_v33 = vpop.f32.mrb[43].mxu1  ;;  %v1082_v34 = vpop.f32.mrb[43].mxu0 }
 0x16e   :  { %v691_v37 = vadd.f32 %v2301_v26, %v690_v33  ;;  %v1083_v38 = vadd.f32 %v2306_v28, %v1082_v34 }
 0x16f   :  { %v1651_v39 = vpack.c.bf16 %v699_v31, %v696_v29  ;;  %v1731_v40 = vpack.c.bf16 %v1091_v32, %v1088_v30 }
 0x170   :  { %v1646_v41 = vpack.c.bf16 %v691_v37, %v688_v35  ;;  %v1726_v42 = vpack.c.bf16 %v1083_v38, %v1080_v36 }
 0x171   :  { %1770 = vst [vmem:[%s2472_s4 + $0x68] sm:$0xff] %v1651_v39   ;;  %1785 = vst [vmem:[%s2473_s5 + $0x68] sm:$0xff] %v1731_v40  }
 0x172   :  { %1769 = vst [vmem:[%s2472_s4 + $0x60] sm:$0xff] %v1646_v41   ;;  %1784 = vst [vmem:[%s2473_s5 + $0x60] sm:$0xff] %v1726_v42   ;;  %v1954_v43 = vpop.f32.mrb[44].mxu1  ;;  %v2002_v44 = vpop.f32.mrb[44].mxu0 }
 0x173   :  { %v703_v45 = vpop.f32.mrb[45].mxu1  ;;  %v1095_v46 = vpop.f32.mrb[45].mxu0  ;;  %v712_v49 = vadd.f32 %v1954_v43, %v2301_v26  ;;  %v1104_v50 = vadd.f32 %v2002_v44, %v2306_v28 }
 0x174   :  { %v1955_v47 = vpop.f32.mrb[46].mxu1  ;;  %v2003_v48 = vpop.f32.mrb[46].mxu0  ;;  %v704_v55 = vadd.f32 %v2301_v26, %v703_v45  ;;  %v1096_v56 = vadd.f32 %v2306_v28, %v1095_v46 }
 0x175   :  { %v715_v51 = vadd.f32 %v1955_v47, %v2301_v26  ;;  %v1107_v52 = vadd.f32 %v2003_v48, %v2306_v28  ;;  %v706_v53 = vpop.f32.mrb[47].mxu1  ;;  %v1098_v54 = vpop.f32.mrb[47].mxu0 }
 0x176   :  { %v707_v57 = vadd.f32 %v2301_v26, %v706_v53  ;;  %v1099_v58 = vadd.f32 %v2306_v28, %v1098_v54 }
 0x177   :  { %v1661_v59 = vpack.c.bf16 %v715_v51, %v712_v49  ;;  %v1741_v60 = vpack.c.bf16 %v1107_v52, %v1104_v50 }
 0x178   :  { %v1656_v61 = vpack.c.bf16 %v707_v57, %v704_v55  ;;  %v1736_v62 = vpack.c.bf16 %v1099_v58, %v1096_v56 }
 0x179   :  { %1772 = vst [vmem:[%s2472_s4 + $0x78] sm:$0xff] %v1661_v59   ;;  %1787 = vst [vmem:[%s2473_s5 + $0x78] sm:$0xff] %v1741_v60  }
 0x17a   :  { %1771 = vst [vmem:[%s2472_s4 + $0x70] sm:$0xff] %v1656_v61   ;;  %1786 = vst [vmem:[%s2473_s5 + $0x70] sm:$0xff] %v1736_v62  }
 0x17b   :  { %1282 = vsyncpa [#allocation3], 1 }
 0x17c   :  { %1283 = vsyncpa [#allocation5], 1 }

// kernel: _forward.5
= control target key start
LH: loop header
LB: loop body
LE: loop exit
PB: predicated region body
PF: predicated region fallthrough
CT: control target
= control target key end

     0   :  { %s5213_s0 = inlined_call_operand.vmem [shape: f32[256,128], index: 0, kind: input, shape index: {}]   ;;  %s5214_s1 = inlined_call_operand.vmem [shape: bf16[256,128], index: 1, kind: input, shape index: {}]   ;;  %s5215_s2 = inlined_call_operand.vmem [shape: bf16[128,128], index: 2, kind: input, shape index: {}]   ;;  %s5216_s3 = inlined_call_operand.vmem [shape: f32[1,128], index: 3, kind: input, shape index: {}]   ;;  %s5217_s4 = inlined_call_operand.vmem [shape: bf16[128,256], index: 4, kind: input, shape index: {}]   ;;  %s5218_s5 = inlined_call_operand.vmem [shape: f32[1,256], index: 5, kind: input, shape index: {}]   ;;  %s5219_s6 = inlined_call_operand.vmem [shape: bf16[256,128], index: 6, kind: input, shape index: {}]   ;;  %s5220_s7 = inlined_call_operand.vmem [shape: f32[1,128], index: 7, kind: input, shape index: {}]   ;;  %s5221_s8 = inlined_call_operand.vmem [shape: f32[1,128], index: 8, kind: input, shape index: {}]   ;;  %s5222_s9 = inlined_call_operand.vmem [shape: f32[1,128], index: 9, kind: input, shape index: {}]   ;;  %s5223_s10 = inlined_call_operand.vmem [shape: f32[1,128], index: 10, kind: input, shape index: {}]   ;;  %s5224_s11 = inlined_call_operand.vmem [shape: f32[1,128], index: 11, kind: input, shape index: {}]   ;;  %s5225_s12 = inlined_call_operand.hbm [shape: f32[256,128], index: 12, kind: output, shape index: {}]  }
   0x1   :  { %v2895_v0 = vld [vmem:[%s5215_s2] sm:$0xff]   ;;  %v2896_v1 = vld [vmem:[%s5215_s2 + $0x8] sm:$0xff]   ;;  %v2897_v2 = vld [vmem:[%s5215_s2 + $0x10] sm:$0xff]  }
   0x2   :  { %2827 = vmatprep.subr.bf16.mxu0 %v2895_v0  ;;  %2875 = vmatprep.subr.bf16.mxu1 %v2895_v0  ;;  %v2898_v3 = vld [vmem:[%s5215_s2 + $0x18] sm:$0xff]   ;;  %v2903_v4 = vld [vmem:[%s5214_s1] sm:$0xff]   ;;  %v2900_v6 = vld [vmem:[%s5215_s2 + $0x28] sm:$0xff]  }
   0x3   :  { %2828 = vmatpush3.bf16.msra.mxu0 %v2895_v0  ;;  %2883 = vmatpush3.bf16.msra.mxu1 %v2895_v0  ;;  %v2899_v5 = vld [vmem:[%s5215_s2 + $0x20] sm:$0xff]   ;;  %v2901_v8 = vld [vmem:[%s5215_s2 + $0x30] sm:$0xff]   ;;  %v2902_v9 = vld [vmem:[%s5215_s2 + $0x38] sm:$0xff]  }
   0x4   :  { %2829 = vmatprep.subr.bf16.mxu0 %v2896_v1  ;;  %2876 = vmatprep.subr.bf16.mxu1 %v2896_v1  ;;  %v2911_v7 = vld [vmem:[%s5214_s1 + $0x40] sm:$0xff]   ;;  %v2904_v10 = vld [vmem:[%s5214_s1 + $0x8] sm:$0xff]   ;;  %v2905_v12 = vld [vmem:[%s5214_s1 + $0x10] sm:$0xff]  }
   0x5   :  { %2843 = vmatprep.mubr.bf16.mxu0 %v2903_v4  ;;  %2859 = vmatprep.mubr.bf16.mxu1 %v2911_v7  ;;  %v2912_v11 = vld [vmem:[%s5214_s1 + $0x48] sm:$0xff]   ;;  %v2913_v13 = vld [vmem:[%s5214_s1 + $0x50] sm:$0xff]   ;;  %v2906_v14 = vld [vmem:[%s5214_s1 + $0x18] sm:$0xff]  }
   0x6   :  { %v2914_v15 = vld [vmem:[%s5214_s1 + $0x58] sm:$0xff]   ;;  %v2907_v16 = vld [vmem:[%s5214_s1 + $0x20] sm:$0xff]  }
   0x7   :  { %2830 = vmatpush3.bf16.msra.mxu0 %v2896_v1  ;;  %2884 = vmatpush3.bf16.msra.mxu1 %v2896_v1  ;;  %v2915_v17 = vld [vmem:[%s5214_s1 + $0x60] sm:$0xff]  }
   0x8   :  { %2831 = vmatprep.subr.bf16.mxu0 %v2897_v2  ;;  %2877 = vmatprep.subr.bf16.mxu1 %v2897_v2 }
   0xb   :  { %2832 = vmatpush3.bf16.msra.mxu0 %v2897_v2  ;;  %2885 = vmatpush3.bf16.msra.mxu1 %v2897_v2 }
   0xc   :  { %2833 = vmatprep.subr.bf16.mxu0 %v2898_v3  ;;  %2878 = vmatprep.subr.bf16.mxu1 %v2898_v3 }
   0xf   :  { %2834 = vmatpush3.bf16.msra.mxu0 %v2898_v3  ;;  %2886 = vmatpush3.bf16.msra.mxu1 %v2898_v3 }
  0x10   :  { %2835 = vmatprep.subr.bf16.mxu0 %v2899_v5  ;;  %2879 = vmatprep.subr.bf16.mxu1 %v2899_v5 }
  0x13   :  { %2836 = vmatpush3.bf16.msra.mxu0 %v2899_v5  ;;  %2887 = vmatpush3.bf16.msra.mxu1 %v2899_v5 }
  0x14   :  { %2837 = vmatprep.subr.bf16.mxu0 %v2900_v6  ;;  %2880 = vmatprep.subr.bf16.mxu1 %v2900_v6 }
  0x17   :  { %2838 = vmatpush3.bf16.msra.mxu0 %v2900_v6  ;;  %2888 = vmatpush3.bf16.msra.mxu1 %v2900_v6 }
  0x18   :  { %2839 = vmatprep.subr.bf16.mxu0 %v2901_v8  ;;  %2881 = vmatprep.subr.bf16.mxu1 %v2901_v8 }
  0x1b   :  { %2840 = vmatpush3.bf16.msra.mxu0 %v2901_v8  ;;  %2889 = vmatpush3.bf16.msra.mxu1 %v2901_v8 }
  0x1c   :  { %2841 = vmatprep.subr.bf16.mxu0 %v2902_v9  ;;  %2882 = vmatprep.subr.bf16.mxu1 %v2902_v9 }
  0x1f   :  { %2842 = vmatpush3.bf16.msra.mxu0 %v2902_v9  ;;  %2890 = vmatpush3.bf16.msra.mxu1 %v2902_v9 }
  0x22   :  { %2844 = vmatmul.mubr.bf16.vlgmr.msra.gmra.mrb[0].mxu0 %v2904_v10  ;;  %2860 = vmatmul.mubr.bf16.vlgmr.msra.gmra.mrb[0].mxu1 %v2912_v11 }
  0x23   :  { %2847 = vmatprep.mubr.bf16.mxu0 %v2905_v12  ;;  %2863 = vmatprep.mubr.bf16.mxu1 %v2913_v13 }
  0x24   :  { %17 = vsyncpa [#allocation3], 0  ;;  %v2908_v18 = vld [vmem:[%s5214_s1 + $0x28] sm:$0xff]   ;;  %v2909_v20 = vld [vmem:[%s5214_s1 + $0x30] sm:$0xff]  }
  0x25   :  { %v2916_v19 = vld [vmem:[%s5214_s1 + $0x68] sm:$0xff]   ;;  %v2917_v21 = vld [vmem:[%s5214_s1 + $0x70] sm:$0xff]   ;;  %v2910_v22 = vld [vmem:[%s5214_s1 + $0x38] sm:$0xff]  }
  0x26   :  { %v2918_v23 = vld [vmem:[%s5214_s1 + $0x78] sm:$0xff]   ;;  %v3383_v24 = vld [vmem:[%s5216_s3] ss:$0 sm:$0xff]  ;;  %v45_v26 = vld [vmem:[%s5213_s0 + $0x10] sm:$0xff] }
  0x27   :  { %v43_v30 = vld [vmem:[%s5213_s0] sm:$0xff]  ;;  %v46_v41 = vld [vmem:[%s5213_s0 + $0x18] sm:$0xff]  ;;  %v44_v42 = vld [vmem:[%s5213_s0 + $0x8] sm:$0xff] }
  0x28   :  { %v47_v47 = vld [vmem:[%s5213_s0 + $0x20] sm:$0xff]  ;;  %v48_v52 = vld [vmem:[%s5213_s0 + $0x28] sm:$0xff]  ;;  %v49_v53 = vld [vmem:[%s5213_s0 + $0x30] sm:$0xff] }
  0x29   :  { %v50_v57 = vld [vmem:[%s5213_s0 + $0x38] sm:$0xff]  ;;  %v51_v63 = vld [vmem:[%s5213_s0 + $0x40] sm:$0xff]  ;;  %v52_v4 = vld [vmem:[%s5213_s0 + $0x48] sm:$0xff] }
  0x2a   :  { %2848 = vmatmul.mubr.bf16.gmra.mrb[4].mxu0 %v2906_v14  ;;  %2864 = vmatmul.mubr.bf16.gmra.mrb[4].mxu1 %v2914_v15  ;;  %v53_v5 = vld [vmem:[%s5213_s0 + $0x50] sm:$0xff]  ;;  %v54_v9 = vld [vmem:[%s5213_s0 + $0x58] sm:$0xff] }
  0x2b   :  { %2851 = vmatprep.mubr.bf16.mxu0 %v2907_v16  ;;  %2867 = vmatprep.mubr.bf16.mxu1 %v2915_v17 }
  0x32   :  { %2852 = vmatmul.mubr.bf16.gmra.mrb[8].mxu0 %v2908_v18  ;;  %2868 = vmatmul.mubr.bf16.gmra.mrb[8].mxu1 %v2916_v19  ;;  %v55_v18 = vld [vmem:[%s5213_s0 + $0x60] sm:$0xff] }
  0x33   :  { %2855 = vmatprep.mubr.bf16.mxu0 %v2909_v20  ;;  %2871 = vmatprep.mubr.bf16.mxu1 %v2917_v21 }
  0x3a   :  { %2856 = vmatmul.mubr.bf16.gmra.mrb[12].mxu0 %v2910_v22  ;;  %2872 = vmatmul.mubr.bf16.gmra.mrb[12].mxu1 %v2918_v23 }
  0xf5   :  { %v2845_v25 = vpop.f32.mrb[0].mxu0  ;;  %v3388_v27 = vpop.f32.mrb[0].mxu1 }
  0xf6   :  { %v317_v28 = vadd.f32 %v2845_v25, %v3383_v24  ;;  %v308_v29 = vpop.f32.mrb[1].mxu0  ;;  %v3394_v31 = vpop.f32.mrb[1].mxu1 }
  0xf7   :  { %v309_v32 = vadd.f32 %v3383_v24, %v308_v29  ;;  %v2846_v33 = vpop.f32.mrb[2].mxu0  ;;  %v3397_v34 = vpop.f32.mrb[2].mxu1  ;;  %v56_v29 = vld [vmem:[%s5213_s0 + $0x68] sm:$0xff] }
  0xf8   :  { %v320_v35 = vadd.f32 %v2846_v33, %v3383_v24  ;;  %v311_v36 = vpop.f32.mrb[3].mxu0  ;;  %v3400_v37 = vadd.f32 %v317_v28, %v45_v26  ;;  %v3402_v38 = vpop.f32.mrb[3].mxu1 }
  0xf9   :  { %v312_v39 = vadd.f32 %v3383_v24, %v311_v36  ;;  %v3405_v40 = vadd.f32 %v309_v32, %v43_v30  ;;  %v57_v30 = vld [vmem:[%s5213_s0 + $0x70] sm:$0xff] }
  0xfa   :  { %473 = vadd.xlane.f32.xlu1 %v3400_v37  ;;  %v3415_v43 = vadd.f32 %v320_v35, %v46_v41 }
  0xfb   :  { %469 = vadd.xlane.f32.xlu0 %v3405_v40  ;;  %v3417_v45 = vadd.f32 %v312_v39, %v44_v42  ;;  %v58_v39 = vld [vmem:[%s5213_s0 + $0x78] sm:$0xff]  ;;  %v373_v42 = vadd.f32 %v3383_v24, %v3394_v31  ;;  %v381_v31 = vadd.f32 %v3388_v27, %v3383_v24 }
  0xfd   :  { %v2849_v44 = vpop.f32.mrb[4].mxu0  ;;  %v2865_v12 = vpop.f32.mrb[4].mxu1 }
  0xfe   :  { %v324_v46 = vpop.f32.mrb[5].mxu0  ;;  %475 = vadd.xlane.f32.xlu1 %v3415_v43  ;;  %v333_v48 = vadd.f32 %v2849_v44, %v3383_v24  ;;  %v3476_v15 = vadd.f32 %v2865_v12, %v3383_v24  ;;  %v388_v16 = vpop.f32.mrb[5].mxu1 }
  0xff   :  { %v325_v49 = vadd.f32 %v3383_v24, %v324_v46  ;;  %v2850_v50 = vpop.f32.mrb[6].mxu0  ;;  %471 = vadd.xlane.f32.xlu0 %v3417_v45  ;;  %v3482_v19 = vadd.f32 %v3383_v24, %v388_v16  ;;  %v2866_v20 = vpop.f32.mrb[6].mxu1  ;;  %v59_v46 = vld [vmem:[%s5213_s0 + $0x80] sm:$0xff] }
 0x100   :  { %v327_v51 = vpop.f32.mrb[7].mxu0  ;;  %v336_v54 = vadd.f32 %v2850_v50, %v3383_v24  ;;  %v3442_v59 = vadd.f32 %v333_v48, %v49_v53  ;;  %v3488_v25 = vadd.f32 %v2866_v20, %v3383_v24  ;;  %v391_v26 = vpop.f32.mrb[7].mxu1  ;;  %v3528_v50 = vadd.f32 %v373_v42, %v59_v46  ;;  %v62_v53 = vld [vmem:[%s5213_s0 + $0x98] sm:$0xff]  ;;  %v2921_v16 = vld [vmem:[%s5217_s4 + $0x4] ss:$8 sps:$4 sm:$0xff]  }
 0x101   :  { %v328_v55 = vadd.f32 %v3383_v24, %v327_v51  ;;  %v3434_v56 = vadd.f32 %v325_v49, %v47_v47  ;;  %v3497_v32 = vadd.f32 %v3383_v24, %v391_v26  ;;  %v376_v47 = vadd.f32 %v3383_v24, %v3402_v38  ;;  %v60_v49 = vld [vmem:[%s5213_s0 + $0x88] sm:$0xff]  ;;  %v61_v51 = vld [vmem:[%s5213_s0 + $0x90] sm:$0xff]  ;;  %1022 = vmatprep.subr.bf16.mxu1 %v2921_v16  ;;  %v63_v26 = vld [vmem:[%s5213_s0 + $0xa0] sm:$0xff] }
 0x102   :  { %v3445_v61 = vadd.f32 %v336_v54, %v50_v57  ;;  %v384_v38 = vadd.f32 %v3397_v34, %v3383_v24  ;;  %v3542_v27 = vadd.f32 %v381_v31, %v61_v51 }
 0x103   :  { %477 = vadd.xlane.f32.xlu0 %v3434_v56  ;;  %v3440_v58 = vadd.f32 %v328_v55, %v48_v52  ;;  %v3536_v52 = vadd.f32 %v376_v47, %v60_v49  ;;  %v64_v49 = vld [vmem:[%s5213_s0 + $0xa8] sm:$0xff] }
 0x104   :  { %v3548_v57 = vadd.f32 %v384_v38, %v62_v53  ;;  %v3611_v31 = vadd.f32 %v3497_v32, %v64_v49  ;;  %v65_v38 = vld [vmem:[%s5213_s0 + $0xb0] sm:$0xff] }
 0x105   :  { %v2853_v60 = vpop.f32.mrb[8].mxu0  ;;  %479 = vadd.xlane.f32.xlu1 %v3440_v58  ;;  %v2869_v54 = vpop.f32.mrb[8].mxu1 }
 0x106   :  { %v340_v62 = vpop.f32.mrb[9].mxu0  ;;  %v349_v0 = vadd.f32 %v2853_v60, %v3383_v24  ;;  %v3545_v55 = vadd.f32 %v2869_v54, %v3383_v24  ;;  %v404_v34 = vpop.f32.mrb[9].mxu1  ;;  %v3621_v54 = vadd.f32 %v3476_v15, %v65_v38 }
 0x107   :  { %v341_v1 = vadd.f32 %v3383_v24, %v340_v62  ;;  %v2854_v2 = vpop.f32.mrb[10].mxu0  ;;  %481 = vadd.xlane.f32.xlu0 %v3442_v59  ;;  %v3551_v60 = vadd.f32 %v3383_v24, %v404_v34  ;;  %v2870_v62 = vpop.f32.mrb[10].mxu1 }
 0x108   :  { %v343_v3 = vpop.f32.mrb[11].mxu0  ;;  %v352_v6 = vadd.f32 %v2854_v2, %v3383_v24  ;;  %v3470_v11 = vadd.f32 %v349_v0, %v53_v5  ;;  %v407_v0 = vpop.f32.mrb[11].mxu1 }
 0x109   :  { %v344_v7 = vadd.f32 %v3383_v24, %v343_v3  ;;  %483 = vadd.xlane.f32.xlu1 %v3445_v61  ;;  %v3462_v8 = vadd.f32 %v341_v1, %v51_v63  ;;  %v3555_v63 = vadd.f32 %v2870_v62, %v3383_v24  ;;  %v3558_v1 = vadd.f32 %v3383_v24, %v407_v0  ;;  %v66_v62 = vld [vmem:[%s5213_s0 + $0xb8] sm:$0xff]  ;;  %v67_v0 = vld [vmem:[%s5213_s0 + $0xc0] sm:$0xff] }
 0x10a   :  { %v3473_v14 = vadd.f32 %v352_v6, %v54_v9 }
 0x10b   :  { %485 = vadd.xlane.f32.xlu0 %v3462_v8  ;;  %v3468_v10 = vadd.f32 %v344_v7, %v52_v4 }
 0x10d   :  { %v2857_v13 = vpop.f32.mrb[12].mxu0  ;;  %487 = vadd.xlane.f32.xlu1 %v3468_v10  ;;  %v2873_v2 = vpop.f32.mrb[12].mxu1 }
 0x10e   :  { %v356_v17 = vpop.f32.mrb[13].mxu0  ;;  %v365_v21 = vadd.f32 %v2857_v13, %v3383_v24  ;;  %v3562_v3 = vadd.f32 %v2873_v2, %v3383_v24  ;;  %v420_v4 = vpop.f32.mrb[13].mxu1  ;;  %v2919_v13 = vld [vmem:[%s5217_s4] ss:$8 sps:$4 sm:$0xff]   ;;  %v3636_v2 = vadd.f32 %v3488_v25, %v66_v62  ;;  %v2939_v62 = vld [vmem:[%s5217_s4 + $0x64] ss:$8 sps:$4 sm:$0xff]  }
 0x10f   :  { %v357_v22 = vadd.f32 %v3383_v24, %v356_v17  ;;  %v2858_v23 = vpop.f32.mrb[14].mxu0  ;;  %489 = vadd.xlane.f32.xlu0 %v3470_v11  ;;  %v3565_v5 = vadd.f32 %v3383_v24, %v420_v4  ;;  %v2874_v6 = vpop.f32.mrb[14].mxu1  ;;  %v2924_v17 = vld [vmem:[%s5217_s4 + $0x14] ss:$8 sps:$4 sm:$0xff]   ;;  %1023 = vmatpush1.bf16.msra.mxu1 %v2919_v13  ;;  %v3648_v13 = vadd.f32 %v3551_v60, %v67_v0  ;;  %v2925_v25 = vld [vmem:[%s5217_s4 + $0x20] ss:$8 sps:$4 sm:$0xff]  }
 0x110   :  { %v359_v28 = vpop.f32.mrb[15].mxu0  ;;  %v368_v33 = vadd.f32 %v2858_v23, %v3383_v24  ;;  %v3512_v44 = vadd.f32 %v365_v21, %v57_v30  ;;  %v3568_v7 = vadd.f32 %v2874_v6, %v3383_v24  ;;  %v423_v9 = vpop.f32.mrb[15].mxu1  ;;  %1024 = vmatprep.subr.bf16.mxu1 %v2924_v17  ;;  %v2930_v60 = vld [vmem:[%s5217_s4 + $0x34] ss:$8 sps:$4 sm:$0xff]  }
 0x111   :  { %v360_v35 = vadd.f32 %v3383_v24, %v359_v28  ;;  %491 = vadd.xlane.f32.xlu1 %v3473_v14  ;;  %v3502_v36 = vadd.f32 %v357_v22, %v55_v18  ;;  %v3571_v12 = vadd.f32 %v3383_v24, %v423_v9  ;;  %v2922_v18 = vld [vmem:[%s5217_s4 + $0x10] ss:$8 sps:$4 sm:$0xff]   ;;  %v2927_v9 = vld [vmem:[%s5217_s4 + $0x24] ss:$8 sps:$4 sm:$0xff]  }
 0x112   :  { %v3520_v48 = vadd.f32 %v368_v33, %v58_v39 }
 0x113   :  { %493 = vadd.xlane.f32.xlu0 %v3502_v36  ;;  %v3508_v41 = vadd.f32 %v360_v35, %v56_v29  ;;  %1025 = vmatpush1.bf16.msra.mxu1 %v2922_v18  ;;  %v3594_v35 = vadd.f32 %v3482_v19, %v63_v26 }
 0x114   :  { %1026 = vmatprep.subr.bf16.mxu1 %v2927_v9 }
 0x115   :  { %495 = vadd.xlane.f32.xlu1 %v3508_v41 }
 0x117   :  { %497 = vadd.xlane.f32.xlu0 %v3512_v44  ;;  %1027 = vmatpush1.bf16.msra.mxu1 %v2925_v25  ;;  %v2942_v25 = vld [vmem:[%s5217_s4 + $0x74] ss:$8 sps:$4 sm:$0xff]  }
 0x118   :  { %1028 = vmatprep.subr.bf16.mxu1 %v2930_v60 }
 0x119   :  { %499 = vadd.xlane.f32.xlu1 %v3520_v48 }
 0x11b   :  { %501 = vadd.xlane.f32.xlu0 %v3528_v50 }
 0x11d   :  { %503 = vadd.xlane.f32.xlu1 %v3536_v52 }
 0x11f   :  { %505 = vadd.xlane.f32.xlu0 %v3542_v27 }
 0x121   :  { %507 = vadd.xlane.f32.xlu1 %v3548_v57 }
 0x187   :  { %v474_v24 = vpop.xlane.xlu1 %473 }
 0x188   :  { %v470_v20 = vpop.xlane.xlu0 %469  ;;  %v536_v28 = vmul.f32 0.0078125, %v474_v24  ;;  %v68_v24 = vld [vmem:[%s5213_s0 + $0xc8] sm:$0xff] }
 0x189   :  { %v534_v21 = vmul.f32 0.0078125, %v470_v20  ;;  %v2928_v20 = vld [vmem:[%s5217_s4 + $0x30] ss:$8 sps:$4 sm:$0xff]  }
 0x18a   :  { %v3602_v46 = vsub.f32 %v3400_v37, %v536_v28  ;;  %1029 = vmatpush1.bf16.msra.mxu1 %v2928_v20  ;;  %v73_v20 = vld [vmem:[%s5213_s0 + $0xf0] sm:$0xff] }
 0x18b   :  { %v3586_v22 = vsub.f32 %v3405_v40, %v534_v21  ;;  %v476_v33 = vpop.xlane.xlu1 %475 }
 0x18c   :  { %v472_v23 = vpop.xlane.xlu0 %471  ;;  %v537_v40 = vmul.f32 0.0078125, %v476_v33  ;;  %v2933_v33 = vld [vmem:[%s5217_s4 + $0x44] ss:$8 sps:$4 sm:$0xff]  }
 0x18d   :  { %v535_v29 = vmul.f32 0.0078125, %v472_v23  ;;  %v598_v30 = vmul.f32 %v3586_v22, %v3586_v22  ;;  %v3669_v23 = vadd.f32 %v3558_v1, %v68_v24  ;;  %v2931_v1 = vld [vmem:[%s5217_s4 + $0x40] ss:$8 sps:$4 sm:$0xff]   ;;  %1030 = vmatprep.subr.bf16.mxu1 %v2933_v33  ;;  %v74_v33 = vld [vmem:[%s5213_s0 + $0xf8] sm:$0xff] }
 0x18e   :  { %v3614_v51 = vsub.f32 %v3415_v43, %v537_v40  ;;  %1031 = vmatpush1.bf16.msra.mxu1 %v2931_v1 }
 0x18f   :  { %630 = vadd.xlane.f32.xlu0 %v598_v30  ;;  %v3597_v39 = vsub.f32 %v3417_v45, %v535_v29  ;;  %v600_v45 = vmul.f32 %v3602_v46, %v3602_v46  ;;  %v69_v30 = vld [vmem:[%s5213_s0 + $0xd0] sm:$0xff] }
 0x190   :  { %v478_v47 = vpop.xlane.xlu0 %477  ;;  %v601_v34 = vmul.f32 %v3614_v51, %v3614_v51 }
 0x191   :  { %v599_v42 = vmul.f32 %v3597_v39, %v3597_v39  ;;  %v538_v19 = vmul.f32 0.0078125, %v478_v47 }
 0x192   :  { %v480_v37 = vpop.xlane.xlu1 %479 }
 0x193   :  { %509 = vadd.xlane.f32.xlu0 %v3594_v35  ;;  %632 = vadd.xlane.f32.xlu1 %v599_v42  ;;  %v539_v53 = vmul.f32 0.0078125, %v480_v37  ;;  %v3626_v32 = vsub.f32 %v3434_v56, %v538_v19  ;;  %v3689_v42 = vadd.f32 %v3545_v55, %v69_v30  ;;  %v70_v19 = vld [vmem:[%s5213_s0 + $0xd8] sm:$0xff] }
 0x194   :  { %v482_v43 = vpop.xlane.xlu0 %481  ;;  %v2934_v55 = vld [vmem:[%s5217_s4 + $0x50] ss:$8 sps:$4 sm:$0xff]  }
 0x195   :  { %v540_v15 = vmul.f32 0.0078125, %v482_v43  ;;  %v602_v56 = vmul.f32 %v3626_v32, %v3626_v32  ;;  %v3641_v4 = vsub.f32 %v3440_v58, %v539_v53  ;;  %v3708_v53 = vadd.f32 %v3555_v63, %v70_v19  ;;  %v2937_v63 = vld [vmem:[%s5217_s4 + $0x60] ss:$8 sps:$4 sm:$0xff]  }
 0x196   :  { %v484_v6 = vpop.xlane.xlu1 %483  ;;  %v3769_v19 = vadd.f32 %v3568_v7, %v74_v33 }
 0x197   :  { %634 = vadd.xlane.f32.xlu0 %v600_v45  ;;  %511 = vadd.xlane.f32.xlu1 %v3611_v31  ;;  %v541_v17 = vmul.f32 0.0078125, %v484_v6  ;;  %v603_v58 = vmul.f32 %v3641_v4, %v3641_v4  ;;  %v3656_v18 = vsub.f32 %v3442_v59, %v540_v15  ;;  %v2936_v45 = vld [vmem:[%s5217_s4 + $0x54] ss:$8 sps:$4 sm:$0xff]  }
 0x198   :  { %v486_v16 = vpop.xlane.xlu0 %485  ;;  %1032 = vmatprep.subr.bf16.mxu1 %v2936_v45 }
 0x199   :  { %v542_v59 = vmul.f32 0.0078125, %v486_v16  ;;  %v604_v26 = vmul.f32 %v3656_v18, %v3656_v18  ;;  %v3674_v28 = vsub.f32 %v3445_v61, %v541_v17  ;;  %1033 = vmatpush1.bf16.msra.mxu1 %v2934_v55  ;;  %v2940_v16 = vld [vmem:[%s5217_s4 + $0x70] ss:$8 sps:$4 sm:$0xff]  }
 0x19a   :  { %v488_v21 = vpop.xlane.xlu1 %487  ;;  %1034 = vmatprep.subr.bf16.mxu1 %v2939_v62 }
 0x19b   :  { %513 = vadd.xlane.f32.xlu0 %v3621_v54  ;;  %636 = vadd.xlane.f32.xlu1 %v601_v34  ;;  %v543_v61 = vmul.f32 0.0078125, %v488_v21  ;;  %v605_v40 = vmul.f32 %v3674_v28, %v3674_v28  ;;  %v3692_v47 = vsub.f32 %v3462_v8, %v542_v59  ;;  %v71_v8 = vld [vmem:[%s5213_s0 + $0xe0] sm:$0xff] }
 0x19c   :  { %v490_v29 = vpop.xlane.xlu0 %489  ;;  %v3720_v0 = vadd.f32 %v3565_v5, %v71_v8  ;;  %v72_v5 = vld [vmem:[%s5213_s0 + $0xe8] sm:$0xff] }
 0x19d   :  { %v544_v38 = vmul.f32 0.0078125, %v490_v29  ;;  %v606_v34 = vmul.f32 %v3692_v47, %v3692_v47  ;;  %v3713_v43 = vsub.f32 %v3468_v10, %v543_v61  ;;  %1035 = vmatpush1.bf16.msra.mxu1 %v2937_v63  ;;  %v3741_v17 = vadd.f32 %v3571_v12, %v72_v5 }
 0x19e   :  { %v492_v49 = vpop.xlane.xlu1 %491  ;;  %1036 = vmatprep.subr.bf16.mxu1 %v2942_v25 }
 0x19f   :  { %515 = vadd.xlane.f32.xlu1 %v3636_v2  ;;  %638 = vadd.xlane.f32.xlu0 %v602_v56  ;;  %v545_v56 = vmul.f32 0.0078125, %v492_v49  ;;  %v607_v10 = vmul.f32 %v3713_v43, %v3713_v43  ;;  %v3728_v6 = vsub.f32 %v3470_v11, %v544_v38 }
 0x1a0   :  { %v494_v37 = vpop.xlane.xlu0 %493 }
 0x1a1   :  { %v546_v11 = vmul.f32 0.0078125, %v494_v37  ;;  %v3746_v24 = vsub.f32 %v3473_v14, %v545_v56  ;;  %1037 = vmatpush1.bf16.msra.mxu1 %v2940_v16  ;;  %v3756_v14 = vadd.f32 %v3562_v3, %v73_v20 }
 0x1a2   :  { %v496_v15 = vpop.xlane.xlu1 %495 }
 0x1a3   :  { %640 = vadd.xlane.f32.xlu1 %v603_v58  ;;  %517 = vadd.xlane.f32.xlu0 %v3648_v13  ;;  %v608_v58 = vmul.f32 %v3728_v6, %v3728_v6  ;;  %v547_v21 = vmul.f32 0.0078125, %v496_v15  ;;  %v609_v29 = vmul.f32 %v3746_v24, %v3746_v24  ;;  %v3759_v30 = vsub.f32 %v3502_v36, %v546_v11 }
 0x1a4   :  { %v498_v9 = vpop.xlane.xlu0 %497 }
 0x1a5   :  { %v548_v12 = vmul.f32 0.0078125, %v498_v9  ;;  %v610_v36 = vmul.f32 %v3759_v30, %v3759_v30 }
 0x1a6   :  { %v500_v60 = vpop.xlane.xlu1 %499 }
 0x1a7   :  { %519 = vadd.xlane.f32.xlu1 %v3669_v23  ;;  %642 = vadd.xlane.f32.xlu0 %v604_v26  ;;  %v3239_v26 = vmov 0   ;;  %v549_v1 = vmul.f32 0.0078125, %v500_v60  ;;  %v3774_v3 = vsub.f32 %v3512_v44, %v548_v12 }
 0x1a8   :  { %v502_v59 = vpop.xlane.xlu0 %501  ;;  %1054 = vmatprep.mubr.bf16.mxu1 %v3239_v26 }
 0x1a9   :  { %v550_v49 = vmul.f32 0.0078125, %v502_v59  ;;  %v612_v7 = vmul.f32 %v3774_v3, %v3774_v3 }
 0x1aa   :  { %v504_v61 = vpop.xlane.xlu1 %503 }
 0x1ab   :  { %644 = vadd.xlane.f32.xlu1 %v605_v40  ;;  %521 = vadd.xlane.f32.xlu0 %v3689_v42  ;;  %v3766_v40 = vsub.f32 %v3508_v41, %v547_v21  ;;  %v3780_v41 = vsub.f32 %v3520_v48, %v549_v1  ;;  %v551_v37 = vmul.f32 0.0078125, %v504_v61  ;;  %v3785_v38 = vsub.f32 %v3528_v50, %v550_v49 }
 0x1ac   :  { %v506_v45 = vpop.xlane.xlu0 %505 }
 0x1ad   :  { %v611_v55 = vmul.f32 %v3766_v40, %v3766_v40  ;;  %v552_v8 = vmul.f32 0.0078125, %v506_v45  ;;  %v614_v63 = vmul.f32 %v3785_v38, %v3785_v38  ;;  %v3792_v48 = vsub.f32 %v3536_v52, %v551_v37 }
 0x1ae   :  { %v508_v44 = vpop.xlane.xlu1 %507 }
 0x1af   :  { %523 = vadd.xlane.f32.xlu1 %v3708_v53  ;;  %646 = vadd.xlane.f32.xlu0 %v606_v34  ;;  %v613_v34 = vmul.f32 %v3780_v41, %v3780_v41  ;;  %v553_v62 = vmul.f32 0.0078125, %v508_v44  ;;  %v3795_v15 = vsub.f32 %v3542_v27, %v552_v8  ;;  %v615_v50 = vmul.f32 %v3792_v48, %v3792_v48 }
 0x1b1   :  { %v616_v56 = vmul.f32 %v3795_v15, %v3795_v15 }
 0x1b3   :  { %648 = vadd.xlane.f32.xlu1 %v607_v10  ;;  %525 = vadd.xlane.f32.xlu0 %v3720_v0  ;;  %v3802_v10 = vsub.f32 %v3548_v57, %v553_v62 }
 0x1b5   :  { %v617_v52 = vmul.f32 %v3802_v10, %v3802_v10 }
 0x1b7   :  { %527 = vadd.xlane.f32.xlu1 %v3741_v17  ;;  %650 = vadd.xlane.f32.xlu0 %v608_v58 }
 0x1bb   :  { %652 = vadd.xlane.f32.xlu1 %v609_v29  ;;  %529 = vadd.xlane.f32.xlu0 %v3756_v14 }
 0x1bf   :  { %531 = vadd.xlane.f32.xlu1 %v3769_v19  ;;  %654 = vadd.xlane.f32.xlu0 %v610_v36 }
 0x1c3   :  { %656 = vadd.xlane.f32.xlu1 %v611_v55  ;;  %658 = vadd.xlane.f32.xlu0 %v612_v7 }
 0x1c7   :  { %660 = vadd.xlane.f32.xlu1 %v613_v34  ;;  %662 = vadd.xlane.f32.xlu0 %v614_v63 }
 0x1cb   :  { %664 = vadd.xlane.f32.xlu1 %v615_v50  ;;  %666 = vadd.xlane.f32.xlu0 %v616_v56 }
 0x1cf   :  { %668 = vadd.xlane.f32.xlu1 %v617_v52 }
 0x21c   :  { %v631_v9 = vpop.xlane.xlu0 %630 }
 0x21d   :  { %v694_v27 = vmul.f32 0.0078125, %v631_v9 }
 0x21f   :  { %v726_v5 = vadd.f32 1e-05, %v694_v27 }
 0x220   :  { %v633_v25 = vpop.xlane.xlu1 %632  ;;  %v510_v16 = vpop.xlane.xlu0 %509 }
 0x221   :  { %2959 = vrsqrt.f32 %v726_v5  ;;  %v695_v11 = vmul.f32 0.0078125, %v633_v25  ;;  %v554_v58 = vmul.f32 0.0078125, %v510_v16 }
 0x223   :  { %v727_v60 = vadd.f32 1e-05, %v695_v11  ;;  %v3807_v20 = vsub.f32 %v3594_v35, %v554_v58  ;;  %v3837_v58 = vld [vmem:[%s5222_s9] ss:$0 sm:$0xff] }
 0x224   :  { %v512_v57 = vpop.xlane.xlu1 %511  ;;  %v635_v21 = vpop.xlane.xlu0 %634 }
 0x225   :  { %2961 = vrsqrt.f32 %v727_v60  ;;  %v555_v59 = vmul.f32 0.0078125, %v512_v57  ;;  %v696_v12 = vmul.f32 0.0078125, %v635_v21  ;;  %v618_v29 = vmul.f32 %v3807_v20, %v3807_v20 }
 0x227   :  { %v728_v33 = vadd.f32 1e-05, %v696_v12  ;;  %670 = vadd.xlane.f32.xlu0 %v618_v29  ;;  %v3812_v1 = vsub.f32 %v3611_v31, %v555_v59  ;;  %v3823_v31 = vld [vmem:[%s5221_s8] ss:$0 sm:$0xff] }
 0x228   :  { %v637_v61 = vpop.xlane.xlu1 %636  ;;  %v514_v49 = vpop.xlane.xlu0 %513 }
 0x229   :  { %2963 = vrsqrt.f32 %v728_v33  ;;  %v697_v36 = vmul.f32 0.0078125, %v637_v61  ;;  %v556_v45 = vmul.f32 0.0078125, %v514_v49  ;;  %v619_v35 = vmul.f32 %v3812_v1, %v3812_v1 }
 0x22b   :  { %v2960_v55 = vpop.eup %2959  ;;  %v729_v37 = vadd.f32 1e-05, %v697_v36  ;;  %672 = vadd.xlane.f32.xlu1 %v619_v35  ;;  %v3817_v8 = vsub.f32 %v3621_v54, %v556_v45 }
 0x22c   :  { %v790_v7 = vmul.f32 %v2960_v55, %v3586_v22  ;;  %v516_v44 = vpop.xlane.xlu1 %515  ;;  %v639_v34 = vpop.xlane.xlu0 %638 }
 0x22d   :  { %2965 = vrsqrt.f32 %v729_v37  ;;  %v557_v62 = vmul.f32 0.0078125, %v516_v44  ;;  %v698_v63 = vmul.f32 0.0078125, %v639_v34  ;;  %v620_v50 = vmul.f32 %v3817_v8, %v3817_v8 }
 0x22e   :  { %v828_v22 = vmul.f32 %v3823_v31, %v790_v7 }
 0x22f   :  { %v2962_v56 = vpop.eup %2961  ;;  %v730_v52 = vadd.f32 1e-05, %v698_v63  ;;  %674 = vadd.xlane.f32.xlu0 %v620_v50  ;;  %v3828_v54 = vsub.f32 %v3636_v2, %v557_v62 }
 0x230   :  { %v791_v9 = vmul.f32 %v2962_v56, %v3597_v39  ;;  %v641_v27 = vpop.xlane.xlu1 %640  ;;  %v518_v5 = vpop.xlane.xlu0 %517  ;;  %v3844_v12 = vadd.f32 %v3837_v58, %v828_v22 }
 0x231   :  { %2967 = vrsqrt.f32 %v730_v52  ;;  %v699_v25 = vmul.f32 0.0078125, %v641_v27  ;;  %v558_v16 = vmul.f32 0.0078125, %v518_v5  ;;  %v621_v11 = vmul.f32 %v3828_v54, %v3828_v54 }
 0x232   :  { %v829_v2 = vmul.f32 %v3823_v31, %v791_v9 }
 0x233   :  { %v2964_v60 = vpop.eup %2963  ;;  %v731_v57 = vadd.f32 1e-05, %v699_v25  ;;  %v3841_v21 = vsub.f32 %v3648_v13, %v558_v16  ;;  %676 = vadd.xlane.f32.xlu1 %v621_v11 }
 0x234   :  { %v520_v39 = vpop.xlane.xlu1 %519  ;;  %v643_v59 = vpop.xlane.xlu0 %642  ;;  %v3847_v29 = vadd.f32 %v3837_v58, %v829_v2  ;;  %v792_v33 = vmul.f32 %v2964_v60, %v3602_v46 }
 0x235   :  { %2969 = vrsqrt.f32 %v731_v57  ;;  %v559_v61 = vmul.f32 0.0078125, %v520_v39  ;;  %v700_v49 = vmul.f32 0.0078125, %v643_v59  ;;  %v622_v36 = vmul.f32 %v3841_v21, %v3841_v21 }
 0x236   :  { %v898_v13 = vpack.c.bf16 %v3847_v29, %v3844_v12  ;;  %v830_v44 = vmul.f32 %v3823_v31, %v792_v33 }
 0x237   :  { %v2966_v45 = vpop.eup %2965  ;;  %v3855_v35 = vsub.f32 %v3669_v23, %v559_v61  ;;  %v732_v55 = vadd.f32 1e-05, %v700_v49  ;;  %678 = vadd.xlane.f32.xlu0 %v622_v36 }
 0x238   :  { %v645_v37 = vpop.xlane.xlu1 %644  ;;  %1055 = vmatmul.mubr.bf16.vlgmr.msra.gmra.mrb[16].mxu1 %v898_v13  ;;  %v522_v7 = vpop.xlane.xlu0 %521  ;;  %v793_v46 = vmul.f32 %v2966_v45, %v3614_v51  ;;  %v3867_v9 = vadd.f32 %v3837_v58, %v830_v44 }
 0x239   :  { %2971 = vrsqrt.f32 %v732_v55  ;;  %v701_v34 = vmul.f32 0.0078125, %v645_v37  ;;  %v560_v62 = vmul.f32 0.0078125, %v522_v7  ;;  %v623_v63 = vmul.f32 %v3855_v35, %v3855_v35  ;;  %1064 = vmatprep.mubr.bf16.mxu1 %v3239_v26 }
 0x23a   :  { %v831_v23 = vmul.f32 %v3823_v31, %v793_v46 }
 0x23b   :  { %v2968_v50 = vpop.eup %2967  ;;  %v733_v56 = vadd.f32 1e-05, %v701_v34  ;;  %v3864_v52 = vsub.f32 %v3689_v42, %v560_v62  ;;  %680 = vadd.xlane.f32.xlu1 %v623_v63 }
 0x23c   :  { %v524_v22 = vpop.xlane.xlu1 %523  ;;  %v647_v51 = vpop.xlane.xlu0 %646  ;;  %v3870_v27 = vadd.f32 %v3837_v58, %v831_v23  ;;  %v794_v5 = vmul.f32 %v2968_v50, %v3626_v32 }
 0x23d   :  { %2973 = vrsqrt.f32 %v733_v56  ;;  %v561_v25 = vmul.f32 0.0078125, %v524_v22  ;;  %v702_v16 = vmul.f32 0.0078125, %v647_v51  ;;  %v624_v11 = vmul.f32 %v3864_v52, %v3864_v52 }
 0x23e   :  { %v899_v42 = vpack.c.bf16 %v3870_v27, %v3867_v9  ;;  %v832_v33 = vmul.f32 %v3823_v31, %v794_v5 }
 0x23f   :  { %v2970_v2 = vpop.eup %2969  ;;  %v3878_v60 = vsub.f32 %v3708_v53, %v561_v25  ;;  %v734_v57 = vadd.f32 1e-05, %v702_v16  ;;  %682 = vadd.xlane.f32.xlu0 %v624_v11 }
 0x240   :  { %v649_v39 = vpop.xlane.xlu1 %648  ;;  %1065 = vmatmul.mubr.bf16.gmra.mrb[20].mxu1 %v899_v42  ;;  %v526_v59 = vpop.xlane.xlu0 %525  ;;  %v795_v32 = vmul.f32 %v2970_v2, %v3641_v4  ;;  %v3890_v7 = vadd.f32 %v3837_v58, %v832_v33 }
 0x241   :  { %2975 = vrsqrt.f32 %v734_v57  ;;  %v703_v61 = vmul.f32 0.0078125, %v649_v39  ;;  %v562_v49 = vmul.f32 0.0078125, %v526_v59  ;;  %v625_v36 = vmul.f32 %v3878_v60, %v3878_v60  ;;  %1074 = vmatprep.mubr.bf16.mxu1 %v3239_v26 }
 0x242   :  { %v833_v53 = vmul.f32 %v3823_v31, %v795_v32 }
 0x243   :  { %v2972_v13 = vpop.eup %2971  ;;  %v735_v45 = vadd.f32 1e-05, %v703_v61  ;;  %v3887_v55 = vsub.f32 %v3720_v0, %v562_v49  ;;  %684 = vadd.xlane.f32.xlu1 %v625_v36 }
 0x244   :  { %v528_v37 = vpop.xlane.xlu1 %527  ;;  %v651_v4 = vpop.xlane.xlu0 %650  ;;  %v3893_v46 = vadd.f32 %v3837_v58, %v833_v53  ;;  %v796_v44 = vmul.f32 %v2972_v13, %v3656_v18 }
 0x245   :  { %2977 = vrsqrt.f32 %v735_v45  ;;  %v563_v34 = vmul.f32 0.0078125, %v528_v37  ;;  %v704_v62 = vmul.f32 0.0078125, %v651_v4  ;;  %v626_v63 = vmul.f32 %v3887_v55, %v3887_v55 }
 0x246   :  { %v900_v0 = vpack.c.bf16 %v3893_v46, %v3890_v7  ;;  %v834_v5 = vmul.f32 %v3823_v31, %v796_v44 }
 0x247   :  { %v2974_v23 = vpop.eup %2973  ;;  %v3901_v50 = vsub.f32 %v3741_v17, %v563_v34  ;;  %v736_v56 = vadd.f32 1e-05, %v704_v62  ;;  %686 = vadd.xlane.f32.xlu0 %v626_v63 }
 0x248   :  { %v653_v22 = vpop.xlane.xlu1 %652  ;;  %1075 = vmatmul.mubr.bf16.gmra.mrb[24].mxu1 %v900_v0  ;;  %v530_v51 = vpop.xlane.xlu0 %529  ;;  %v797_v18 = vmul.f32 %v2974_v23, %v3674_v28  ;;  %v3913_v59 = vadd.f32 %v3837_v58, %v834_v5 }
 0x249   :  { %2979 = vrsqrt.f32 %v736_v56  ;;  %v705_v25 = vmul.f32 0.0078125, %v653_v22  ;;  %v564_v16 = vmul.f32 0.0078125, %v530_v51  ;;  %v627_v11 = vmul.f32 %v3901_v50, %v3901_v50  ;;  %1084 = vmatprep.mubr.bf16.mxu1 %v3239_v26 }
 0x24a   :  { %v835_v17 = vmul.f32 %v3823_v31, %v797_v18 }
 0x24b   :  { %v2976_v42 = vpop.eup %2975  ;;  %v737_v2 = vadd.f32 1e-05, %v705_v25  ;;  %v3910_v57 = vsub.f32 %v3756_v14, %v564_v16  ;;  %688 = vadd.xlane.f32.xlu1 %v627_v11 }
 0x24c   :  { %v532_v39 = vpop.xlane.xlu1 %531  ;;  %v655_v28 = vpop.xlane.xlu0 %654  ;;  %v3916_v32 = vadd.f32 %v3837_v58, %v835_v17  ;;  %v798_v33 = vmul.f32 %v2976_v42, %v3692_v47 }
 0x24d   :  { %2981 = vrsqrt.f32 %v737_v2  ;;  %v565_v61 = vmul.f32 0.0078125, %v532_v39  ;;  %v706_v49 = vmul.f32 0.0078125, %v655_v28  ;;  %v628_v36 = vmul.f32 %v3910_v57, %v3910_v57 }
 0x24e   :  { %5251 = vst [vmem:[#allocation5_spill] sm:$0xff] %v3916_v32  ;;  %v901_v14 = vpack.c.bf16 %v3916_v32, %v3913_v59  ;;  %v836_v44 = vmul.f32 %v3823_v31, %v798_v33 }
 0x24f   :  { %v2978_v53 = vpop.eup %2977  ;;  %v3924_v13 = vsub.f32 %v3769_v19, %v565_v61  ;;  %v738_v45 = vadd.f32 1e-05, %v706_v49  ;;  %690 = vadd.xlane.f32.xlu0 %v628_v36 }
 0x250   :  { %v657_v37 = vpop.xlane.xlu1 %656  ;;  %1085 = vmatmul.mubr.bf16.gmra.mrb[28].mxu1 %v901_v14  ;;  %v659_v4 = vpop.xlane.xlu0 %658  ;;  %v799_v47 = vmul.f32 %v2978_v53, %v3713_v43  ;;  %v3933_v43 = vadd.f32 %v3837_v58, %v836_v44 }
 0x251   :  { %2983 = vrsqrt.f32 %v738_v45  ;;  %v707_v34 = vmul.f32 0.0078125, %v657_v37  ;;  %v708_v62 = vmul.f32 0.0078125, %v659_v4  ;;  %v629_v63 = vmul.f32 %v3924_v13, %v3924_v13  ;;  %1094 = vmatprep.mubr.bf16.mxu1 %v3239_v26 }
 0x252   :  { %v837_v19 = vmul.f32 %v3823_v31, %v799_v47  ;;  %5252 = vst [vmem:[#allocation6_spill] sm:$0xff] %v3933_v43 }
 0x253   :  { %v2980_v0 = vpop.eup %2979  ;;  %v739_v23 = vadd.f32 1e-05, %v707_v34  ;;  %v740_v56 = vadd.f32 1e-05, %v708_v62  ;;  %692 = vadd.xlane.f32.xlu1 %v629_v63 }
 0x254   :  { %v661_v22 = vpop.xlane.xlu1 %660  ;;  %v663_v51 = vpop.xlane.xlu0 %662  ;;  %v3936_v18 = vadd.f32 %v3837_v58, %v837_v19  ;;  %v800_v5 = vmul.f32 %v2980_v0, %v3728_v6 }
 0x255   :  { %2985 = vrsqrt.f32 %v739_v23  ;;  %v709_v25 = vmul.f32 0.0078125, %v661_v22  ;;  %v710_v42 = vmul.f32 0.0078125, %v663_v51 }
 0x256   :  { %5253 = vst [vmem:[#allocation7_spill] sm:$0xff] %v3936_v18  ;;  %v902_v16 = vpack.c.bf16 %v3936_v18, %v3933_v43  ;;  %2987 = vrsqrt.f32 %v740_v56  ;;  %v838_v28 = vmul.f32 %v3823_v31, %v800_v5 }
 0x257   :  { %v2982_v11 = vpop.eup %2981  ;;  %v741_v17 = vadd.f32 1e-05, %v709_v25  ;;  %v742_v49 = vadd.f32 1e-05, %v710_v42 }
 0x258   :  { %v665_v2 = vpop.xlane.xlu1 %664  ;;  %1095 = vmatmul.mubr.bf16.gmra.mrb[32].mxu1 %v902_v16  ;;  %v801_v39 = vmul.f32 %v2982_v11, %v3746_v24  ;;  %v667_v14 = vpop.xlane.xlu0 %666  ;;  %v3946_v45 = vadd.f32 %v3837_v58, %v838_v28 }
 0x259   :  { %2989 = vrsqrt.f32 %v741_v17  ;;  %v711_v33 = vmul.f32 0.0078125, %v665_v2  ;;  %1104 = vmatprep.mubr.bf16.mxu1 %v3239_v26  ;;  %v712_v34 = vmul.f32 0.0078125, %v667_v14 }
 0x25a   :  { %v839_v6 = vmul.f32 %v3823_v31, %v801_v39  ;;  %5254 = vst [vmem:[#allocation8_spill] sm:$0xff] %v3946_v45 }
 0x25b   :  { %v2984_v61 = vpop.eup %2983  ;;  %v743_v36 = vadd.f32 1e-05, %v711_v33  ;;  %v744_v56 = vadd.f32 1e-05, %v712_v34  ;;  %v2944_v34 = vld [vmem:[%s5219_s6] sm:$0xff]  }
 0x25c   :  { %v669_v53 = vpop.xlane.xlu1 %668  ;;  %v3949_v37 = vadd.f32 %v3837_v58, %v839_v6  ;;  %v802_v24 = vmul.f32 %v2984_v61, %v3759_v30 }
 0x25d   :  { %2991 = vrsqrt.f32 %v743_v36  ;;  %v713_v4 = vmul.f32 0.0078125, %v669_v53 }
 0x25e   :  { %5255 = vst [vmem:[#allocation9_spill] sm:$0xff] %v3949_v37  ;;  %v903_v47 = vpack.c.bf16 %v3949_v37, %v3946_v45  ;;  %2993 = vrsqrt.f32 %v742_v49  ;;  %v840_v63 = vmul.f32 %v3823_v31, %v802_v24 }
 0x25f   :  { %v2986_v44 = vpop.eup %2985  ;;  %v745_v0 = vadd.f32 1e-05, %v713_v4 }
 0x260   :  { %1105 = vmatmul.mubr.bf16.gmra.mrb[36].mxu1 %v903_v47  ;;  %v803_v62 = vmul.f32 %v2986_v44, %v3766_v40  ;;  %v2988_v19 = vpop.eup %2987  ;;  %v3959_v22 = vadd.f32 %v3837_v58, %v840_v63  ;;  %v2946_v63 = vld [vmem:[%s5219_s6 + $0x8] sm:$0xff]  }
 0x261   :  { %1114 = vmatprep.mubr.bf16.mxu1 %v3239_v26  ;;  %v804_v5 = vmul.f32 %v2988_v19, %v3774_v3  ;;  %2995 = vrsqrt.f32 %v745_v0  ;;  %v2947_v19 = vld [vmem:[%s5219_s6 + $0x50] sm:$0xff]  }
 0x262   :  { %v841_v23 = vmul.f32 %v3823_v31, %v803_v62  ;;  %5256 = vst [vmem:[#allocation10_spill] sm:$0xff] %v3959_v22  ;;  %2997 = vrsqrt.f32 %v744_v56  ;;  %v2945_v62 = vld [vmem:[%s5219_s6 + $0x48] sm:$0xff]   ;;  %v2948_v0 = vld [vmem:[%s5219_s6 + $0x10] sm:$0xff]   ;;  %v2951_v56 = vld [vmem:[%s5219_s6 + $0x60] sm:$0xff]  }
 0x263   :  { %v2990_v30 = vpop.eup %2989  ;;  %v842_v17 = vmul.f32 %v3823_v31, %v804_v5  ;;  %v2952_v5 = vld [vmem:[%s5219_s6 + $0x20] sm:$0xff]  }
 0x264   :  { %v3962_v51 = vadd.f32 %v3837_v58, %v841_v23  ;;  %v805_v40 = vmul.f32 %v2990_v30, %v3780_v41  ;;  %v2949_v23 = vld [vmem:[%s5219_s6 + $0x58] sm:$0xff]  }
 0x265   :  { %v3976_v41 = vadd.f32 %v3837_v58, %v842_v17  ;;  %v2950_v30 = vld [vmem:[%s5219_s6 + $0x18] sm:$0xff]  }
 0x266   :  { %5257 = vst [vmem:[#allocation11_spill] sm:$0xff] %v3962_v51  ;;  %v904_v25 = vpack.c.bf16 %v3962_v51, %v3959_v22  ;;  %v843_v16 = vmul.f32 %v3823_v31, %v805_v40  ;;  %v2953_v40 = vld [vmem:[%s5219_s6 + $0x68] sm:$0xff]   ;;  %v2957_v17 = vld [vmem:[%s5219_s6 + $0x78] sm:$0xff]  }
 0x267   :  { %v2992_v11 = vpop.eup %2991  ;;  %5259 = vst [vmem:[#allocation13_spill] sm:$0xff] %v3976_v41 }
 0x268   :  { %1115 = vmatmul.mubr.bf16.gmra.mrb[40].mxu1 %v904_v25  ;;  %v2994_v42 = vpop.eup %2993  ;;  %v3972_v2 = vadd.f32 %v3837_v58, %v843_v16  ;;  %v807_v3 = vmul.f32 %v2992_v11, %v3792_v48  ;;  %v2954_v25 = vld [vmem:[%s5219_s6 + $0x28] sm:$0xff]   ;;  %v2955_v16 = vld [vmem:[%s5219_s6 + $0x70] sm:$0xff]  }
 0x269   :  { %1124 = vmatprep.mubr.bf16.mxu1 %v3239_v26  ;;  %v806_v39 = vmul.f32 %v2994_v42, %v3785_v38  ;;  %v2956_v11 = vld [vmem:[%s5219_s6 + $0x30] sm:$0xff]   ;;  %v2958_v42 = vld [vmem:[%s5219_s6 + $0x38] sm:$0xff]  }
 0x26a   :  { %5258 = vst [vmem:[#allocation12_spill] sm:$0xff] %v3972_v2  ;;  %v905_v28 = vpack.c.bf16 %v3972_v2, %v3976_v41  ;;  %v845_v33 = vmul.f32 %v3823_v31, %v807_v3 }
 0x26b   :  { %v2996_v6 = vpop.eup %2995  ;;  %v844_v61 = vmul.f32 %v3823_v31, %v806_v39 }
 0x26c   :  { %v2998_v49 = vpop.eup %2997  ;;  %v3985_v36 = vadd.f32 %v3837_v58, %v845_v33  ;;  %v809_v48 = vmul.f32 %v2996_v6, %v3802_v10 }
 0x26d   :  { %v3989_v14 = vadd.f32 %v3837_v58, %v844_v61  ;;  %v808_v38 = vmul.f32 %v2998_v49, %v3795_v15  ;;  %v2943_v15 = vld [vmem:[%s5219_s6 + $0x40] sm:$0xff]  }
 0x26e   :  { %5260 = vst [vmem:[#allocation14_spill] sm:$0xff] %v3985_v36  ;;  %v847_v24 = vmul.f32 %v3823_v31, %v809_v48  ;;  %2715 = vmatprep.subr.bf16.mxu0 %v2943_v15 }
 0x26f   :  { %5261 = vst [vmem:[#allocation15_spill] sm:$0xff] %v3989_v14  ;;  %v906_v53 = vpack.c.bf16 %v3985_v36, %v3989_v14  ;;  %v846_v4 = vmul.f32 %v3823_v31, %v808_v38  ;;  %2716 = vmatpush3.bf16.msra.mxu0 %v2944_v34 }
 0x270   :  { %1125 = vmatmul.mubr.bf16.gmra.mrb[44].mxu1 %v905_v28  ;;  %v3998_v47 = vadd.f32 %v3837_v58, %v847_v24  ;;  %2717 = vmatprep.subr.bf16.mxu0 %v2945_v62 }
 0x271   :  { %1134 = vmatprep.mubr.bf16.mxu1 %v3239_v26  ;;  %v4001_v10 = vadd.f32 %v3837_v58, %v846_v4 }
 0x272   :  { %5262 = vst [vmem:[#allocation16_spill] sm:$0xff] %v3998_v47 }
 0x273   :  { %5263 = vst [vmem:[#allocation17_spill] sm:$0xff] %v4001_v10  ;;  %v907_v44 = vpack.c.bf16 %v3998_v47, %v4001_v10  ;;  %2718 = vmatpush3.bf16.msra.mxu0 %v2946_v63 }
 0x274   :  { %2719 = vmatprep.subr.bf16.mxu0 %v2947_v19 }
 0x277   :  { %2720 = vmatpush3.bf16.msra.mxu0 %v2948_v0 }
 0x278   :  { %1135 = vmatmul.mubr.bf16.gmra.mrb[48].mxu1 %v906_v53  ;;  %2721 = vmatprep.subr.bf16.mxu0 %v2949_v23 }
 0x279   :  { %1144 = vmatprep.mubr.bf16.mxu1 %v3239_v26 }
 0x27b   :  { %2722 = vmatpush3.bf16.msra.mxu0 %v2950_v30 }
 0x27c   :  { %2723 = vmatprep.subr.bf16.mxu0 %v2951_v56 }
 0x27f   :  { %2724 = vmatpush3.bf16.msra.mxu0 %v2952_v5 }
 0x280   :  { %1145 = vmatmul.mubr.bf16.gmra.mrb[52].mxu1 %v907_v44  ;;  %2725 = vmatprep.subr.bf16.mxu0 %v2953_v40 }
 0x281   :  { %1154 = vmatprep.mubr.bf16.mxu1 %v3239_v26 }
 0x283   :  { %2726 = vmatpush3.bf16.msra.mxu0 %v2954_v25 }
 0x284   :  { %2727 = vmatprep.subr.bf16.mxu0 %v2955_v16 }
 0x287   :  { %2728 = vmatpush3.bf16.msra.mxu0 %v2956_v11 }
 0x288   :  { %2729 = vmatprep.subr.bf16.mxu0 %v2957_v17 }
 0x28b   :  { %2730 = vmatpush3.bf16.msra.mxu0 %v2958_v42 }
 0x2b4   :  { %v671_v3 = vpop.xlane.xlu0 %670 }
 0x2b5   :  { %v714_v39 = vmul.f32 0.0078125, %v671_v3 }
 0x2b7   :  { %v746_v28 = vadd.f32 1e-05, %v714_v39 }
 0x2b8   :  { %v673_v33 = vpop.xlane.xlu1 %672 }
 0x2b9   :  { %2999 = vrsqrt.f32 %v746_v28  ;;  %v715_v6 = vmul.f32 0.0078125, %v673_v33 }
 0x2bb   :  { %v747_v61 = vadd.f32 1e-05, %v715_v6 }
 0x2bc   :  { %v675_v49 = vpop.xlane.xlu0 %674 }
 0x2bd   :  { %3001 = vrsqrt.f32 %v747_v61  ;;  %v716_v48 = vmul.f32 0.0078125, %v675_v49 }
 0x2bf   :  { %v748_v38 = vadd.f32 1e-05, %v716_v48 }
 0x2c0   :  { %v677_v53 = vpop.xlane.xlu1 %676 }
 0x2c1   :  { %3003 = vrsqrt.f32 %v748_v38  ;;  %v717_v24 = vmul.f32 0.0078125, %v677_v53 }
 0x2c3   :  { %v3000_v4 = vpop.eup %2999  ;;  %v749_v44 = vadd.f32 1e-05, %v717_v24 }
 0x2c4   :  { %v679_v15 = vpop.xlane.xlu0 %678  ;;  %v810_v34 = vmul.f32 %v3000_v4, %v3807_v20 }
 0x2c5   :  { %3005 = vrsqrt.f32 %v749_v44  ;;  %v718_v62 = vmul.f32 0.0078125, %v679_v15 }
 0x2c6   :  { %v848_v30 = vmul.f32 %v3823_v31, %v810_v34 }
 0x2c7   :  { %v3002_v63 = vpop.eup %3001  ;;  %v750_v19 = vadd.f32 1e-05, %v718_v62 }
 0x2c8   :  { %v681_v0 = vpop.xlane.xlu1 %680  ;;  %v811_v23 = vmul.f32 %v3002_v63, %v3812_v1  ;;  %v4059_v11 = vadd.f32 %v3837_v58, %v848_v30 }
 0x2c9   :  { %3007 = vrsqrt.f32 %v750_v19  ;;  %v719_v56 = vmul.f32 0.0078125, %v681_v0 }
 0x2ca   :  { %v849_v5 = vmul.f32 %v3823_v31, %v811_v23  ;;  %5264 = vst [vmem:[#allocation18_spill] sm:$0xff] %v4059_v11 }
 0x2cb   :  { %v3004_v40 = vpop.eup %3003  ;;  %v751_v25 = vadd.f32 1e-05, %v719_v56 }
 0x2cc   :  { %v683_v16 = vpop.xlane.xlu0 %682  ;;  %v4062_v20 = vadd.f32 %v3837_v58, %v849_v5  ;;  %v812_v17 = vmul.f32 %v3004_v40, %v3817_v8 }
 0x2cd   :  { %3009 = vrsqrt.f32 %v751_v25  ;;  %v720_v42 = vmul.f32 0.0078125, %v683_v16 }
 0x2ce   :  { %5265 = vst [vmem:[#allocation19_spill] sm:$0xff] %v4062_v20  ;;  %v908_v1 = vpack.c.bf16 %v4062_v20, %v4059_v11  ;;  %v850_v6 = vmul.f32 %v3823_v31, %v812_v17 }
 0x2cf   :  { %v3006_v3 = vpop.eup %3005  ;;  %v752_v39 = vadd.f32 1e-05, %v720_v42 }
 0x2d0   :  { %v685_v28 = vpop.xlane.xlu1 %684  ;;  %1155 = vmatmul.mubr.bf16.gmra.mrb[56].mxu1 %v908_v1  ;;  %v813_v33 = vmul.f32 %v3006_v3, %v3828_v54  ;;  %v4072_v53 = vadd.f32 %v3837_v58, %v850_v6 }
 0x2d1   :  { %3011 = vrsqrt.f32 %v752_v39  ;;  %v721_v61 = vmul.f32 0.0078125, %v685_v28  ;;  %1164 = vmatprep.mubr.bf16.mxu1 %v3239_v26 }
 0x2d2   :  { %v851_v49 = vmul.f32 %v3823_v31, %v813_v33  ;;  %5266 = vst [vmem:[#allocation20_spill] sm:$0xff] %v4072_v53 }
 0x2d3   :  { %v3008_v8 = vpop.eup %3007  ;;  %v753_v48 = vadd.f32 1e-05, %v721_v61 }
 0x2d4   :  { %v687_v38 = vpop.xlane.xlu0 %686  ;;  %v4075_v24 = vadd.f32 %v3837_v58, %v851_v49  ;;  %v814_v4 = vmul.f32 %v3008_v8, %v3841_v21 }
 0x2d5   :  { %3013 = vrsqrt.f32 %v753_v48  ;;  %v722_v54 = vmul.f32 0.0078125, %v687_v38 }
 0x2d6   :  { %5267 = vst [vmem:[#allocation21_spill] sm:$0xff] %v4075_v24  ;;  %v909_v44 = vpack.c.bf16 %v4075_v24, %v4072_v53  ;;  %v852_v19 = vmul.f32 %v3823_v31, %v814_v4 }
 0x2d7   :  { %v3010_v15 = vpop.eup %3009  ;;  %v754_v34 = vadd.f32 1e-05, %v722_v54 }
 0x2d8   :  { %v689_v62 = vpop.xlane.xlu1 %688  ;;  %1165 = vmatmul.mubr.bf16.gmra.mrb[60].mxu1 %v909_v44  ;;  %v815_v63 = vmul.f32 %v3010_v15, %v3855_v35  ;;  %v4085_v5 = vadd.f32 %v3837_v58, %v852_v19 }
 0x2d9   :  { %3015 = vrsqrt.f32 %v754_v34  ;;  %v723_v0 = vmul.f32 0.0078125, %v689_v62  ;;  %1174 = vmatprep.mubr.bf16.mxu1 %v3239_v26 }
 0x2da   :  { %v853_v23 = vmul.f32 %v3823_v31, %v815_v63  ;;  %5268 = vst [vmem:[#allocation22_spill] sm:$0xff] %v4085_v5 }
 0x2db   :  { %v3012_v21 = vpop.eup %3011  ;;  %v755_v30 = vadd.f32 1e-05, %v723_v0 }
 0x2dc   :  { %v691_v56 = vpop.xlane.xlu0 %690  ;;  %v4088_v40 = vadd.f32 %v3837_v58, %v853_v23  ;;  %v816_v25 = vmul.f32 %v3012_v21, %v3864_v52 }
 0x2dd   :  { %3017 = vrsqrt.f32 %v755_v30  ;;  %v724_v35 = vmul.f32 0.0078125, %v691_v56  ;;  %v932_v30 = vlaneseq }
 0x2de   :  { %5269 = vst [vmem:[#allocation23_spill] sm:$0xff] %v4088_v40  ;;  %v910_v16 = vpack.c.bf16 %v4088_v40, %v4085_v5  ;;  %v854_v39 = vmul.f32 %v3823_v31, %v816_v25 }
 0x2df   :  { %v3014_v17 = vpop.eup %3013  ;;  %v756_v42 = vadd.f32 1e-05, %v724_v35  ;;  %v933_v56 = vshrl.u32 %v932_v30, 7 }
 0x2e0   :  { %v693_v1 = vpop.xlane.xlu1 %692  ;;  %1175 = vmatmul.mubr.bf16.gmra.mrb[64].mxu1 %v910_v16  ;;  %v817_v3 = vmul.f32 %v3014_v17, %v3878_v60  ;;  %v4098_v61 = vadd.f32 %v3837_v58, %v854_v39 }
 0x2e1   :  { %3019 = vrsqrt.f32 %v756_v42  ;;  %v725_v28 = vmul.f32 0.0078125, %v693_v1  ;;  %1184 = vmatprep.mubr.bf16.mxu1 %v3239_v26  ;;  %v934_v25 = vsub.s32 0, %v933_v56 }
 0x2e2   :  { %v855_v33 = vmul.f32 %v3823_v31, %v817_v3  ;;  %5270 = vst [vmem:[#allocation24_spill] sm:$0xff] %v4098_v61 }
 0x2e3   :  { %v3016_v52 = vpop.eup %3015  ;;  %v757_v6 = vadd.f32 1e-05, %v725_v28 }
 0x2e4   :  { %v4101_v49 = vadd.f32 %v3837_v58, %v855_v33  ;;  %v818_v8 = vmul.f32 %v3016_v52, %v3887_v55 }
 0x2e5   :  { %3021 = vrsqrt.f32 %v757_v6 }
 0x2e6   :  { %5271 = vst [vmem:[#allocation25_spill] sm:$0xff] %v4101_v49  ;;  %v911_v60 = vpack.c.bf16 %v4101_v49, %v4098_v61  ;;  %v856_v4 = vmul.f32 %v3823_v31, %v818_v8 }
 0x2e7   :  { %v3018_v48 = vpop.eup %3017 }
 0x2e8   :  { %1185 = vmatmul.mubr.bf16.gmra.mrb[68].mxu1 %v911_v60  ;;  %v819_v38 = vmul.f32 %v3018_v48, %v3901_v50  ;;  %v4111_v15 = vadd.f32 %v3837_v58, %v856_v4 }
 0x2e9   :  { %1194 = vmatprep.mubr.bf16.mxu1 %v3239_v26 }
 0x2ea   :  { %v857_v54 = vmul.f32 %v3823_v31, %v819_v38  ;;  %5272 = vst [vmem:[#allocation26_spill] sm:$0xff] %v4111_v15 }
 0x2eb   :  { %v3020_v44 = vpop.eup %3019 }
 0x2ec   :  { %v4114_v55 = vadd.f32 %v3837_v58, %v857_v54  ;;  %v820_v34 = vmul.f32 %v3020_v44, %v3910_v57 }
 0x2ee   :  { %5273 = vst [vmem:[#allocation27_spill] sm:$0xff] %v4114_v55  ;;  %v912_v62 = vpack.c.bf16 %v4114_v55, %v4111_v15  ;;  %v858_v19 = vmul.f32 %v3823_v31, %v820_v34 }
 0x2ef   :  { %v3022_v63 = vpop.eup %3021 }
 0x2f0   :  { %1195 = vmatmul.mubr.bf16.gmra.mrb[72].mxu1 %v912_v62  ;;  %v821_v50 = vmul.f32 %v3022_v63, %v3924_v13  ;;  %v4124_v23 = vadd.f32 %v3837_v58, %v858_v19  ;;  %v930_v13 = vld [vmem:[%s5218_s5] sm:$0x3] }
 0x2f1   :  { %1204 = vmatprep.mubr.bf16.mxu1 %v3239_v26  ;;  %v938_v26 = vsub.s32 1, %v933_v56  ;;  %v4134_v35 = vrot.slane %v930_v13, %v934_v25 }
 0x2f2   :  { %v859_v0 = vmul.f32 %v3823_v31, %v821_v50  ;;  %5274 = vst [vmem:[#allocation28_spill] sm:$0xff] %v4124_v23 }
 0x2f3   :  { %v4136_v31 = vrot.slane %v930_v13, %v938_v26 }
 0x2f4   :  { %v4127_v21 = vadd.f32 %v3837_v58, %v859_v0 }
 0x2f6   :  { %5275 = vst [vmem:[#allocation29_spill] sm:$0xff] %v4127_v21  ;;  %v913_v57 = vpack.c.bf16 %v4127_v21, %v4124_v23 }
 0x2f8   :  { %1205 = vmatmul.mubr.bf16.gmra.mrb[76].mxu1 %v913_v57 }
 0x30b   :  { %v1056_v16 = vpop.f32.mrb[16].mxu1 }
 0x30c   :  { %v4139_v58 = vadd.f32 %v1056_v16, %v4134_v35  ;;  %v1058_v17 = vpop.f32.mrb[17].mxu1 }
 0x30d   :  { %v4142_v42 = vadd.f32 %v1058_v17, %v4136_v31  ;;  %v1060_v1 = vpop.f32.mrb[18].mxu1 }
 0x30e   :  { %v1215_v3 = vmul.f32 %v4139_v58, %v4139_v58  ;;  %v4147_v39 = vadd.f32 %v1060_v1, %v4134_v35  ;;  %v1062_v28 = vpop.f32.mrb[19].mxu1 }
 0x30f   :  { %v1216_v33 = vmul.f32 %v4142_v42, %v4142_v42  ;;  %v4152_v52 = vadd.f32 %v1062_v28, %v4136_v31 }
 0x310   :  { %v1279_v6 = vmul.f32 %v1215_v3, %v4139_v58  ;;  %v1217_v8 = vmul.f32 %v4147_v39, %v4147_v39 }
 0x311   :  { %v1280_v60 = vmul.f32 %v1216_v33, %v4142_v42  ;;  %v1218_v48 = vmul.f32 %v4152_v52, %v4152_v52 }
 0x312   :  { %v1343_v38 = vmul.f32 0.044715, %v1279_v6  ;;  %v1281_v4 = vmul.f32 %v1217_v8, %v4147_v39 }
 0x313   :  { %v1344_v54 = vmul.f32 0.044715, %v1280_v60  ;;  %v1282_v44 = vmul.f32 %v1218_v48, %v4152_v52  ;;  %v1066_v34 = vpop.f32.mrb[20].mxu1 }
 0x314   :  { %v1407_v62 = vadd.f32 %v1343_v38, %v4139_v58  ;;  %v1345_v63 = vmul.f32 0.044715, %v1281_v4  ;;  %v4164_v50 = vadd.f32 %v1066_v34, %v4134_v35  ;;  %v1068_v19 = vpop.f32.mrb[21].mxu1 }
 0x315   :  { %v1408_v0 = vadd.f32 %v1344_v54, %v4142_v42  ;;  %v1346_v57 = vmul.f32 0.044715, %v1282_v44  ;;  %v4168_v30 = vadd.f32 %v1068_v19, %v4136_v31  ;;  %v1070_v56 = vpop.f32.mrb[22].mxu1 }
 0x316   :  { %v1471_v25 = vmul.f32 0.7978846, %v1407_v62  ;;  %v1409_v13 = vadd.f32 %v1345_v63, %v4147_v39  ;;  %v1219_v26 = vmul.f32 %v4164_v50, %v4164_v50  ;;  %v4174_v16 = vadd.f32 %v1070_v56, %v4134_v35  ;;  %v1072_v17 = vpop.f32.mrb[23].mxu1 }
 0x317   :  { %v1472_v1 = vmul.f32 0.7978846, %v1408_v0  ;;  %v1410_v3 = vadd.f32 %v1346_v57, %v4152_v52  ;;  %v1220_v28 = vmul.f32 %v4168_v30, %v4168_v30  ;;  %v4180_v33 = vadd.f32 %v1072_v17, %v4136_v31 }
 0x318   :  { %3023 = vtanh.f32 %v1471_v25  ;;  %v1473_v6 = vmul.f32 0.7978846, %v1409_v13  ;;  %v1283_v8 = vmul.f32 %v1219_v26, %v4164_v50  ;;  %v1221_v60 = vmul.f32 %v4174_v16, %v4174_v16 }
 0x319   :  { %3025 = vtanh.f32 %v1472_v1  ;;  %v1474_v48 = vmul.f32 0.7978846, %v1410_v3  ;;  %v1284_v38 = vmul.f32 %v1220_v28, %v4168_v30  ;;  %v1222_v4 = vmul.f32 %v4180_v33, %v4180_v33 }
 0x31a   :  { %3027 = vtanh.f32 %v1473_v6  ;;  %v1347_v54 = vmul.f32 0.044715, %v1283_v8  ;;  %v1285_v44 = vmul.f32 %v1221_v60, %v4174_v16 }
 0x31b   :  { %v1348_v34 = vmul.f32 0.044715, %v1284_v38  ;;  %v1286_v62 = vmul.f32 %v1222_v4, %v4180_v33  ;;  %v1076_v63 = vpop.f32.mrb[24].mxu1  ;;  %3029 = vtanh.f32 %v1474_v48 }
 0x31c   :  { %v1411_v19 = vadd.f32 %v1347_v54, %v4164_v50  ;;  %v1349_v0 = vmul.f32 0.044715, %v1285_v44  ;;  %v4192_v57 = vadd.f32 %v1076_v63, %v4134_v35  ;;  %v1078_v56 = vpop.f32.mrb[25].mxu1 }
 0x31d   :  { %v1412_v25 = vadd.f32 %v1348_v34, %v4168_v30  ;;  %v1350_v13 = vmul.f32 0.044715, %v1286_v62  ;;  %v4196_v26 = vadd.f32 %v1078_v56, %v4136_v31  ;;  %v1080_v17 = vpop.f32.mrb[26].mxu1 }
 0x31e   :  { %v1475_v1 = vmul.f32 0.7978846, %v1411_v19  ;;  %v1413_v3 = vadd.f32 %v1349_v0, %v4174_v16  ;;  %v1223_v28 = vmul.f32 %v4192_v57, %v4192_v57  ;;  %v4202_v6 = vadd.f32 %v1080_v17, %v4134_v35  ;;  %v1082_v8 = vpop.f32.mrb[27].mxu1 }
 0x31f   :  { %v1476_v60 = vmul.f32 0.7978846, %v1412_v25  ;;  %v1414_v48 = vadd.f32 %v1350_v13, %v4180_v33  ;;  %v1224_v38 = vmul.f32 %v4196_v26, %v4196_v26  ;;  %v4208_v4 = vadd.f32 %v1082_v8, %v4136_v31 }
 0x320   :  { %3031 = vtanh.f32 %v1475_v1  ;;  %v1477_v54 = vmul.f32 0.7978846, %v1413_v3  ;;  %v1287_v44 = vmul.f32 %v1223_v28, %v4192_v57  ;;  %v1225_v34 = vmul.f32 %v4202_v6, %v4202_v6 }
 0x321   :  { %3033 = vtanh.f32 %v1476_v60  ;;  %v1478_v62 = vmul.f32 0.7978846, %v1414_v48  ;;  %v1288_v63 = vmul.f32 %v1224_v38, %v4196_v26  ;;  %v1226_v19 = vmul.f32 %v4208_v4, %v4208_v4 }
 0x322   :  { %v3024_v0 = vpop.eup %3023  ;;  %3035 = vtanh.f32 %v1477_v54  ;;  %v1351_v56 = vmul.f32 0.044715, %v1287_v44  ;;  %v1289_v25 = vmul.f32 %v1225_v34, %v4202_v6 }
 0x323   :  { %v3026_v13 = vpop.eup %3025  ;;  %v1599_v17 = vadd.f32 1.0, %v3024_v0  ;;  %3037 = vtanh.f32 %v1478_v62  ;;  %v1352_v1 = vmul.f32 0.044715, %v1288_v63  ;;  %v1290_v3 = vmul.f32 %v1226_v19, %v4208_v4  ;;  %v1086_v28 = vpop.f32.mrb[28].mxu1 }
 0x324   :  { %v3028_v8 = vpop.eup %3027  ;;  %v1415_v60 = vadd.f32 %v1351_v56, %v4192_v57  ;;  %v1353_v48 = vmul.f32 0.044715, %v1289_v25  ;;  %v4220_v38 = vadd.f32 %v1086_v28, %v4134_v35  ;;  %v1088_v21 = vpop.f32.mrb[29].mxu1  ;;  %v1600_v23 = vadd.f32 1.0, %v3026_v13 }
 0x325   :  { %v1663_v54 = vmul.f32 0.5, %v1599_v17  ;;  %v1601_v44 = vadd.f32 1.0, %v3028_v8  ;;  %v1416_v34 = vadd.f32 %v1352_v1, %v4196_v26  ;;  %v1354_v55 = vmul.f32 0.044715, %v1290_v3  ;;  %v1090_v0 = vpop.f32.mrb[30].mxu1  ;;  %v3030_v28 = vpop.eup %3029 }
 0x326   :  { %v1479_v62 = vmul.f32 0.7978846, %v1415_v60  ;;  %v1417_v63 = vadd.f32 %v1353_v48, %v4202_v6  ;;  %v1227_v19 = vmul.f32 %v4220_v38, %v4220_v38  ;;  %v4227_v56 = vadd.f32 %v1088_v21, %v4136_v31  ;;  %v1092_v25 = vpop.f32.mrb[31].mxu1 }
 0x327   :  { %v4230_v15 = vmul.f32 %v1663_v54, %v4139_v58  ;;  %v1665_v13 = vmul.f32 0.5, %v1601_v44  ;;  %v1480_v17 = vmul.f32 0.7978846, %v1416_v34  ;;  %v1418_v1 = vadd.f32 %v1354_v55, %v4208_v4 }
 0x328   :  { %3039 = vtanh.f32 %v1479_v62  ;;  %v1481_v3 = vmul.f32 0.7978846, %v1417_v63  ;;  %v1291_v8 = vmul.f32 %v1227_v19, %v4220_v38  ;;  %v1228_v60 = vmul.f32 %v4227_v56, %v4227_v56 }
 0x329   :  { %v4237_v48 = vmul.f32 %v1665_v13, %v4147_v39  ;;  %3041 = vtanh.f32 %v1480_v17  ;;  %v1482_v21 = vmul.f32 0.7978846, %v1418_v1  ;;  %v4240_v49 = vadd.f32 %v1090_v0, %v4134_v35 }
 0x32a   :  { %v4242_v58 = vpop.eup %3031  ;;  %3043 = vtanh.f32 %v1481_v3  ;;  %v1355_v54 = vmul.f32 0.044715, %v1291_v8  ;;  %v1292_v55 = vmul.f32 %v1228_v60, %v4227_v56  ;;  %v4246_v44 = vadd.f32 %v1092_v25, %v4136_v31 }
 0x32b   :  { %v4248_v34 = vpop.eup %3033  ;;  %3045 = vtanh.f32 %v1482_v21  ;;  %v1229_v62 = vmul.f32 %v4240_v49, %v4240_v49  ;;  %v1096_v0 = vpop.f32.mrb[32].mxu1  ;;  %v1602_v63 = vadd.f32 1.0, %v3030_v28  ;;  %v1664_v39 = vmul.f32 0.5, %v1600_v23 }
 0x32c   :  { %v4254_v19 = vpop.eup %3035  ;;  %v1419_v13 = vadd.f32 %v1355_v54, %v4220_v38  ;;  %v1356_v17 = vmul.f32 0.044715, %v1292_v55  ;;  %v1230_v25 = vmul.f32 %v4246_v44, %v4246_v44  ;;  %v4260_v1 = vadd.f32 %v1096_v0, %v4134_v35  ;;  %v1098_v3 = vpop.f32.mrb[33].mxu1 }
 0x32d   :  { %v4262_v8 = vpop.eup %3037  ;;  %v1293_v60 = vmul.f32 %v1229_v62, %v4240_v49  ;;  %v4266_v21 = vadd.f32 %v1098_v3, %v4136_v31  ;;  %v1100_v28 = vpop.f32.mrb[34].mxu1  ;;  %v1666_v61 = vmul.f32 0.5, %v1602_v63 }
 0x32e   :  { %v1483_v40 = vmul.f32 0.7978846, %v1419_v13  ;;  %v1420_v54 = vadd.f32 %v1356_v17, %v4227_v56  ;;  %v1294_v55 = vmul.f32 %v1230_v25, %v4246_v44  ;;  %v1231_v0 = vmul.f32 %v4260_v1, %v4260_v1  ;;  %v1102_v5 = vpop.f32.mrb[35].mxu1 }
 0x32f   :  { %v1357_v24 = vmul.f32 0.044715, %v1293_v60  ;;  %v1232_v53 = vmul.f32 %v4266_v21, %v4266_v21  ;;  %v4275_v62 = vadd.f32 %v1100_v28, %v4134_v35  ;;  %v4278_v3 = vadd.f32 %v1102_v5, %v4136_v31 }
 0x330   :  { %3047 = vtanh.f32 %v1483_v40  ;;  %v1484_v23 = vmul.f32 0.7978846, %v1420_v54  ;;  %v1358_v63 = vmul.f32 0.044715, %v1294_v55  ;;  %v1295_v13 = vmul.f32 %v1231_v0, %v4260_v1 }
 0x331   :  { %v1421_v17 = vadd.f32 %v1357_v24, %v4240_v49  ;;  %v1296_v25 = vmul.f32 %v1232_v53, %v4266_v21  ;;  %v1233_v60 = vmul.f32 %v4275_v62, %v4275_v62  ;;  %v1234_v20 = vmul.f32 %v4278_v3, %v4278_v3 }
 0x332   :  { %v4287_v28 = vpop.eup %3039  ;;  %3049 = vtanh.f32 %v1484_v23  ;;  %v1422_v5 = vadd.f32 %v1358_v63, %v4246_v44  ;;  %v1359_v40 = vmul.f32 0.044715, %v1295_v13  ;;  %v1728_v54 = vmul.f32 %v1664_v39, %v4142_v42 }
 0x333   :  { %v4291_v55 = vpop.eup %3041  ;;  %v1485_v0 = vmul.f32 0.7978846, %v1421_v17  ;;  %v1360_v24 = vmul.f32 0.044715, %v1296_v25  ;;  %v1297_v53 = vmul.f32 %v1233_v60, %v4275_v62  ;;  %v1298_v11 = vmul.f32 %v1234_v20, %v4278_v3  ;;  %v1106_v47 = vpop.f32.mrb[36].mxu1 }
 0x334   :  { %v4295_v10 = vpop.eup %3043  ;;  %v1486_v36 = vmul.f32 0.7978846, %v1422_v5  ;;  %v1423_v14 = vadd.f32 %v1359_v40, %v4260_v1  ;;  %v1730_v23 = vmul.f32 %v1666_v61, %v4152_v52  ;;  %v4300_v63 = vadd.f32 %v1106_v47, %v4134_v35  ;;  %v1108_v42 = vpop.f32.mrb[37].mxu1 }
 0x335   :  { %v4302_v39 = vpop.eup %3045  ;;  %3051 = vtanh.f32 %v1485_v0  ;;  %v1424_v13 = vadd.f32 %v1360_v24, %v4266_v21  ;;  %v1361_v17 = vmul.f32 0.044715, %v1297_v53  ;;  %v1362_v25 = vmul.f32 0.044715, %v1298_v11  ;;  %v1110_v20 = vpop.f32.mrb[38].mxu1 }
 0x336   :  { %3053 = vtanh.f32 %v1486_v36  ;;  %v1487_v60 = vmul.f32 0.7978846, %v1423_v14  ;;  %v1792_v2 = vpack.c.bf16 %v1730_v23, %v1728_v54  ;;  %v1235_v5 = vmul.f32 %v4300_v63, %v4300_v63  ;;  %v1112_v40 = vpop.f32.mrb[39].mxu1 }
 0x337   :  { %v1488_v61 = vmul.f32 0.7978846, %v1424_v13  ;;  %v1425_v47 = vadd.f32 %v1361_v17, %v4275_v62  ;;  %v1426_v52 = vadd.f32 %v1362_v25, %v4278_v3  ;;  %v4310_v41 = vadd.f32 %v1108_v42, %v4136_v31 }
 0x338   :  { %3055 = vtanh.f32 %v1487_v60  ;;  %1990 = vmatprep.mubr.bf16.mxu0 %v1792_v2  ;;  %v1299_v11 = vmul.f32 %v1235_v5, %v4300_v63  ;;  %v4314_v36 = vadd.f32 %v1110_v20, %v4134_v35  ;;  %v4317_v14 = vadd.f32 %v1112_v40, %v4136_v31 }
 0x339   :  { %3057 = vtanh.f32 %v1488_v61  ;;  %v1489_v54 = vmul.f32 0.7978846, %v1425_v47  ;;  %v1490_v0 = vmul.f32 0.7978846, %v1426_v52  ;;  %v5276_v24 = vpack.c.bf16 %v4237_v48, %v4230_v15 }
 0x33a   :  { %v1236_v53 = vmul.f32 %v4310_v41, %v4310_v41  ;;  %v4324_v23 = vpop.eup %3047  ;;  %v1363_v2 = vmul.f32 0.044715, %v1299_v11  ;;  %v1237_v42 = vmul.f32 %v4314_v36, %v4314_v36  ;;  %v1238_v13 = vmul.f32 %v4317_v14, %v4317_v14 }
 0x33b   :  { %1991 = vmatmul.mubr.bf16.vlgmr.msra.gmra.mrb[16].mxu0 %v5276_v24  ;;  %v1604_v17 = vadd.f32 1.0, %v4248_v34  ;;  %3059 = vtanh.f32 %v1489_v54  ;;  %v1606_v15 = vadd.f32 1.0, %v4262_v8  ;;  %v1603_v48 = vadd.f32 1.0, %v4242_v58  ;;  %v1116_v20 = vpop.f32.mrb[40].mxu1 }
 0x33c   :  { %v1300_v25 = vmul.f32 %v1236_v53, %v4310_v41  ;;  %v4334_v60 = vpop.eup %3049  ;;  %3061 = vtanh.f32 %v1490_v0  ;;  %v1427_v5 = vadd.f32 %v1363_v2, %v4300_v63  ;;  %v1301_v40 = vmul.f32 %v1237_v42, %v4314_v36  ;;  %v1118_v47 = vpop.f32.mrb[41].mxu1 }
 0x33d   :  { %v1302_v61 = vmul.f32 %v1238_v13, %v4317_v14  ;;  %v1668_v34 = vmul.f32 0.5, %v1604_v17  ;;  %v1670_v11 = vmul.f32 0.5, %v1606_v15  ;;  %v1605_v54 = vadd.f32 1.0, %v4254_v19  ;;  %v1120_v24 = vpop.f32.mrb[42].mxu1 }
 0x33e   :  { %v1364_v52 = vmul.f32 0.044715, %v1300_v25  ;;  %v1491_v8 = vmul.f32 0.7978846, %v1427_v5  ;;  %v1365_v53 = vmul.f32 0.044715, %v1301_v40  ;;  %v4341_v51 = vadd.f32 %v1116_v20, %v4134_v35 }
 0x33f   :  { %v1366_v58 = vmul.f32 0.044715, %v1302_v61  ;;  %v4343_v0 = vpop.eup %3051  ;;  %v1732_v42 = vmul.f32 %v1668_v34, %v4168_v30  ;;  %v1734_v13 = vmul.f32 %v1670_v11, %v4180_v33  ;;  %v1667_v25 = vmul.f32 0.5, %v1603_v48  ;;  %v1122_v17 = vpop.f32.mrb[43].mxu1 }
 0x340   :  { %v1428_v2 = vadd.f32 %v1364_v52, %v4310_v41  ;;  %v4348_v15 = vpop.eup %3053  ;;  %3063 = vtanh.f32 %v1491_v8  ;;  %v1429_v19 = vadd.f32 %v1365_v53, %v4314_v36  ;;  %v1669_v40 = vmul.f32 0.5, %v1605_v54 }
 0x341   :  { %v1430_v5 = vadd.f32 %v1366_v58, %v4317_v14  ;;  %v1794_v61 = vpack.c.bf16 %v1734_v13, %v1732_v42  ;;  %v1731_v22 = vmul.f32 %v1667_v25, %v4164_v50  ;;  %v1239_v52 = vmul.f32 %v4341_v51, %v4341_v51 }
 0x342   :  { %v1492_v20 = vmul.f32 0.7978846, %v1428_v2  ;;  %v4355_v30 = vpop.eup %3055  ;;  %v1493_v33 = vmul.f32 0.7978846, %v1429_v19  ;;  %v1733_v34 = vmul.f32 %v1669_v40, %v4174_v16  ;;  %v4359_v11 = vadd.f32 %v1118_v47, %v4136_v31 }
 0x343   :  { %v1494_v48 = vmul.f32 0.7978846, %v1430_v5  ;;  %v4361_v8 = vpop.eup %3057  ;;  %1998 = vmatprep.mubr.bf16.mxu0 %v1794_v61  ;;  %v1303_v54 = vmul.f32 %v1239_v52, %v4341_v51  ;;  %v4365_v50 = vadd.f32 %v1120_v24, %v4134_v35  ;;  %v4368_v53 = vadd.f32 %v1122_v17, %v4136_v31  ;;  %v1126_v58 = vpop.f32.mrb[44].mxu1 }
 0x344   :  { %3065 = vtanh.f32 %v1492_v20  ;;  %v1793_v2 = vpack.c.bf16 %v1733_v34, %v1731_v22  ;;  %v1240_v16 = vmul.f32 %v4359_v11, %v4359_v11  ;;  %v1608_v47 = vadd.f32 1.0, %v4291_v55  ;;  %v1128_v42 = vpop.f32.mrb[45].mxu1 }
 0x345   :  { %3067 = vtanh.f32 %v1493_v33  ;;  %v4373_v13 = vpop.eup %3059  ;;  %v1367_v25 = vmul.f32 0.044715, %v1303_v54  ;;  %v1241_v24 = vmul.f32 %v4365_v50, %v4365_v50  ;;  %v1242_v17 = vmul.f32 %v4368_v53, %v4368_v53  ;;  %v1130_v19 = vpop.f32.mrb[46].mxu1 }
 0x346   :  { %3069 = vtanh.f32 %v1494_v48  ;;  %v4379_v5 = vpop.eup %3061  ;;  %1999 = vmatmul.mubr.bf16.gmra.mrb[20].mxu0 %v1793_v2  ;;  %v1304_v22 = vmul.f32 %v1240_v16, %v4359_v11  ;;  %v1610_v40 = vadd.f32 1.0, %v4302_v39  ;;  %v1672_v55 = vmul.f32 0.5, %v1608_v47  ;;  %v1132_v61 = vpop.f32.mrb[47].mxu1 }
 0x347   :  { %v1607_v20 = vadd.f32 1.0, %v4287_v28  ;;  %v1431_v52 = vadd.f32 %v1367_v25, %v4341_v51  ;;  %v1305_v33 = vmul.f32 %v1241_v24, %v4365_v50  ;;  %v1306_v48 = vmul.f32 %v1242_v17, %v4368_v53 }
 0x348   :  { %v1609_v34 = vadd.f32 1.0, %v4295_v10  ;;  %v1368_v54 = vmul.f32 0.044715, %v1304_v22  ;;  %v1674_v37 = vmul.f32 0.5, %v1610_v40  ;;  %v1736_v2 = vmul.f32 %v1672_v55, %v4196_v26 }
 0x349   :  { %v1671_v45 = vmul.f32 0.5, %v1607_v20  ;;  %v1495_v16 = vmul.f32 0.7978846, %v1431_v52  ;;  %v1369_v18 = vmul.f32 0.044715, %v1305_v33  ;;  %v4390_v47 = vadd.f32 %v1126_v58, %v4134_v35 }
 0x34a   :  { %v1370_v39 = vmul.f32 0.044715, %v1306_v48  ;;  %v4392_v28 = vpop.eup %3063  ;;  %v1432_v25 = vadd.f32 %v1368_v54, %v4359_v11  ;;  %v1738_v24 = vmul.f32 %v1674_v37, %v4208_v4  ;;  %v1673_v17 = vmul.f32 0.5, %v1609_v34 }
 0x34b   :  { %v1735_v10 = vmul.f32 %v1671_v45, %v4192_v57  ;;  %3071 = vtanh.f32 %v1495_v16  ;;  %v1433_v22 = vadd.f32 %v1369_v18, %v4365_v50  ;;  %v1243_v40 = vmul.f32 %v4390_v47, %v4390_v47  ;;  %v1136_v55 = vpop.f32.mrb[48].mxu1 }
 0x34c   :  { %v1434_v26 = vadd.f32 %v1370_v39, %v4368_v53  ;;  %v1496_v58 = vmul.f32 0.7978846, %v1432_v25  ;;  %v1796_v20 = vpack.c.bf16 %v1738_v24, %v1736_v2  ;;  %v1737_v52 = vmul.f32 %v1673_v17, %v4202_v6  ;;  %v1138_v37 = vpop.f32.mrb[49].mxu1 }
 0x34d   :  { %v4403_v33 = vadd.f32 %v1128_v42, %v4136_v31  ;;  %v1497_v45 = vmul.f32 0.7978846, %v1433_v22  ;;  %v1307_v18 = vmul.f32 %v1243_v40, %v4390_v47  ;;  %v4409_v48 = vadd.f32 %v1130_v19, %v4134_v35  ;;  %v1140_v34 = vpop.f32.mrb[50].mxu1 }
 0x34e   :  { %v4405_v4 = vpop.eup %3065  ;;  %v1498_v57 = vmul.f32 0.7978846, %v1434_v26  ;;  %3073 = vtanh.f32 %v1496_v58  ;;  %2006 = vmatprep.mubr.bf16.mxu0 %v1796_v20  ;;  %v1795_v2 = vpack.c.bf16 %v1737_v52, %v1735_v10  ;;  %v4416_v42 = vadd.f32 %v1132_v61, %v4136_v31  ;;  %v1142_v16 = vpop.f32.mrb[51].mxu1 }
 0x34f   :  { %v4411_v54 = vpop.eup %3067  ;;  %v1244_v6 = vmul.f32 %v4403_v33, %v4403_v33  ;;  %3075 = vtanh.f32 %v1497_v45  ;;  %v1371_v25 = vmul.f32 0.044715, %v1307_v18  ;;  %v1245_v19 = vmul.f32 %v4409_v48, %v4409_v48 }
 0x350   :  { %v4418_v39 = vpop.eup %3069  ;;  %v1612_v24 = vadd.f32 1.0, %v4334_v60  ;;  %3077 = vtanh.f32 %v1498_v57  ;;  %2007 = vmatmul.mubr.bf16.gmra.mrb[24].mxu0 %v1795_v2  ;;  %v1246_v10 = vmul.f32 %v4416_v42, %v4416_v42  ;;  %v1614_v61 = vadd.f32 1.0, %v4348_v15 }
 0x351   :  { %v1308_v17 = vmul.f32 %v1244_v6, %v4403_v33  ;;  %v1435_v22 = vadd.f32 %v1371_v25, %v4390_v47  ;;  %v1309_v26 = vmul.f32 %v1245_v19, %v4409_v48  ;;  %v1611_v58 = vadd.f32 1.0, %v4324_v23 }
 0x352   :  { %v1676_v40 = vmul.f32 0.5, %v1612_v24  ;;  %v1310_v52 = vmul.f32 %v1246_v10, %v4416_v42  ;;  %v1678_v60 = vmul.f32 0.5, %v1614_v61  ;;  %v1613_v45 = vadd.f32 1.0, %v4343_v0 }
 0x353   :  { %v1372_v20 = vmul.f32 0.044715, %v1308_v17  ;;  %v1499_v57 = vmul.f32 0.7978846, %v1435_v22  ;;  %v1373_v18 = vmul.f32 0.044715, %v1309_v26  ;;  %v4440_v10 = vadd.f32 %v1136_v55, %v4134_v35 }
 0x354   :  { %v1740_v2 = vmul.f32 %v1676_v40, %v4227_v56  ;;  %v1675_v6 = vmul.f32 0.5, %v1611_v58  ;;  %v1146_v43 = vpop.f32.mrb[52].mxu1  ;;  %v1374_v25 = vmul.f32 0.044715, %v1310_v52  ;;  %v1742_v19 = vmul.f32 %v1678_v60, %v4246_v44 }
 0x355   :  { %v1436_v15 = vadd.f32 %v1372_v20, %v4403_v33  ;;  %v1677_v24 = vmul.f32 0.5, %v1613_v45  ;;  %v1148_v32 = vpop.f32.mrb[53].mxu1  ;;  %v4435_v23 = vpop.eup %3071  ;;  %3079 = vtanh.f32 %v1499_v57  ;;  %v1437_v17 = vadd.f32 %v1373_v18, %v4409_v48 }
 0x356   :  { %v1739_v0 = vmul.f32 %v1675_v6, %v4220_v38  ;;  %v1150_v56 = vpop.f32.mrb[54].mxu1  ;;  %v1438_v22 = vadd.f32 %v1374_v25, %v4416_v42  ;;  %v1798_v26 = vpack.c.bf16 %v1742_v19, %v1740_v2  ;;  %v1247_v20 = vmul.f32 %v4440_v10, %v4440_v10 }
 0x357   :  { %v1500_v61 = vmul.f32 0.7978846, %v1436_v15  ;;  %v1741_v40 = vmul.f32 %v1677_v24, %v4240_v49  ;;  %v1152_v44 = vpop.f32.mrb[55].mxu1  ;;  %v1501_v58 = vmul.f32 0.7978846, %v1437_v17  ;;  %v4447_v52 = vadd.f32 %v1138_v37, %v4136_v31 }
 0x358   :  { %v4450_v38 = vadd.f32 %v1140_v34, %v4134_v35  ;;  %v4452_v55 = vpop.eup %3073  ;;  %v1502_v60 = vmul.f32 0.7978846, %v1438_v22  ;;  %2014 = vmatprep.mubr.bf16.mxu0 %v1798_v26  ;;  %v4455_v57 = vadd.f32 %v1142_v16, %v4136_v31  ;;  %v1311_v18 = vmul.f32 %v1247_v20, %v4440_v10 }
 0x359   :  { %3081 = vtanh.f32 %v1500_v61  ;;  %v1797_v45 = vpack.c.bf16 %v1741_v40, %v1739_v0  ;;  %v4457_v49 = vpop.eup %3075  ;;  %v1248_v37 = vmul.f32 %v4447_v52, %v4447_v52  ;;  %v1616_v16 = vadd.f32 1.0, %v4361_v8 }
 0x35a   :  { %3083 = vtanh.f32 %v1501_v58  ;;  %v1249_v34 = vmul.f32 %v4450_v38, %v4450_v38  ;;  %v4464_v2 = vpop.eup %3077  ;;  %v1250_v6 = vmul.f32 %v4455_v57, %v4455_v57  ;;  %v1618_v15 = vadd.f32 1.0, %v4379_v5 }
 0x35b   :  { %3085 = vtanh.f32 %v1502_v60  ;;  %2015 = vmatmul.mubr.bf16.gmra.mrb[28].mxu0 %v1797_v45  ;;  %v1375_v25 = vmul.f32 0.044715, %v1311_v18  ;;  %v1312_v19 = vmul.f32 %v1248_v37, %v4447_v52  ;;  %v1615_v17 = vadd.f32 1.0, %v4355_v30 }
 0x35c   :  { %v1313_v24 = vmul.f32 %v1249_v34, %v4450_v38  ;;  %v1314_v0 = vmul.f32 %v1250_v6, %v4455_v57  ;;  %v1680_v61 = vmul.f32 0.5, %v1616_v16  ;;  %v1682_v22 = vmul.f32 0.5, %v1618_v15 }
 0x35d   :  { %v1617_v26 = vadd.f32 1.0, %v4373_v13  ;;  %v1439_v40 = vadd.f32 %v1375_v25, %v4440_v10  ;;  %v1376_v58 = vmul.f32 0.044715, %v1312_v19  ;;  %v1679_v8 = vmul.f32 0.5, %v1615_v17 }
 0x35e   :  { %v1377_v20 = vmul.f32 0.044715, %v1313_v24  ;;  %v1378_v60 = vmul.f32 0.044715, %v1314_v0  ;;  %v1744_v5 = vmul.f32 %v1680_v61, %v4266_v21  ;;  %v1746_v45 = vmul.f32 %v1682_v22, %v4278_v3 }
 0x35f   :  { %v1681_v18 = vmul.f32 0.5, %v1617_v26  ;;  %v4478_v37 = vpop.eup %3079  ;;  %v1503_v30 = vmul.f32 0.7978846, %v1439_v40  ;;  %v1440_v34 = vadd.f32 %v1376_v58, %v4447_v52  ;;  %v1743_v13 = vmul.f32 %v1679_v8, %v4260_v1 }
 0x360   :  { %v1441_v6 = vadd.f32 %v1377_v20, %v4450_v38  ;;  %v1442_v16 = vadd.f32 %v1378_v60, %v4455_v57  ;;  %v1800_v15 = vpack.c.bf16 %v1746_v45, %v1744_v5  ;;  %v4486_v19 = vadd.f32 %v1146_v43, %v4134_v35 }
 0x361   :  { %v1745_v25 = vmul.f32 %v1681_v18, %v4275_v62  ;;  %3087 = vtanh.f32 %v1503_v30  ;;  %v1504_v21 = vmul.f32 0.7978846, %v1440_v34  ;;  %v4489_v24 = vadd.f32 %v1148_v32, %v4136_v31 }
 0x362   :  { %v1505_v3 = vmul.f32 0.7978846, %v1441_v6  ;;  %v1506_v0 = vmul.f32 0.7978846, %v1442_v16  ;;  %2022 = vmatprep.mubr.bf16.mxu0 %v1800_v15  ;;  %v1251_v1 = vmul.f32 %v4486_v19, %v4486_v19  ;;  %v4496_v22 = vadd.f32 %v1150_v56, %v4134_v35 }
 0x363   :  { %v4491_v17 = vpop.eup %3081  ;;  %v1799_v61 = vpack.c.bf16 %v1745_v25, %v1743_v13  ;;  %3089 = vtanh.f32 %v1504_v21  ;;  %v1252_v43 = vmul.f32 %v4489_v24, %v4489_v24  ;;  %v4503_v32 = vadd.f32 %v1152_v44, %v4136_v31 }
 0x364   :  { %v4498_v62 = vpop.eup %3083  ;;  %v1620_v26 = vadd.f32 1.0, %v4405_v4  ;;  %3091 = vtanh.f32 %v1505_v3  ;;  %v1315_v58 = vmul.f32 %v1251_v1, %v4486_v19  ;;  %v1253_v56 = vmul.f32 %v4496_v22, %v4496_v22 }
 0x365   :  { %v3086_v40 = vpop.eup %3085  ;;  %2023 = vmatmul.mubr.bf16.gmra.mrb[32].mxu0 %v1799_v61  ;;  %v1622_v20 = vadd.f32 1.0, %v4418_v39  ;;  %3093 = vtanh.f32 %v1506_v0  ;;  %v1316_v8 = vmul.f32 %v1252_v43, %v4489_v24  ;;  %v1254_v60 = vmul.f32 %v4503_v32, %v4503_v32 }
 0x366   :  { %v1684_v44 = vmul.f32 0.5, %v1620_v26  ;;  %v1379_v5 = vmul.f32 0.044715, %v1315_v58  ;;  %v1317_v4 = vmul.f32 %v1253_v56, %v4496_v22  ;;  %v1619_v18 = vadd.f32 1.0, %v4392_v28 }
 0x367   :  { %v1686_v45 = vmul.f32 0.5, %v1622_v20  ;;  %v1380_v30 = vmul.f32 0.044715, %v1316_v8  ;;  %v1318_v34 = vmul.f32 %v1254_v60, %v4503_v32  ;;  %v1621_v39 = vadd.f32 1.0, %v4411_v54 }
 0x368   :  { %v1748_v6 = vmul.f32 %v1684_v44, %v4310_v41  ;;  %v1443_v13 = vadd.f32 %v1379_v5, %v4486_v19  ;;  %v1381_v16 = vmul.f32 0.044715, %v1317_v4  ;;  %v1683_v25 = vmul.f32 0.5, %v1619_v18 }
 0x369   :  { %v1750_v15 = vmul.f32 %v1686_v45, %v4317_v14  ;;  %v1444_v21 = vadd.f32 %v1380_v30, %v4489_v24  ;;  %v1382_v3 = vmul.f32 0.044715, %v1318_v34  ;;  %v1685_v0 = vmul.f32 0.5, %v1621_v39 }
 0x36a   :  { %v1624_v61 = vadd.f32 1.0, %v4452_v55  ;;  %v1507_v28 = vmul.f32 0.7978846, %v1443_v13  ;;  %v1445_v1 = vadd.f32 %v1381_v16, %v4496_v22  ;;  %v1747_v41 = vmul.f32 %v1683_v25, %v4300_v63 }
 0x36b   :  { %v1802_v43 = vpack.c.bf16 %v1750_v15, %v1748_v6  ;;  %v3088_v26 = vpop.eup %3087  ;;  %v1508_v54 = vmul.f32 0.7978846, %v1444_v21  ;;  %v1446_v58 = vadd.f32 %v1382_v3, %v4503_v32  ;;  %v1749_v56 = vmul.f32 %v1685_v0, %v4314_v36 }
 0x36c   :  { %v1626_v14 = vadd.f32 1.0, %v4464_v2  ;;  %3095 = vtanh.f32 %v1507_v28  ;;  %v1509_v20 = vmul.f32 0.7978846, %v1445_v1  ;;  %v1688_v8 = vmul.f32 0.5, %v1624_v61 }
 0x36d   :  { %2030 = vmatprep.mubr.bf16.mxu0 %v1802_v43  ;;  %v1623_v55 = vadd.f32 1.0, %v4435_v23  ;;  %v3090_v60 = vpop.eup %3089  ;;  %3097 = vtanh.f32 %v1508_v54  ;;  %v1510_v44 = vmul.f32 0.7978846, %v1446_v58  ;;  %v1801_v5 = vpack.c.bf16 %v1749_v56, %v1747_v41 }
 0x36e   :  { %v1690_v4 = vmul.f32 0.5, %v1626_v14  ;;  %v3092_v63 = vpop.eup %3091  ;;  %3099 = vtanh.f32 %v1509_v20  ;;  %v1752_v45 = vmul.f32 %v1688_v8, %v4359_v11  ;;  %v1625_v18 = vadd.f32 1.0, %v4457_v49 }
 0x36f   :  { %v1687_v36 = vmul.f32 0.5, %v1623_v55  ;;  %v3094_v30 = vpop.eup %3093  ;;  %3101 = vtanh.f32 %v1510_v44  ;;  %2031 = vmatmul.mubr.bf16.gmra.mrb[36].mxu0 %v1801_v5  ;;  %v1628_v34 = vadd.f32 1.0, %v4491_v17  ;;  %v1630_v23 = vadd.f32 1.0, %v3086_v40 }
 0x370   :  { %v1754_v2 = vmul.f32 %v1690_v4, %v4368_v53  ;;  %v1689_v6 = vmul.f32 0.5, %v1625_v18  ;;  %v1627_v13 = vadd.f32 1.0, %v4478_v37  ;;  %v1629_v16 = vadd.f32 1.0, %v4498_v62 }
 0x371   :  { %v1751_v39 = vmul.f32 %v1687_v36, %v4341_v51  ;;  %v1692_v11 = vmul.f32 0.5, %v1628_v34  ;;  %v1694_v25 = vmul.f32 0.5, %v1630_v23  ;;  %v1632_v49 = vadd.f32 1.0, %v3090_v60 }
 0x372   :  { %v1804_v15 = vpack.c.bf16 %v1754_v2, %v1752_v45  ;;  %v1753_v21 = vmul.f32 %v1689_v6, %v4365_v50  ;;  %v1691_v3 = vmul.f32 0.5, %v1627_v13  ;;  %v1693_v0 = vmul.f32 0.5, %v1629_v16 }
 0x373   :  { %v1634_v61 = vadd.f32 1.0, %v3094_v30  ;;  %v1756_v53 = vmul.f32 %v1692_v11, %v4403_v33  ;;  %v1758_v17 = vmul.f32 %v1694_v25, %v4416_v42  ;;  %v1696_v40 = vmul.f32 0.5, %v1632_v49 }
 0x374   :  { %2038 = vmatprep.mubr.bf16.mxu0 %v1804_v15  ;;  %v1631_v51 = vadd.f32 1.0, %v3088_v26  ;;  %v1803_v28 = vpack.c.bf16 %v1753_v21, %v1751_v39  ;;  %v1755_v37 = vmul.f32 %v1691_v3, %v4390_v47  ;;  %v1757_v62 = vmul.f32 %v1693_v0, %v4409_v48 }
 0x375   :  { %v1698_v1 = vmul.f32 0.5, %v1634_v61  ;;  %v1806_v43 = vpack.c.bf16 %v1758_v17, %v1756_v53  ;;  %v1633_v41 = vadd.f32 1.0, %v3092_v63  ;;  %v1760_v56 = vmul.f32 %v1696_v40, %v4447_v52 }
 0x376   :  { %v1695_v54 = vmul.f32 0.5, %v1631_v51  ;;  %v3096_v50 = vpop.eup %3095  ;;  %v1805_v58 = vpack.c.bf16 %v1757_v62, %v1755_v37 }
 0x377   :  { %v1762_v14 = vmul.f32 %v1698_v1, %v4455_v57  ;;  %v3098_v33 = vpop.eup %3097  ;;  %2039 = vmatmul.mubr.bf16.gmra.mrb[40].mxu0 %v1803_v28  ;;  %v1697_v42 = vmul.f32 0.5, %v1633_v41  ;;  %v1635_v20 = vadd.f32 1.0, %v3096_v50 }
 0x378   :  { %v3100_v26 = vpop.eup %3099  ;;  %2046 = vmatprep.mubr.bf16.mxu0 %v1806_v43  ;;  %v1636_v47 = vadd.f32 1.0, %v3098_v33  ;;  %v1759_v48 = vmul.f32 %v1695_v54, %v4440_v10 }
 0x379   :  { %v1808_v8 = vpack.c.bf16 %v1762_v14, %v1760_v56  ;;  %v3102_v55 = vpop.eup %3101  ;;  %v1761_v60 = vmul.f32 %v1697_v42, %v4450_v38  ;;  %v1637_v44 = vadd.f32 1.0, %v3100_v26  ;;  %v1699_v5 = vmul.f32 0.5, %v1635_v20 }
 0x37a   :  { %v1638_v4 = vadd.f32 1.0, %v3102_v55  ;;  %v1700_v63 = vmul.f32 0.5, %v1636_v47 }
 0x37b   :  { %v1807_v52 = vpack.c.bf16 %v1761_v60, %v1759_v48  ;;  %v1701_v45 = vmul.f32 0.5, %v1637_v44  ;;  %v1763_v18 = vmul.f32 %v1699_v5, %v4486_v19 }
 0x37c   :  { %v1702_v57 = vmul.f32 0.5, %v1638_v4  ;;  %v1764_v30 = vmul.f32 %v1700_v63, %v4489_v24 }
 0x37d   :  { %v1765_v36 = vmul.f32 %v1701_v45, %v4496_v22 }
 0x37e   :  { %v1766_v2 = vmul.f32 %v1702_v57, %v4503_v32 }
 0x37f   :  { %2047 = vmatmul.mubr.bf16.gmra.mrb[44].mxu0 %v1805_v58  ;;  %v1809_v34 = vpack.c.bf16 %v1765_v36, %v1763_v18 }
 0x380   :  { %2054 = vmatprep.mubr.bf16.mxu0 %v1808_v8  ;;  %v1810_v10 = vpack.c.bf16 %v1766_v2, %v1764_v30 }
 0x387   :  { %2055 = vmatmul.mubr.bf16.gmra.mrb[48].mxu0 %v1807_v52 }
 0x388   :  { %2062 = vmatprep.mubr.bf16.mxu0 %v1810_v10 }
 0x38f   :  { %2063 = vmatmul.mubr.bf16.gmra.mrb[52].mxu0 %v1809_v34 }
 0x3a3   :  { %v1156_v38 = vpop.f32.mrb[56].mxu1 }
 0x3a4   :  { %v4549_v23 = vadd.f32 %v1156_v38, %v4134_v35  ;;  %v1158_v6 = vpop.f32.mrb[57].mxu1 }
 0x3a5   :  { %v4552_v19 = vadd.f32 %v1158_v6, %v4136_v31  ;;  %v1160_v22 = vpop.f32.mrb[58].mxu1 }
 0x3a6   :  { %v1255_v24 = vmul.f32 %v4549_v23, %v4549_v23  ;;  %v4557_v32 = vadd.f32 %v1160_v22, %v4134_v35  ;;  %v1162_v39 = vpop.f32.mrb[59].mxu1 }
 0x3a7   :  { %v1256_v13 = vmul.f32 %v4552_v19, %v4552_v19  ;;  %v4562_v16 = vadd.f32 %v1162_v39, %v4136_v31 }
 0x3a8   :  { %v1319_v15 = vmul.f32 %v1255_v24, %v4549_v23  ;;  %v1257_v11 = vmul.f32 %v4557_v32, %v4557_v32 }
 0x3a9   :  { %v1320_v25 = vmul.f32 %v1256_v13, %v4552_v19  ;;  %v1258_v49 = vmul.f32 %v4562_v16, %v4562_v16 }
 0x3aa   :  { %v1383_v21 = vmul.f32 0.044715, %v1319_v15  ;;  %v1321_v3 = vmul.f32 %v1257_v11, %v4557_v32 }
 0x3ab   :  { %v1384_v0 = vmul.f32 0.044715, %v1320_v25  ;;  %v1322_v61 = vmul.f32 %v1258_v49, %v4562_v16  ;;  %v1166_v53 = vpop.f32.mrb[60].mxu1 }
 0x3ac   :  { %v1447_v17 = vadd.f32 %v1383_v21, %v4549_v23  ;;  %v1385_v40 = vmul.f32 0.044715, %v1321_v3  ;;  %v4574_v51 = vadd.f32 %v1166_v53, %v4134_v35  ;;  %v1168_v28 = vpop.f32.mrb[61].mxu1 }
 0x3ad   :  { %v1448_v37 = vadd.f32 %v1384_v0, %v4552_v19  ;;  %v1386_v62 = vmul.f32 0.044715, %v1322_v61  ;;  %v4578_v1 = vadd.f32 %v1168_v28, %v4136_v31  ;;  %v1170_v43 = vpop.f32.mrb[62].mxu1 }
 0x3ae   :  { %v1511_v41 = vmul.f32 0.7978846, %v1447_v17  ;;  %v1449_v54 = vadd.f32 %v1385_v40, %v4557_v32  ;;  %v1259_v50 = vmul.f32 %v4574_v51, %v4574_v51  ;;  %v4584_v58 = vadd.f32 %v1170_v43, %v4134_v35  ;;  %v1172_v56 = vpop.f32.mrb[63].mxu1 }
 0x3af   :  { %v1512_v14 = vmul.f32 0.7978846, %v1448_v37  ;;  %v1450_v33 = vadd.f32 %v1386_v62, %v4562_v16  ;;  %v1260_v42 = vmul.f32 %v4578_v1, %v4578_v1  ;;  %v4590_v20 = vadd.f32 %v1172_v56, %v4136_v31 }
 0x3b0   :  { %3103 = vtanh.f32 %v1511_v41  ;;  %v1513_v26 = vmul.f32 0.7978846, %v1449_v54  ;;  %v1323_v8 = vmul.f32 %v1259_v50, %v4574_v51  ;;  %v1261_v47 = vmul.f32 %v4584_v58, %v4584_v58 }
 0x3b1   :  { %3105 = vtanh.f32 %v1512_v14  ;;  %v1514_v55 = vmul.f32 0.7978846, %v1450_v33  ;;  %v1324_v48 = vmul.f32 %v1260_v42, %v4578_v1  ;;  %v1262_v60 = vmul.f32 %v4590_v20, %v4590_v20 }
 0x3b2   :  { %3107 = vtanh.f32 %v1513_v26  ;;  %v1387_v44 = vmul.f32 0.044715, %v1323_v8  ;;  %v1325_v5 = vmul.f32 %v1261_v47, %v4584_v58 }
 0x3b3   :  { %v1388_v4 = vmul.f32 0.044715, %v1324_v48  ;;  %v1326_v63 = vmul.f32 %v1262_v60, %v4590_v20  ;;  %v1176_v52 = vpop.f32.mrb[64].mxu1  ;;  %3109 = vtanh.f32 %v1514_v55 }
 0x3b4   :  { %v1451_v45 = vadd.f32 %v1387_v44, %v4574_v51  ;;  %v1389_v57 = vmul.f32 0.044715, %v1325_v5  ;;  %v4602_v18 = vadd.f32 %v1176_v52, %v4134_v35  ;;  %v1178_v36 = vpop.f32.mrb[65].mxu1 }
 0x3b5   :  { %v1452_v30 = vadd.f32 %v1388_v4, %v4578_v1  ;;  %v1390_v2 = vmul.f32 0.044715, %v1326_v63  ;;  %v4606_v34 = vadd.f32 %v1178_v36, %v4136_v31  ;;  %v1180_v10 = vpop.f32.mrb[66].mxu1 }
 0x3b6   :  { %v1515_v38 = vmul.f32 0.7978846, %v1451_v45  ;;  %v1453_v6 = vadd.f32 %v1389_v57, %v4584_v58  ;;  %v1263_v22 = vmul.f32 %v4602_v18, %v4602_v18  ;;  %v4612_v24 = vadd.f32 %v1180_v10, %v4134_v35  ;;  %v1182_v39 = vpop.f32.mrb[67].mxu1 }
 0x3b7   :  { %v1516_v13 = vmul.f32 0.7978846, %v1452_v30  ;;  %v1454_v15 = vadd.f32 %v1390_v2, %v4590_v20  ;;  %v1264_v11 = vmul.f32 %v4606_v34, %v4606_v34  ;;  %v4618_v25 = vadd.f32 %v1182_v39, %v4136_v31 }
 0x3b8   :  { %3111 = vtanh.f32 %v1515_v38  ;;  %v1517_v49 = vmul.f32 0.7978846, %v1453_v6  ;;  %v1327_v21 = vmul.f32 %v1263_v22, %v4602_v18  ;;  %v1265_v3 = vmul.f32 %v4612_v24, %v4612_v24 }
 0x3b9   :  { %3113 = vtanh.f32 %v1516_v13  ;;  %v1518_v0 = vmul.f32 0.7978846, %v1454_v15  ;;  %v1328_v61 = vmul.f32 %v1264_v11, %v4606_v34  ;;  %v1266_v53 = vmul.f32 %v4618_v25, %v4618_v25 }
 0x3ba   :  { %v3104_v17 = vpop.eup %3103  ;;  %3115 = vtanh.f32 %v1517_v49  ;;  %v1391_v40 = vmul.f32 0.044715, %v1327_v21  ;;  %v1329_v28 = vmul.f32 %v1265_v3, %v4612_v24 }
 0x3bb   :  { %v3106_v37 = vpop.eup %3105  ;;  %3117 = vtanh.f32 %v1518_v0  ;;  %v1392_v62 = vmul.f32 0.044715, %v1328_v61  ;;  %v1330_v43 = vmul.f32 %v1266_v53, %v4618_v25  ;;  %v1186_v41 = vpop.f32.mrb[68].mxu1  ;;  %v4628_v54 = vadd.f32 1.0, %v3104_v17 }
 0x3bc   :  { %v3108_v50 = vpop.eup %3107  ;;  %v1455_v56 = vadd.f32 %v1391_v40, %v4602_v18  ;;  %v1393_v14 = vmul.f32 0.044715, %v1329_v28  ;;  %v4632_v33 = vadd.f32 %v1186_v41, %v4134_v35  ;;  %v1188_v42 = vpop.f32.mrb[69].mxu1  ;;  %v1640_v26 = vadd.f32 1.0, %v3106_v37 }
 0x3bd   :  { %v1456_v8 = vadd.f32 %v1392_v62, %v4606_v34  ;;  %v1394_v47 = vmul.f32 0.044715, %v1330_v43  ;;  %v4636_v55 = vadd.f32 %v1188_v42, %v4136_v31  ;;  %v1190_v48 = vpop.f32.mrb[70].mxu1  ;;  %v4638_v60 = vadd.f32 1.0, %v3108_v50  ;;  %v3110_v45 = vpop.eup %3109 }
 0x3be   :  { %v1519_v44 = vmul.f32 0.7978846, %v1455_v56  ;;  %v1457_v5 = vadd.f32 %v1393_v14, %v4612_v24  ;;  %v1267_v4 = vmul.f32 %v4632_v33, %v4632_v33  ;;  %v4644_v63 = vadd.f32 %v1190_v48, %v4134_v35  ;;  %v1192_v52 = vpop.f32.mrb[71].mxu1 }
 0x3bf   :  { %v1520_v57 = vmul.f32 0.7978846, %v1456_v8  ;;  %v1458_v36 = vadd.f32 %v1394_v47, %v4618_v25  ;;  %v1268_v30 = vmul.f32 %v4636_v55, %v4636_v55  ;;  %v4650_v2 = vadd.f32 %v1192_v52, %v4136_v31 }
 0x3c0   :  { %3119 = vtanh.f32 %v1519_v44  ;;  %v1521_v10 = vmul.f32 0.7978846, %v1457_v5  ;;  %v1331_v38 = vmul.f32 %v1267_v4, %v4632_v33  ;;  %v1269_v6 = vmul.f32 %v4644_v63, %v4644_v63 }
 0x3c1   :  { %3121 = vtanh.f32 %v1520_v57  ;;  %v1522_v22 = vmul.f32 0.7978846, %v1458_v36  ;;  %v1332_v39 = vmul.f32 %v1268_v30, %v4636_v55  ;;  %v1270_v13 = vmul.f32 %v4650_v2, %v4650_v2 }
 0x3c2   :  { %v4658_v15 = vpop.eup %3111  ;;  %3123 = vtanh.f32 %v1521_v10  ;;  %v1395_v11 = vmul.f32 0.044715, %v1331_v38  ;;  %v1333_v49 = vmul.f32 %v1269_v6, %v4644_v63  ;;  %v1642_v21 = vadd.f32 1.0, %v3110_v45 }
 0x3c3   :  { %v4661_v3 = vpop.eup %3113  ;;  %3125 = vtanh.f32 %v1522_v22  ;;  %v1396_v0 = vmul.f32 0.044715, %v1332_v39  ;;  %v1334_v61 = vmul.f32 %v1270_v13, %v4650_v2  ;;  %v1196_v53 = vpop.f32.mrb[72].mxu1  ;;  %v1704_v17 = vmul.f32 0.5, %v1640_v26 }
 0x3c4   :  { %v4664_v40 = vpop.eup %3115  ;;  %v1459_v28 = vadd.f32 %v1395_v11, %v4632_v33  ;;  %v1397_v37 = vmul.f32 0.044715, %v1333_v49  ;;  %v4668_v62 = vadd.f32 %v1196_v53, %v4134_v35  ;;  %v1198_v43 = vpop.f32.mrb[73].mxu1  ;;  %v1706_v41 = vmul.f32 0.5, %v1642_v21 }
 0x3c5   :  { %v4670_v50 = vpop.eup %3117  ;;  %v1460_v56 = vadd.f32 %v1396_v0, %v4636_v55  ;;  %v1398_v14 = vmul.f32 0.044715, %v1334_v61  ;;  %v4674_v42 = vadd.f32 %v1198_v43, %v4136_v31  ;;  %v1200_v8 = vpop.f32.mrb[74].mxu1  ;;  %v1768_v26 = vmul.f32 %v1704_v17, %v4552_v19 }
 0x3c6   :  { %v1523_v47 = vmul.f32 0.7978846, %v1459_v28  ;;  %v1461_v48 = vadd.f32 %v1397_v37, %v4644_v63  ;;  %v1271_v44 = vmul.f32 %v4668_v62, %v4668_v62  ;;  %v4681_v5 = vadd.f32 %v1200_v8, %v4134_v35  ;;  %v1202_v4 = vpop.f32.mrb[75].mxu1 }
 0x3c7   :  { %v1524_v52 = vmul.f32 0.7978846, %v1460_v56  ;;  %v1462_v45 = vadd.f32 %v1398_v14, %v4650_v2  ;;  %v1272_v57 = vmul.f32 %v4674_v42, %v4674_v42  ;;  %v4687_v36 = vadd.f32 %v1202_v4, %v4136_v31 }
 0x3c8   :  { %3127 = vtanh.f32 %v1523_v47  ;;  %v1525_v19 = vmul.f32 0.7978846, %v1461_v48  ;;  %v1335_v30 = vmul.f32 %v1271_v44, %v4668_v62  ;;  %v1273_v10 = vmul.f32 %v4681_v5, %v4681_v5 }
 0x3c9   :  { %3129 = vtanh.f32 %v1524_v52  ;;  %v1526_v38 = vmul.f32 0.7978846, %v1462_v45  ;;  %v1336_v6 = vmul.f32 %v1272_v57, %v4674_v42  ;;  %v1274_v22 = vmul.f32 %v4687_v36, %v4687_v36 }
 0x3ca   :  { %v4695_v39 = vpop.eup %3119  ;;  %3131 = vtanh.f32 %v1525_v19  ;;  %v1399_v13 = vmul.f32 0.044715, %v1335_v30  ;;  %v1337_v11 = vmul.f32 %v1273_v10, %v4681_v5  ;;  %v1770_v49 = vmul.f32 %v1706_v41, %v4562_v16 }
 0x3cb   :  { %v4699_v21 = vpop.eup %3121  ;;  %3133 = vtanh.f32 %v1526_v38  ;;  %v1400_v0 = vmul.f32 0.044715, %v1336_v6  ;;  %v1338_v61 = vmul.f32 %v1274_v22, %v4687_v36  ;;  %v1703_v53 = vmul.f32 0.5, %v4628_v54  ;;  %v1206_v17 = vpop.f32.mrb[76].mxu1 }
 0x3cc   :  { %v4703_v28 = vpop.eup %3123  ;;  %v1463_v37 = vadd.f32 %v1399_v13, %v4668_v62  ;;  %v1401_v43 = vmul.f32 0.044715, %v1337_v11  ;;  %v1812_v56 = vpack.c.bf16 %v1770_v49, %v1768_v26  ;;  %v1705_v14 = vmul.f32 0.5, %v4638_v60  ;;  %v1208_v8 = vpop.f32.mrb[77].mxu1 }
 0x3cd   :  { %v4707_v47 = vpop.eup %3125  ;;  %v1464_v16 = vadd.f32 %v1400_v0, %v4674_v42  ;;  %v1402_v41 = vmul.f32 0.044715, %v1338_v61  ;;  %v1767_v48 = vmul.f32 %v1703_v53, %v4549_v23  ;;  %v4712_v44 = vadd.f32 %v1206_v17, %v4134_v35  ;;  %v1210_v54 = vpop.f32.mrb[78].mxu1 }
 0x3ce   :  { %v1527_v4 = vmul.f32 0.7978846, %v1463_v37  ;;  %v1465_v52 = vadd.f32 %v1401_v43, %v4681_v5  ;;  %2070 = vmatprep.mubr.bf16.mxu0 %v1812_v56  ;;  %v1769_v26 = vmul.f32 %v1705_v14, %v4557_v32  ;;  %v4717_v60 = vadd.f32 %v1208_v8, %v4136_v31  ;;  %v1212_v45 = vpop.f32.mrb[79].mxu1 }
 0x3cf   :  { %v1528_v57 = vmul.f32 0.7978846, %v1464_v16  ;;  %v1466_v19 = vadd.f32 %v1402_v41, %v4687_v36  ;;  %v1275_v23 = vmul.f32 %v4712_v44, %v4712_v44  ;;  %v4723_v30 = vadd.f32 %v1210_v54, %v4134_v35 }
 0x3d0   :  { %3135 = vtanh.f32 %v1527_v4  ;;  %v1529_v10 = vmul.f32 0.7978846, %v1465_v52  ;;  %v1811_v38 = vpack.c.bf16 %v1769_v26, %v1767_v48  ;;  %v1276_v6 = vmul.f32 %v4717_v60, %v4717_v60 }
 0x3d1   :  { %3137 = vtanh.f32 %v1528_v57  ;;  %v1530_v32 = vmul.f32 0.7978846, %v1466_v19  ;;  %v1339_v22 = vmul.f32 %v1275_v23, %v4712_v44  ;;  %v1277_v13 = vmul.f32 %v4723_v30, %v4723_v30 }
 0x3d2   :  { %v3128_v11 = vpop.eup %3127  ;;  %3139 = vtanh.f32 %v1529_v10  ;;  %2071 = vmatmul.mubr.bf16.gmra.mrb[56].mxu0 %v1811_v38  ;;  %v1340_v49 = vmul.f32 %v1276_v6, %v4717_v60  ;;  %v4732_v35 = vadd.f32 %v1212_v45, %v4136_v31  ;;  %v1644_v0 = vadd.f32 1.0, %v4661_v3 }
 0x3d3   :  { %v3130_v61 = vpop.eup %3129  ;;  %3141 = vtanh.f32 %v1530_v32  ;;  %v1403_v53 = vmul.f32 0.044715, %v1339_v22  ;;  %v1341_v17 = vmul.f32 %v1277_v13, %v4723_v30  ;;  %v1646_v37 = vadd.f32 1.0, %v4670_v50 }
 0x3d4   :  { %v3132_v43 = vpop.eup %3131  ;;  %v1404_v56 = vmul.f32 0.044715, %v1340_v49  ;;  %v1278_v14 = vmul.f32 %v4732_v35, %v4732_v35  ;;  %v1708_v8 = vmul.f32 0.5, %v1644_v0  ;;  %v1643_v16 = vadd.f32 1.0, %v4658_v15 }
 0x3d5   :  { %v3134_v41 = vpop.eup %3133  ;;  %v1467_v31 = vadd.f32 %v1403_v53, %v4712_v44  ;;  %v1405_v48 = vmul.f32 0.044715, %v1341_v17  ;;  %v1710_v3 = vmul.f32 0.5, %v1646_v37  ;;  %v1645_v54 = vadd.f32 1.0, %v4664_v40 }
 0x3d6   :  { %v1468_v4 = vadd.f32 %v1404_v56, %v4717_v60  ;;  %v1342_v52 = vmul.f32 %v1278_v14, %v4732_v35  ;;  %v1772_v50 = vmul.f32 %v1708_v8, %v4578_v1  ;;  %v1707_v26 = vmul.f32 0.5, %v1643_v16 }
 0x3d7   :  { %v1531_v45 = vmul.f32 0.7978846, %v1467_v31  ;;  %v1469_v57 = vadd.f32 %v1405_v48, %v4723_v30  ;;  %v1774_v19 = vmul.f32 %v1710_v3, %v4590_v20  ;;  %v1709_v15 = vmul.f32 0.5, %v1645_v54 }
 0x3d8   :  { %v1532_v23 = vmul.f32 0.7978846, %v1468_v4  ;;  %v1406_v10 = vmul.f32 0.044715, %v1342_v52  ;;  %v1771_v38 = vmul.f32 %v1707_v26, %v4574_v51  ;;  %v1648_v6 = vadd.f32 1.0, %v4699_v21 }
 0x3d9   :  { %3143 = vtanh.f32 %v1531_v45  ;;  %v1533_v40 = vmul.f32 0.7978846, %v1469_v57  ;;  %v1814_v32 = vpack.c.bf16 %v1774_v19, %v1772_v50  ;;  %v1773_v22 = vmul.f32 %v1709_v15, %v4584_v58 }
 0x3da   :  { %v3136_v13 = vpop.eup %3135  ;;  %3145 = vtanh.f32 %v1532_v23  ;;  %v1470_v1 = vadd.f32 %v1406_v10, %v4732_v35  ;;  %v1650_v49 = vadd.f32 1.0, %v4707_v47  ;;  %v1712_v0 = vmul.f32 0.5, %v1648_v6 }
 0x3db   :  { %v3138_v20 = vpop.eup %3137  ;;  %3147 = vtanh.f32 %v1533_v40  ;;  %2078 = vmatprep.mubr.bf16.mxu0 %v1814_v32  ;;  %v1813_v53 = vpack.c.bf16 %v1773_v22, %v1771_v38  ;;  %v1647_v51 = vadd.f32 1.0, %v4695_v39  ;;  %v1649_v21 = vadd.f32 1.0, %v4703_v28 }
 0x3dc   :  { %v3140_v17 = vpop.eup %3139  ;;  %v1534_v37 = vmul.f32 0.7978846, %v1470_v1  ;;  %v1714_v56 = vmul.f32 0.5, %v1650_v49  ;;  %v1776_v58 = vmul.f32 %v1712_v0, %v4606_v34  ;;  %v1652_v14 = vadd.f32 1.0, %v3130_v61 }
 0x3dd   :  { %v3142_v8 = vpop.eup %3141  ;;  %2079 = vmatmul.mubr.bf16.gmra.mrb[60].mxu0 %v1813_v53  ;;  %v1711_v16 = vmul.f32 0.5, %v1647_v51  ;;  %v1713_v31 = vmul.f32 0.5, %v1649_v21  ;;  %v1654_v47 = vadd.f32 1.0, %v3134_v41  ;;  %v1651_v48 = vadd.f32 1.0, %v3128_v11 }
 0x3de   :  { %3149 = vtanh.f32 %v1534_v37  ;;  %v1778_v3 = vmul.f32 %v1714_v56, %v4618_v25  ;;  %v1716_v54 = vmul.f32 0.5, %v1652_v14  ;;  %v1653_v4 = vadd.f32 1.0, %v3132_v43 }
 0x3df   :  { %v1775_v39 = vmul.f32 %v1711_v16, %v4602_v18  ;;  %v1777_v28 = vmul.f32 %v1713_v31, %v4612_v24  ;;  %v1718_v52 = vmul.f32 0.5, %v1654_v47  ;;  %v1715_v50 = vmul.f32 0.5, %v1651_v48  ;;  %v4773_v16 = vld [vmem:[%s5220_s7] ss:$0 sm:$0xff] }
 0x3e0   :  { %v1816_v26 = vpack.c.bf16 %v1778_v3, %v1776_v58  ;;  %v1780_v34 = vmul.f32 %v1716_v54, %v4636_v55  ;;  %v1717_v61 = vmul.f32 0.5, %v1653_v4  ;;  %v1656_v45 = vadd.f32 1.0, %v3138_v20 }
 0x3e1   :  { %v1815_v57 = vpack.c.bf16 %v1777_v28, %v1775_v39  ;;  %v1782_v41 = vmul.f32 %v1718_v52, %v4650_v2  ;;  %v1779_v11 = vmul.f32 %v1715_v50, %v4632_v33  ;;  %v1658_v19 = vadd.f32 1.0, %v3142_v8 }
 0x3e2   :  { %2086 = vmatprep.mubr.bf16.mxu0 %v1816_v26  ;;  %v1781_v25 = vmul.f32 %v1717_v61, %v4644_v63  ;;  %v1720_v43 = vmul.f32 0.5, %v1656_v45  ;;  %v1655_v18 = vadd.f32 1.0, %v3136_v13  ;;  %v1657_v15 = vadd.f32 1.0, %v3140_v17 }
 0x3e3   :  { %v3144_v24 = vpop.eup %3143  ;;  %v1818_v23 = vpack.c.bf16 %v1782_v41, %v1780_v34  ;;  %v1722_v10 = vmul.f32 0.5, %v1658_v19 }
 0x3e4   :  { %v3146_v38 = vpop.eup %3145  ;;  %v1817_v6 = vpack.c.bf16 %v1781_v25, %v1779_v11  ;;  %v1719_v55 = vmul.f32 0.5, %v1655_v18  ;;  %v1721_v40 = vmul.f32 0.5, %v1657_v15  ;;  %v1784_v2 = vmul.f32 %v1720_v43, %v4674_v42 }
 0x3e5   :  { %v3148_v32 = vpop.eup %3147  ;;  %2087 = vmatmul.mubr.bf16.gmra.mrb[64].mxu0 %v1815_v57  ;;  %v1786_v33 = vmul.f32 %v1722_v10, %v4687_v36  ;;  %v1660_v22 = vadd.f32 1.0, %v3146_v38  ;;  %v1659_v1 = vadd.f32 1.0, %v3144_v24 }
 0x3e6   :  { %2094 = vmatprep.mubr.bf16.mxu0 %v1818_v23  ;;  %v1783_v63 = vmul.f32 %v1719_v55, %v4668_v62  ;;  %v1785_v13 = vmul.f32 %v1721_v40, %v4681_v5  ;;  %v1661_v49 = vadd.f32 1.0, %v3148_v32  ;;  %v5277_v32 = vld [vmem:[#allocation5_spill] sm:$0xff] }
 0x3e7   :  { %v1820_v0 = vpack.c.bf16 %v1786_v33, %v1784_v2  ;;  %v1723_v20 = vmul.f32 0.5, %v1659_v1  ;;  %v1724_v37 = vmul.f32 0.5, %v1660_v22 }
 0x3e8   :  { %v3150_v53 = vpop.eup %3149  ;;  %v1819_v51 = vpack.c.bf16 %v1785_v13, %v1783_v63  ;;  %v1725_v21 = vmul.f32 0.5, %v1661_v49 }
 0x3e9   :  { %v1662_v17 = vadd.f32 1.0, %v3150_v53  ;;  %v1787_v56 = vmul.f32 %v1723_v20, %v4712_v44  ;;  %v1788_v14 = vmul.f32 %v1724_v37, %v4717_v60  ;;  %v5278_v20 = vld [vmem:[#allocation6_spill] sm:$0xff]  ;;  %v5279_v53 = vld [vmem:[#allocation7_spill] sm:$0xff] }
 0x3ea   :  { %v1789_v42 = vmul.f32 %v1725_v21, %v4723_v30 }
 0x3eb   :  { %v1726_v36 = vmul.f32 0.5, %v1662_v17 }
 0x3ec   :  { %v1821_v58 = vpack.c.bf16 %v1789_v42, %v1787_v56 }
 0x3ed   :  { %2095 = vmatmul.mubr.bf16.gmra.mrb[68].mxu0 %v1817_v6  ;;  %v1790_v62 = vmul.f32 %v1726_v36, %v4732_v35 }
 0x3ee   :  { %2102 = vmatprep.mubr.bf16.mxu0 %v1820_v0 }
 0x3ef   :  { %v1822_v5 = vpack.c.bf16 %v1790_v62, %v1788_v14  ;;  %v5280_v62 = vld [vmem:[#allocation8_spill] sm:$0xff] }
 0x3f5   :  { %2103 = vmatmul.mubr.bf16.gmra.mrb[72].mxu0 %v1819_v51 }
 0x3f6   :  { %2110 = vmatprep.mubr.bf16.mxu0 %v1822_v5 }
 0x3fd   :  { %2111 = vmatmul.mubr.bf16.gmra.mrb[76].mxu0 %v1821_v58 }
 0x40e   :  { %v2731_v8 = vpop.f32.mrb[16].mxu0 }
 0x40f   :  { %v2732_v44 = vpop.f32.mrb[17].mxu0 }
 0x410   :  { %v2733_v30 = vadd.f32 %v2732_v44, %v2731_v8  ;;  %v2734_v31 = vpop.f32.mrb[18].mxu0  ;;  %v5281_v44 = vld [vmem:[#allocation9_spill] sm:$0xff] }
 0x411   :  { %v2735_v47 = vpop.f32.mrb[19].mxu0 }
 0x412   :  { %v1993_v48 = vadd.f32 %v2733_v30, %v4773_v16  ;;  %v2736_v60 = vadd.f32 %v2735_v47, %v2734_v31 }
 0x414   :  { %v1996_v35 = vadd.f32 %v2736_v60, %v4773_v16  ;;  %v4778_v3 = vadd.f32 %v1993_v48, %v3844_v12 }
 0x416   :  { %2153 = vadd.xlane.f32.xlu0 %v4778_v3  ;;  %v4782_v54 = vadd.f32 %v1996_v35, %v3847_v29 }
 0x418   :  { %2155 = vadd.xlane.f32.xlu1 %v4782_v54 }
 0x419   :  { %v2737_v4 = vpop.f32.mrb[20].mxu0 }
 0x41a   :  { %v2738_v39 = vpop.f32.mrb[21].mxu0 }
 0x41b   :  { %v2739_v28 = vadd.f32 %v2738_v39, %v2737_v4  ;;  %v2740_v52 = vpop.f32.mrb[22].mxu0 }
 0x41c   :  { %v2741_v50 = vpop.f32.mrb[23].mxu0 }
 0x41d   :  { %v2001_v26 = vadd.f32 %v2739_v28, %v4773_v16  ;;  %v2742_v34 = vadd.f32 %v2741_v50, %v2740_v52  ;;  %v5282_v28 = vld [vmem:[#allocation10_spill] sm:$0xff] }
 0x41f   :  { %v2004_v61 = vadd.f32 %v2742_v34, %v4773_v16  ;;  %v4788_v12 = vadd.f32 %v2001_v26, %v3867_v9  ;;  %v5283_v26 = vld [vmem:[#allocation11_spill] sm:$0xff] }
 0x421   :  { %2157 = vadd.xlane.f32.xlu0 %v4788_v12  ;;  %v4792_v29 = vadd.f32 %v2004_v61, %v3870_v27 }
 0x423   :  { %v2743_v45 = vpop.f32.mrb[24].mxu0  ;;  %2159 = vadd.xlane.f32.xlu1 %v4792_v29 }
 0x424   :  { %v2744_v57 = vpop.f32.mrb[25].mxu0 }
 0x425   :  { %v2745_v41 = vadd.f32 %v2744_v57, %v2743_v45  ;;  %v2746_v11 = vpop.f32.mrb[26].mxu0 }
 0x426   :  { %v2747_v19 = vpop.f32.mrb[27].mxu0 }
 0x427   :  { %v2009_v25 = vadd.f32 %v2745_v41, %v4773_v16  ;;  %v2748_v43 = vadd.f32 %v2747_v19, %v2746_v11 }
 0x429   :  { %v2012_v18 = vadd.f32 %v2748_v43, %v4773_v16  ;;  %v4798_v9 = vadd.f32 %v2009_v25, %v3890_v7  ;;  %v5284_v43 = vld [vmem:[#allocation13_spill] sm:$0xff] }
 0x42b   :  { %2161 = vadd.xlane.f32.xlu0 %v4798_v9  ;;  %v4802_v27 = vadd.f32 %v2012_v18, %v3893_v46 }
 0x42d   :  { %2163 = vadd.xlane.f32.xlu1 %v4802_v27 }
 0x42e   :  { %v2749_v15 = vpop.f32.mrb[28].mxu0 }
 0x42f   :  { %v2750_v24 = vpop.f32.mrb[29].mxu0 }
 0x430   :  { %v2751_v23 = vadd.f32 %v2750_v24, %v2749_v15  ;;  %v2752_v10 = vpop.f32.mrb[30].mxu0  ;;  %v5285_v24 = vld [vmem:[#allocation12_spill] sm:$0xff] }
 0x431   :  { %v2753_v38 = vpop.f32.mrb[31].mxu0 }
 0x432   :  { %v2017_v6 = vadd.f32 %v2751_v23, %v4773_v16  ;;  %v2754_v55 = vadd.f32 %v2753_v38, %v2752_v10 }
 0x434   :  { %v2020_v40 = vadd.f32 %v2754_v55, %v4773_v16  ;;  %v4808_v7 = vadd.f32 %v2017_v6, %v3913_v59 }
 0x436   :  { %2165 = vadd.xlane.f32.xlu0 %v4808_v7  ;;  %v4812_v46 = vadd.f32 %v2020_v40, %v5277_v32 }
 0x438   :  { %v2755_v2 = vpop.f32.mrb[32].mxu0  ;;  %2167 = vadd.xlane.f32.xlu1 %v4812_v46 }
 0x439   :  { %v2756_v33 = vpop.f32.mrb[33].mxu0 }
 0x43a   :  { %v2757_v22 = vadd.f32 %v2756_v33, %v2755_v2  ;;  %v2758_v1 = vpop.f32.mrb[34].mxu0  ;;  %v5286_v33 = vld [vmem:[#allocation15_spill] sm:$0xff] }
 0x43b   :  { %v2759_v63 = vpop.f32.mrb[35].mxu0 }
 0x43c   :  { %v2025_v13 = vadd.f32 %v2757_v22, %v4773_v16  ;;  %v2760_v49 = vadd.f32 %v2759_v63, %v2758_v1  ;;  %v5287_v63 = vld [vmem:[#allocation14_spill] sm:$0xff] }
 0x43e   :  { %v2028_v0 = vadd.f32 %v2760_v49, %v4773_v16  ;;  %v4818_v59 = vadd.f32 %v2025_v13, %v5278_v20 }
 0x440   :  { %2169 = vadd.xlane.f32.xlu0 %v4818_v59  ;;  %v4822_v51 = vadd.f32 %v2028_v0, %v5279_v53 }
 0x442   :  { %2171 = vadd.xlane.f32.xlu1 %v4822_v51  ;;  %v2761_v21 = vpop.f32.mrb[36].mxu0 }
 0x443   :  { %v2762_v17 = vpop.f32.mrb[37].mxu0 }
 0x444   :  { %v2763_v37 = vadd.f32 %v2762_v17, %v2761_v21  ;;  %v2764_v56 = vpop.f32.mrb[38].mxu0 }
 0x445   :  { %v2765_v42 = vpop.f32.mrb[39].mxu0 }
 0x446   :  { %v2033_v36 = vadd.f32 %v2763_v37, %v4773_v16  ;;  %v2766_v58 = vadd.f32 %v2765_v42, %v2764_v56  ;;  %v5288_v56 = vld [vmem:[#allocation17_spill] sm:$0xff] }
 0x448   :  { %v2036_v14 = vadd.f32 %v2766_v58, %v4773_v16  ;;  %v4828_v5 = vadd.f32 %v2033_v36, %v5280_v62  ;;  %v5289_v36 = vld [vmem:[#allocation16_spill] sm:$0xff] }
 0x44a   :  { %2173 = vadd.xlane.f32.xlu0 %v4828_v5  ;;  %v2767_v8 = vpop.f32.mrb[40].mxu0  ;;  %v4832_v30 = vadd.f32 %v2036_v14, %v5281_v44 }
 0x44b   :  { %v2768_v31 = vpop.f32.mrb[41].mxu0 }
 0x44c   :  { %v2769_v47 = vadd.f32 %v2768_v31, %v2767_v8  ;;  %2175 = vadd.xlane.f32.xlu1 %v4832_v30  ;;  %v2770_v48 = vpop.f32.mrb[42].mxu0 }
 0x44d   :  { %v2771_v60 = vpop.f32.mrb[43].mxu0 }
 0x44e   :  { %v2041_v35 = vadd.f32 %v2769_v47, %v4773_v16  ;;  %v2772_v4 = vadd.f32 %v2771_v60, %v2770_v48 }
 0x450   :  { %v2044_v39 = vadd.f32 %v2772_v4, %v4773_v16  ;;  %v4838_v52 = vadd.f32 %v2041_v35, %v5282_v28  ;;  %v5290_v35 = vld [vmem:[#allocation18_spill] sm:$0xff] }
 0x452   :  { %2177 = vadd.xlane.f32.xlu0 %v4838_v52  ;;  %v2773_v50 = vpop.f32.mrb[44].mxu0  ;;  %v4842_v34 = vadd.f32 %v2044_v39, %v5283_v26  ;;  %v5291_v39 = vld [vmem:[#allocation19_spill] sm:$0xff] }
 0x453   :  { %v2774_v61 = vpop.f32.mrb[45].mxu0 }
 0x454   :  { %v2775_v45 = vadd.f32 %v2774_v61, %v2773_v50  ;;  %2179 = vadd.xlane.f32.xlu1 %v4842_v34  ;;  %v2776_v57 = vpop.f32.mrb[46].mxu0 }
 0x455   :  { %v2777_v41 = vpop.f32.mrb[47].mxu0 }
 0x456   :  { %v2049_v11 = vadd.f32 %v2775_v45, %v4773_v16  ;;  %v2778_v19 = vadd.f32 %v2777_v41, %v2776_v57 }
 0x458   :  { %v2052_v25 = vadd.f32 %v2778_v19, %v4773_v16  ;;  %v4848_v18 = vadd.f32 %v2049_v11, %v5284_v43 }
 0x45a   :  { %2181 = vadd.xlane.f32.xlu0 %v4848_v18  ;;  %v2779_v15 = vpop.f32.mrb[48].mxu0  ;;  %v4852_v23 = vadd.f32 %v2052_v25, %v5285_v24  ;;  %v5292_v25 = vld [vmem:[#allocation20_spill] sm:$0xff]  ;;  %v5293_v24 = vld [vmem:[#allocation21_spill] sm:$0xff] }
 0x45b   :  { %v2780_v10 = vpop.f32.mrb[49].mxu0 }
 0x45c   :  { %v2781_v38 = vadd.f32 %v2780_v10, %v2779_v15  ;;  %2183 = vadd.xlane.f32.xlu1 %v4852_v23  ;;  %v2782_v6 = vpop.f32.mrb[50].mxu0 }
 0x45d   :  { %v2783_v55 = vpop.f32.mrb[51].mxu0 }
 0x45e   :  { %v2057_v40 = vadd.f32 %v2781_v38, %v4773_v16  ;;  %v2784_v32 = vadd.f32 %v2783_v55, %v2782_v6 }
 0x460   :  { %v2060_v2 = vadd.f32 %v2784_v32, %v4773_v16  ;;  %v4858_v22 = vadd.f32 %v2057_v40, %v5286_v33 }
 0x462   :  { %2185 = vadd.xlane.f32.xlu0 %v4858_v22  ;;  %v2785_v1 = vpop.f32.mrb[52].mxu0  ;;  %v4862_v13 = vadd.f32 %v2060_v2, %v5287_v63 }
 0x463   :  { %v2786_v49 = vpop.f32.mrb[53].mxu0 }
 0x464   :  { %v2787_v0 = vadd.f32 %v2786_v49, %v2785_v1  ;;  %2187 = vadd.xlane.f32.xlu1 %v4862_v13  ;;  %v2788_v20 = vpop.f32.mrb[54].mxu0  ;;  %v5294_v1 = vld [vmem:[#allocation22_spill] sm:$0xff] }
 0x465   :  { %v2789_v53 = vpop.f32.mrb[55].mxu0 }
 0x466   :  { %v2065_v21 = vadd.f32 %v2787_v0, %v4773_v16  ;;  %v2790_v17 = vadd.f32 %v2789_v53, %v2788_v20  ;;  %v5295_v0 = vld [vmem:[#allocation23_spill] sm:$0xff] }
 0x468   :  { %v2068_v37 = vadd.f32 %v2790_v17, %v4773_v16  ;;  %v4868_v42 = vadd.f32 %v2065_v21, %v5288_v56 }
 0x46a   :  { %2189 = vadd.xlane.f32.xlu0 %v4868_v42  ;;  %v4872_v58 = vadd.f32 %v2068_v37, %v5289_v36 }
 0x46c   :  { %2191 = vadd.xlane.f32.xlu1 %v4872_v58 }
 0x4a5   :  { %v2791_v14 = vpop.f32.mrb[56].mxu0 }
 0x4a6   :  { %v2792_v62 = vpop.f32.mrb[57].mxu0 }
 0x4a7   :  { %v2793_v8 = vadd.f32 %v2792_v62, %v2791_v14  ;;  %v2794_v44 = vpop.f32.mrb[58].mxu0  ;;  %v5296_v62 = vld [vmem:[#allocation24_spill] sm:$0xff] }
 0x4a8   :  { %v2795_v31 = vpop.f32.mrb[59].mxu0 }
 0x4a9   :  { %v2073_v47 = vadd.f32 %v2793_v8, %v4773_v16  ;;  %v2796_v48 = vadd.f32 %v2795_v31, %v2794_v44  ;;  %v5297_v31 = vld [vmem:[#allocation25_spill] sm:$0xff] }
 0x4ab   :  { %v2076_v60 = vadd.f32 %v2796_v48, %v4773_v16  ;;  %v4878_v4 = vadd.f32 %v2073_v47, %v5290_v35 }
 0x4ad   :  { %2193 = vadd.xlane.f32.xlu0 %v4878_v4  ;;  %v4882_v28 = vadd.f32 %v2076_v60, %v5291_v39 }
 0x4af   :  { %2195 = vadd.xlane.f32.xlu1 %v4882_v28 }
 0x4b0   :  { %v2797_v50 = vpop.f32.mrb[60].mxu0 }
 0x4b1   :  { %v2798_v26 = vpop.f32.mrb[61].mxu0 }
 0x4b2   :  { %v2799_v61 = vadd.f32 %v2798_v26, %v2797_v50  ;;  %v2800_v45 = vpop.f32.mrb[62].mxu0 }
 0x4b3   :  { %v2801_v57 = vpop.f32.mrb[63].mxu0 }
 0x4b4   :  { %v2081_v41 = vadd.f32 %v2799_v61, %v4773_v16  ;;  %v2802_v11 = vadd.f32 %v2801_v57, %v2800_v45  ;;  %v5298_v45 = vld [vmem:[#allocation26_spill] sm:$0xff] }
 0x4b6   :  { %v2084_v19 = vadd.f32 %v2802_v11, %v4773_v16  ;;  %v4888_v43 = vadd.f32 %v2081_v41, %v5292_v25  ;;  %v2154_v41 = vpop.xlane.xlu0 %2153 }
 0x4b8   :  { %2197 = vadd.xlane.f32.xlu0 %v4888_v43  ;;  %v2803_v15 = vpop.f32.mrb[64].mxu0  ;;  %v4892_v10 = vadd.f32 %v2084_v19, %v5293_v24  ;;  %v5299_v19 = vld [vmem:[#allocation27_spill] sm:$0xff] }
 0x4b9   :  { %v2804_v38 = vpop.f32.mrb[65].mxu0 }
 0x4ba   :  { %v2805_v6 = vadd.f32 %v2804_v38, %v2803_v15  ;;  %2199 = vadd.xlane.f32.xlu1 %v4892_v10  ;;  %v2806_v55 = vpop.f32.mrb[66].mxu0  ;;  %v2156_v15 = vpop.xlane.xlu1 %2155  ;;  %v2217_v38 = vmul.f32 0.0078125, %v2154_v41 }
 0x4bb   :  { %v2807_v40 = vpop.f32.mrb[67].mxu0 }
 0x4bc   :  { %v2089_v32 = vadd.f32 %v2805_v6, %v4773_v16  ;;  %v2808_v2 = vadd.f32 %v2807_v40, %v2806_v55  ;;  %v2158_v40 = vpop.xlane.xlu0 %2157 }
 0x4be   :  { %v2092_v33 = vadd.f32 %v2808_v2, %v4773_v16  ;;  %v4898_v63 = vadd.f32 %v2089_v32, %v5294_v1  ;;  %v2218_v2 = vmul.f32 0.0078125, %v2156_v15 }
 0x4c0   :  { %2201 = vadd.xlane.f32.xlu0 %v4898_v63  ;;  %v2809_v49 = vpop.f32.mrb[68].mxu0  ;;  %v4902_v20 = vadd.f32 %v2092_v33, %v5295_v0  ;;  %v4927_v0 = vsub.f32 %v4778_v3, %v2217_v38 }
 0x4c1   :  { %v2810_v53 = vpop.f32.mrb[69].mxu0 }
 0x4c2   :  { %v2811_v21 = vadd.f32 %v2810_v53, %v2809_v49  ;;  %2203 = vadd.xlane.f32.xlu1 %v4902_v20  ;;  %v2812_v17 = vpop.f32.mrb[70].mxu0  ;;  %v2160_v49 = vpop.xlane.xlu1 %2159  ;;  %v2219_v53 = vmul.f32 0.0078125, %v2158_v40 }
 0x4c3   :  { %v2813_v37 = vpop.f32.mrb[71].mxu0 }
 0x4c4   :  { %v2097_v56 = vadd.f32 %v2811_v21, %v4773_v16  ;;  %v2814_v36 = vadd.f32 %v2813_v37, %v2812_v17  ;;  %v5300_v17 = vld [vmem:[#allocation28_spill] sm:$0xff]  ;;  %v4941_v3 = vsub.f32 %v4788_v12, %v2219_v53 }
 0x4c6   :  { %v2100_v14 = vadd.f32 %v2814_v36, %v4773_v16  ;;  %v4908_v8 = vadd.f32 %v2097_v56, %v5296_v62  ;;  %v2162_v56 = vpop.xlane.xlu0 %2161  ;;  %v4934_v36 = vsub.f32 %v4782_v54, %v2218_v2  ;;  %v5301_v62 = vld [vmem:[#allocation29_spill] sm:$0xff] }
 0x4c8   :  { %2205 = vadd.xlane.f32.xlu0 %v4908_v8  ;;  %v2815_v44 = vpop.f32.mrb[72].mxu0  ;;  %v4912_v47 = vadd.f32 %v2100_v14, %v5297_v31  ;;  %v2220_v14 = vmul.f32 0.0078125, %v2160_v49  ;;  %v2164_v31 = vpop.xlane.xlu1 %2163 }
 0x4c9   :  { %v2816_v48 = vpop.f32.mrb[73].mxu0 }
 0x4ca   :  { %v2817_v60 = vadd.f32 %v2816_v48, %v2815_v44  ;;  %2207 = vadd.xlane.f32.xlu1 %v4912_v47  ;;  %v2818_v35 = vpop.f32.mrb[74].mxu0  ;;  %v2221_v48 = vmul.f32 0.0078125, %v2162_v56  ;;  %v4947_v54 = vsub.f32 %v4792_v29, %v2220_v14 }
 0x4cb   :  { %v2819_v39 = vpop.f32.mrb[75].mxu0 }
 0x4cc   :  { %v2105_v50 = vadd.f32 %v2817_v60, %v4773_v16  ;;  %v2820_v26 = vadd.f32 %v2819_v39, %v2818_v35  ;;  %v2166_v60 = vpop.xlane.xlu0 %2165  ;;  %v2222_v35 = vmul.f32 0.0078125, %v2164_v31  ;;  %v2282_v39 = vmul.f32 %v4934_v36, %v4934_v36 }
 0x4cd   :  { %v2223_v12 = vmul.f32 0.0078125, %v2166_v60 }
 0x4ce   :  { %v2108_v61 = vadd.f32 %v2820_v26, %v4773_v16  ;;  %v4918_v57 = vadd.f32 %v2105_v50, %v5298_v45  ;;  %v2168_v50 = vpop.xlane.xlu1 %2167  ;;  %v4952_v26 = vsub.f32 %v4798_v9, %v2221_v48  ;;  %v4957_v41 = vsub.f32 %v4802_v27, %v2222_v35 }
 0x4cf   :  { %v2224_v29 = vmul.f32 0.0078125, %v2168_v50  ;;  %v4962_v15 = vsub.f32 %v4808_v7, %v2223_v12 }
 0x4d0   :  { %2209 = vadd.xlane.f32.xlu0 %v4918_v57  ;;  %v2821_v11 = vpop.f32.mrb[76].mxu0  ;;  %v4922_v25 = vadd.f32 %v2108_v61, %v5299_v19  ;;  %v2283_v61 = vmul.f32 %v4941_v3, %v4941_v3  ;;  %v2170_v45 = vpop.xlane.xlu0 %2169 }
 0x4d1   :  { %v2822_v24 = vpop.f32.mrb[77].mxu0  ;;  %v2225_v9 = vmul.f32 0.0078125, %v2170_v45  ;;  %v2287_v2 = vmul.f32 %v4962_v15, %v4962_v15 }
 0x4d2   :  { %v2823_v6 = vadd.f32 %v2822_v24, %v2821_v11  ;;  %2211 = vadd.xlane.f32.xlu1 %v4922_v25  ;;  %v2824_v55 = vpop.f32.mrb[78].mxu0  ;;  %v2284_v11 = vmul.f32 %v4947_v54, %v4947_v54  ;;  %v2172_v19 = vpop.xlane.xlu1 %2171  ;;  %v2285_v24 = vmul.f32 %v4952_v26, %v4952_v26 }
 0x4d3   :  { %v2825_v32 = vpop.f32.mrb[79].mxu0  ;;  %v2226_v27 = vmul.f32 0.0078125, %v2172_v19 }
 0x4d4   :  { %v2113_v33 = vadd.f32 %v2823_v6, %v4773_v16  ;;  %v2826_v1 = vadd.f32 %v2825_v32, %v2824_v55  ;;  %v4967_v6 = vsub.f32 %v4812_v46, %v2224_v29  ;;  %v2286_v55 = vmul.f32 %v4957_v41, %v4957_v41 }
 0x4d5   :  { %v4972_v32 = vsub.f32 %v4818_v59, %v2225_v9 }
 0x4d6   :  { %v2116_v21 = vadd.f32 %v2826_v1, %v4773_v16  ;;  %v4931_v37 = vadd.f32 %v2113_v33, %v5300_v17  ;;  %v2281_v16 = vmul.f32 %v4927_v0, %v4927_v0  ;;  %v4977_v1 = vsub.f32 %v4822_v51, %v2226_v27 }
 0x4d7   :  { %v2174_v38 = vpop.xlane.xlu0 %2173  ;;  %v2288_v49 = vmul.f32 %v4967_v6, %v4967_v6  ;;  %v2289_v17 = vmul.f32 %v4972_v32, %v4972_v32 }
 0x4d8   :  { %2213 = vadd.xlane.f32.xlu0 %v4931_v37  ;;  %v4938_v44 = vadd.f32 %v2116_v21, %v5301_v62  ;;  %v2227_v7 = vmul.f32 0.0078125, %v2174_v38  ;;  %v2290_v62 = vmul.f32 %v4977_v1, %v4977_v1 }
 0x4d9   :  { %v2176_v40 = vpop.xlane.xlu1 %2175 }
 0x4da   :  { %2215 = vadd.xlane.f32.xlu1 %v4938_v44  ;;  %v2228_v46 = vmul.f32 0.0078125, %v2176_v40  ;;  %v4982_v21 = vsub.f32 %v4828_v5, %v2227_v7 }
 0x4dc   :  { %2313 = vadd.xlane.f32.xlu0 %v2281_v16  ;;  %v4987_v14 = vsub.f32 %v4832_v30, %v2228_v46  ;;  %v2291_v16 = vmul.f32 %v4982_v21, %v4982_v21 }
 0x4de   :  { %2315 = vadd.xlane.f32.xlu1 %v2282_v39  ;;  %v2292_v39 = vmul.f32 %v4987_v14, %v4987_v14 }
 0x4df   :  { %v2178_v33 = vpop.xlane.xlu0 %2177 }
 0x4e0   :  { %2317 = vadd.xlane.f32.xlu0 %v2283_v61  ;;  %v2229_v59 = vmul.f32 0.0078125, %v2178_v33 }
 0x4e1   :  { %v2180_v53 = vpop.xlane.xlu1 %2179 }
 0x4e2   :  { %2319 = vadd.xlane.f32.xlu1 %v2284_v11  ;;  %v2230_v51 = vmul.f32 0.0078125, %v2180_v53  ;;  %v4992_v48 = vsub.f32 %v4838_v52, %v2229_v59 }
 0x4e4   :  { %2321 = vadd.xlane.f32.xlu0 %v2285_v24  ;;  %v4997_v35 = vsub.f32 %v4842_v34, %v2230_v51  ;;  %v2293_v61 = vmul.f32 %v4992_v48, %v4992_v48 }
 0x4e6   :  { %2323 = vadd.xlane.f32.xlu1 %v2286_v55  ;;  %v2294_v34 = vmul.f32 %v4997_v35, %v4997_v35 }
 0x4e7   :  { %v2182_v56 = vpop.xlane.xlu0 %2181 }
 0x4e8   :  { %2325 = vadd.xlane.f32.xlu0 %v2287_v2  ;;  %v2231_v5 = vmul.f32 0.0078125, %v2182_v56 }
 0x4e9   :  { %v2184_v31 = vpop.xlane.xlu1 %2183 }
 0x4ea   :  { %2327 = vadd.xlane.f32.xlu1 %v2288_v49  ;;  %v2232_v30 = vmul.f32 0.0078125, %v2184_v31  ;;  %v5002_v12 = vsub.f32 %v4848_v18, %v2231_v5 }
 0x4ec   :  { %2329 = vadd.xlane.f32.xlu0 %v2289_v17  ;;  %v5007_v45 = vsub.f32 %v4852_v23, %v2232_v30  ;;  %v2295_v18 = vmul.f32 %v5002_v12, %v5002_v12 }
 0x4ee   :  { %2331 = vadd.xlane.f32.xlu1 %v2290_v62  ;;  %v2296_v23 = vmul.f32 %v5007_v45, %v5007_v45 }
 0x4ef   :  { %v2186_v60 = vpop.xlane.xlu0 %2185 }
 0x4f0   :  { %2333 = vadd.xlane.f32.xlu0 %v2291_v16  ;;  %v2233_v52 = vmul.f32 0.0078125, %v2186_v60 }
 0x4f1   :  { %v2188_v50 = vpop.xlane.xlu1 %2187 }
 0x4f2   :  { %2335 = vadd.xlane.f32.xlu1 %v2292_v39  ;;  %v2234_v29 = vmul.f32 0.0078125, %v2188_v50  ;;  %v5012_v11 = vsub.f32 %v4858_v22, %v2233_v52 }
 0x4f4   :  { %2337 = vadd.xlane.f32.xlu0 %v2293_v61  ;;  %v5017_v9 = vsub.f32 %v4862_v13, %v2234_v29  ;;  %v2297_v22 = vmul.f32 %v5012_v11, %v5012_v11 }
 0x4f6   :  { %2339 = vadd.xlane.f32.xlu1 %v2294_v34  ;;  %v2298_v13 = vmul.f32 %v5017_v9, %v5017_v9 }
 0x4f7   :  { %v2190_v19 = vpop.xlane.xlu0 %2189 }
 0x4f8   :  { %v2235_v24 = vmul.f32 0.0078125, %v2190_v19  ;;  %2341 = vadd.xlane.f32.xlu0 %v2295_v18 }
 0x4f9   :  { %v2192_v38 = vpop.xlane.xlu1 %2191 }
 0x4fa   :  { %v5022_v27 = vsub.f32 %v4868_v42, %v2235_v24  ;;  %v2236_v55 = vmul.f32 0.0078125, %v2192_v38  ;;  %2343 = vadd.xlane.f32.xlu1 %v2296_v23 }
 0x4fc   :  { %v5027_v40 = vsub.f32 %v4872_v58, %v2236_v55  ;;  %2345 = vadd.xlane.f32.xlu0 %v2297_v22  ;;  %v2299_v7 = vmul.f32 %v5022_v27, %v5022_v27 }
 0x4fe   :  { %2347 = vadd.xlane.f32.xlu1 %v2298_v13  ;;  %v2300_v42 = vmul.f32 %v5027_v40, %v5027_v40 }
 0x500   :  { %2349 = vadd.xlane.f32.xlu0 %v2299_v7 }
 0x502   :  { %2351 = vadd.xlane.f32.xlu1 %v2300_v42 }
 0x53a   :  { %v2194_v2 = vpop.xlane.xlu0 %2193 }
 0x53b   :  { %v2237_v33 = vmul.f32 0.0078125, %v2194_v2 }
 0x53c   :  { %v2196_v46 = vpop.xlane.xlu1 %2195 }
 0x53d   :  { %v5036_v49 = vsub.f32 %v4878_v4, %v2237_v33  ;;  %v2238_v58 = vmul.f32 0.0078125, %v2196_v46 }
 0x53f   :  { %v5039_v53 = vsub.f32 %v4882_v28, %v2238_v58  ;;  %v2301_v59 = vmul.f32 %v5036_v49, %v5036_v49 }
 0x541   :  { %2353 = vadd.xlane.f32.xlu0 %v2301_v59  ;;  %v2302_v17 = vmul.f32 %v5039_v53, %v5039_v53 }
 0x543   :  { %2355 = vadd.xlane.f32.xlu1 %v2302_v17 }
 0x545   :  { %v2198_v56 = vpop.xlane.xlu0 %2197 }
 0x546   :  { %v2239_v51 = vmul.f32 0.0078125, %v2198_v56 }
 0x547   :  { %v2200_v62 = vpop.xlane.xlu1 %2199 }
 0x548   :  { %v5046_v31 = vsub.f32 %v4888_v43, %v2239_v51  ;;  %v2240_v4 = vmul.f32 0.0078125, %v2200_v62 }
 0x54a   :  { %v5049_v5 = vsub.f32 %v4892_v10, %v2240_v4  ;;  %v2303_v28 = vmul.f32 %v5046_v31, %v5046_v31 }
 0x54c   :  { %2357 = vadd.xlane.f32.xlu0 %v2303_v28  ;;  %v2304_v16 = vmul.f32 %v5049_v5, %v5049_v5 }
 0x54d   :  { %v2202_v60 = vpop.xlane.xlu0 %2201 }
 0x54e   :  { %v2241_v30 = vmul.f32 0.0078125, %v2202_v60  ;;  %2359 = vadd.xlane.f32.xlu1 %v2304_v16 }
 0x54f   :  { %v2204_v39 = vpop.xlane.xlu1 %2203 }
 0x550   :  { %v5056_v50 = vsub.f32 %v4898_v63, %v2241_v30  ;;  %v2242_v43 = vmul.f32 0.0078125, %v2204_v39 }
 0x552   :  { %v5059_v52 = vsub.f32 %v4902_v20, %v2242_v43  ;;  %v2305_v10 = vmul.f32 %v5056_v50, %v5056_v50 }
 0x554   :  { %2361 = vadd.xlane.f32.xlu0 %v2305_v10  ;;  %v2306_v61 = vmul.f32 %v5059_v52, %v5059_v52 }
 0x555   :  { %v2206_v29 = vpop.xlane.xlu0 %2205 }
 0x556   :  { %v2243_v34 = vmul.f32 0.0078125, %v2206_v29  ;;  %2363 = vadd.xlane.f32.xlu1 %v2306_v61 }
 0x557   :  { %v2208_v18 = vpop.xlane.xlu1 %2207 }
 0x558   :  { %v5066_v19 = vsub.f32 %v4908_v8, %v2243_v34  ;;  %v2244_v63 = vmul.f32 0.0078125, %v2208_v18 }
 0x55a   :  { %v5069_v24 = vsub.f32 %v4912_v47, %v2244_v63  ;;  %v2307_v20 = vmul.f32 %v5066_v19, %v5066_v19 }
 0x55c   :  { %2365 = vadd.xlane.f32.xlu0 %v2307_v20  ;;  %v2308_v23 = vmul.f32 %v5069_v24, %v5069_v24 }
 0x55d   :  { %v2210_v38 = vpop.xlane.xlu0 %2209 }
 0x55e   :  { %v2245_v55 = vmul.f32 0.0078125, %v2210_v38  ;;  %2367 = vadd.xlane.f32.xlu1 %v2308_v23 }
 0x55f   :  { %v2212_v22 = vpop.xlane.xlu1 %2211 }
 0x560   :  { %v5076_v13 = vsub.f32 %v4918_v57, %v2245_v55  ;;  %v2246_v8 = vmul.f32 0.0078125, %v2212_v22  ;;  %v5098_v22 = vld [vmem:[%s5223_s10] ss:$0 sm:$0xff]  ;;  %s3240_s10 = smov [#allocation2]  }
 0x562   :  { %v5079_v7 = vsub.f32 %v4922_v25, %v2246_v8  ;;  %v2309_v47 = vmul.f32 %v5076_v13, %v5076_v13 }
 0x564   :  { %2369 = vadd.xlane.f32.xlu0 %v2309_v47  ;;  %v2310_v42 = vmul.f32 %v5079_v7, %v5079_v7 }
 0x565   :  { %v2214_v2 = vpop.xlane.xlu0 %2213 }
 0x566   :  { %v2247_v33 = vmul.f32 0.0078125, %v2214_v2  ;;  %2371 = vadd.xlane.f32.xlu1 %v2310_v42 }
 0x567   :  { %v2216_v46 = vpop.xlane.xlu1 %2215 }
 0x568   :  { %v5086_v58 = vsub.f32 %v4931_v37, %v2247_v33  ;;  %v2248_v57 = vmul.f32 0.0078125, %v2216_v46  ;;  %v5104_v46 = vld [vmem:[%s5224_s11] ss:$0 sm:$0xff]  ;;  %s2618_s11 = sshll.u32 %s3240_s10, 4  ;;  %s2619_s11 = int_to_ptr.vmem [resolvable:$true] %s2618_s11 }
 0x569   :  { %v2314_v59 = vpop.xlane.xlu0 %2313  ;;  %s3215_s18 = scalar_lea.vmem %s2619_s11, 4096  ;;  %p3220_p1 = scmp.lt.s32.totalorder %s2619_s11, %s2619_s11 }
 0x56a   :  { %v5089_v17 = vsub.f32 %v4938_v44, %v2248_v57  ;;  %v2377_v25 = vmul.f32 0.0078125, %v2314_v59  ;;  %v2311_v56 = vmul.f32 %v5086_v58, %v5086_v58  ;;  %p3216_p0 = scmp.ne.s32.totalorder %s2619_s11, %s3215_s18  ;;  %p3221_p2 = scmp.lt.s32.totalorder %s3215_s18, %s3215_s18 }
 0x56b   :  { %v2316_v51 = vpop.xlane.xlu1 %2315 }
 0x56c   :  { %v2409_v62 = vadd.f32 1e-05, %v2377_v25  ;;  %v2378_v4 = vmul.f32 0.0078125, %v2316_v51  ;;  %2373 = vadd.xlane.f32.xlu0 %v2311_v56  ;;  %v2312_v28 = vmul.f32 %v5089_v17, %v5089_v17  ;;  %p3222_p3 = por %p3221_p2, %p3220_p1 }
 0x56d   :  { %v2318_v16 = vpop.xlane.xlu0 %2317 }
 0x56e   :  { %3151 = vrsqrt.f32 %v2409_v62  ;;  %v2410_v37 = vadd.f32 1e-05, %v2378_v4  ;;  %v2379_v60 = vmul.f32 0.0078125, %v2318_v16  ;;  %2375 = vadd.xlane.f32.xlu1 %v2312_v28  ;;  %p3223_p4 = pnand %p3222_p3, %p3216_p0 }
 0x56f   :  { %v2320_v30 = vpop.xlane.xlu1 %2319 }
 0x570   :  { %3153 = vrsqrt.f32 %v2410_v37  ;;  %v2411_v44 = vadd.f32 1e-05, %v2379_v60  ;;  %v2380_v39 = vmul.f32 0.0078125, %v2320_v30 }
 0x571   :  { %v2322_v43 = vpop.xlane.xlu0 %2321 }
 0x572   :  { %3155 = vrsqrt.f32 %v2411_v44  ;;  %v2412_v10 = vadd.f32 1e-05, %v2380_v39  ;;  %v2381_v61 = vmul.f32 0.0078125, %v2322_v43 }
 0x573   :  { %v2324_v29 = vpop.xlane.xlu1 %2323 }
 0x574   :  { %3157 = vrsqrt.f32 %v2412_v10  ;;  %v2413_v34 = vadd.f32 1e-05, %v2381_v61  ;;  %v2382_v18 = vmul.f32 0.0078125, %v2324_v29 }
 0x575   :  { %v2326_v63 = vpop.xlane.xlu0 %2325 }
 0x576   :  { %3159 = vrsqrt.f32 %v2413_v34  ;;  %v2414_v20 = vadd.f32 1e-05, %v2382_v18  ;;  %v2383_v23 = vmul.f32 0.0078125, %v2326_v63 }
 0x577   :  { %v2328_v38 = vpop.xlane.xlu1 %2327 }
 0x578   :  { %v3152_v55 = vpop.eup %3151  ;;  %3161 = vrsqrt.f32 %v2414_v20  ;;  %v2415_v8 = vadd.f32 1e-05, %v2383_v23  ;;  %v2384_v47 = vmul.f32 0.0078125, %v2328_v38 }
 0x579   :  { %v2473_v42 = vmul.f32 %v3152_v55, %v4927_v0  ;;  %v2330_v2 = vpop.xlane.xlu0 %2329 }
 0x57a   :  { %v3154_v33 = vpop.eup %3153  ;;  %3163 = vrsqrt.f32 %v2415_v8  ;;  %v2416_v57 = vadd.f32 1e-05, %v2384_v47  ;;  %v2385_v59 = vmul.f32 0.0078125, %v2330_v2 }
 0x57b   :  { %v2511_v25 = vmul.f32 %v5098_v22, %v2473_v42  ;;  %v2474_v56 = vmul.f32 %v3154_v33, %v4934_v36  ;;  %v2332_v51 = vpop.xlane.xlu1 %2331 }
 0x57c   :  { %v3156_v62 = vpop.eup %3155  ;;  %3165 = vrsqrt.f32 %v2416_v57  ;;  %v2417_v4 = vadd.f32 1e-05, %v2385_v59  ;;  %v2386_v28 = vmul.f32 0.0078125, %v2332_v51 }
 0x57d   :  { %v2549_v0 = vadd.f32 %v5104_v46, %v2511_v25  ;;  %v2512_v16 = vmul.f32 %v5098_v22, %v2474_v56  ;;  %v2475_v37 = vmul.f32 %v3156_v62, %v4941_v3  ;;  %v2334_v60 = vpop.xlane.xlu0 %2333 }
 0x57e   :  { %v3158_v30 = vpop.eup %3157  ;;  %3167 = vrsqrt.f32 %v2417_v4  ;;  %v2418_v44 = vadd.f32 1e-05, %v2386_v28  ;;  %v2387_v39 = vmul.f32 0.0078125, %v2334_v60 }
 0x57f   :  { %2581 = vst [vmem:[#allocation2] sm:$0xff] %v2549_v0  ;;  %v2550_v43 = vadd.f32 %v5104_v46, %v2512_v16  ;;  %v2513_v36 = vmul.f32 %v5098_v22, %v2475_v37  ;;  %v2476_v10 = vmul.f32 %v3158_v30, %v4947_v54  ;;  %v2336_v61 = vpop.xlane.xlu1 %2335 }
 0x580   :  { %v3160_v29 = vpop.eup %3159  ;;  %3169 = vrsqrt.f32 %v2418_v44  ;;  %v2419_v34 = vadd.f32 1e-05, %v2387_v39  ;;  %v2388_v18 = vmul.f32 0.0078125, %v2336_v61 }
 0x581   :  { %2582 = vst [vmem:[#allocation2 + $0x8] sm:$0xff] %v2550_v43  ;;  %v2551_v3 = vadd.f32 %v5104_v46, %v2513_v36  ;;  %v2514_v63 = vmul.f32 %v5098_v22, %v2476_v10  ;;  %v2477_v20 = vmul.f32 %v3160_v29, %v4952_v26  ;;  %v2338_v23 = vpop.xlane.xlu0 %2337 }
 0x582   :  { %v3162_v38 = vpop.eup %3161  ;;  %3171 = vrsqrt.f32 %v2419_v34  ;;  %v2420_v55 = vadd.f32 1e-05, %v2388_v18  ;;  %v2389_v8 = vmul.f32 0.0078125, %v2338_v23 }
 0x583   :  { %2583 = vst [vmem:[#allocation2 + $0x10] sm:$0xff] %v2551_v3  ;;  %v2552_v54 = vadd.f32 %v5104_v46, %v2514_v63  ;;  %v2515_v47 = vmul.f32 %v5098_v22, %v2477_v20  ;;  %v2478_v42 = vmul.f32 %v3162_v38, %v4957_v41  ;;  %v2340_v2 = vpop.xlane.xlu1 %2339 }
 0x584   :  { %v3164_v33 = vpop.eup %3163  ;;  %3173 = vrsqrt.f32 %v2420_v55  ;;  %v2421_v57 = vadd.f32 1e-05, %v2389_v8  ;;  %v2390_v59 = vmul.f32 0.0078125, %v2340_v2 }
 0x585   :  { %2584 = vst [vmem:[#allocation2 + $0x18] sm:$0xff] %v2552_v54  ;;  %v2553_v26 = vadd.f32 %v5104_v46, %v2515_v47  ;;  %v2516_v25 = vmul.f32 %v5098_v22, %v2478_v42  ;;  %v2479_v56 = vmul.f32 %v3164_v33, %v4962_v15  ;;  %v2342_v51 = vpop.xlane.xlu0 %2341 }
 0x586   :  { %v3166_v62 = vpop.eup %3165  ;;  %3175 = vrsqrt.f32 %v2421_v57  ;;  %v2422_v4 = vadd.f32 1e-05, %v2390_v59  ;;  %v2391_v28 = vmul.f32 0.0078125, %v2342_v51 }
 0x587   :  { %2585 = vst [vmem:[#allocation2 + $0x20] sm:$0xff] %v2553_v26  ;;  %v2554_v41 = vadd.f32 %v5104_v46, %v2516_v25  ;;  %v2517_v0 = vmul.f32 %v5098_v22, %v2479_v56  ;;  %v2480_v16 = vmul.f32 %v3166_v62, %v4967_v6  ;;  %v2344_v37 = vpop.xlane.xlu1 %2343 }
 0x588   :  { %v3168_v60 = vpop.eup %3167  ;;  %3177 = vrsqrt.f32 %v2422_v4  ;;  %v2423_v30 = vadd.f32 1e-05, %v2391_v28  ;;  %v2392_v44 = vmul.f32 0.0078125, %v2344_v37 }
 0x589   :  { %2586 = vst [vmem:[#allocation2 + $0x28] sm:$0xff] %v2554_v41  ;;  %v2555_v15 = vadd.f32 %v5104_v46, %v2517_v0  ;;  %v2518_v39 = vmul.f32 %v5098_v22, %v2480_v16  ;;  %v2481_v43 = vmul.f32 %v3168_v60, %v4972_v32  ;;  %v2346_v36 = vpop.xlane.xlu0 %2345 }
 0x58a   :  { %v3170_v10 = vpop.eup %3169  ;;  %3179 = vrsqrt.f32 %v2423_v30  ;;  %v2424_v61 = vadd.f32 1e-05, %v2392_v44  ;;  %v2393_v29 = vmul.f32 0.0078125, %v2346_v36 }
 0x58b   :  { %2587 = vst [vmem:[#allocation2 + $0x30] sm:$0xff] %v2555_v15  ;;  %v2556_v6 = vadd.f32 %v5104_v46, %v2518_v39  ;;  %v2519_v34 = vmul.f32 %v5098_v22, %v2481_v43  ;;  %v2482_v18 = vmul.f32 %v3170_v10, %v4977_v1  ;;  %v2348_v3 = vpop.xlane.xlu1 %2347 }
 0x58c   :  { %v3172_v63 = vpop.eup %3171  ;;  %3181 = vrsqrt.f32 %v2424_v61  ;;  %v2425_v20 = vadd.f32 1e-05, %v2393_v29  ;;  %v2394_v23 = vmul.f32 0.0078125, %v2348_v3 }
 0x58d   :  { %2588 = vst [vmem:[#allocation2 + $0x38] sm:$0xff] %v2556_v6  ;;  %v2557_v32 = vadd.f32 %v5104_v46, %v2519_v34  ;;  %v2520_v38 = vmul.f32 %v5098_v22, %v2482_v18  ;;  %v2483_v55 = vmul.f32 %v3172_v63, %v4982_v21  ;;  %v2350_v8 = vpop.xlane.xlu0 %2349 }
 0x58e   :  { %v3174_v54 = vpop.eup %3173  ;;  %3183 = vrsqrt.f32 %v2425_v20  ;;  %v2426_v47 = vadd.f32 1e-05, %v2394_v23  ;;  %v2395_v42 = vmul.f32 0.0078125, %v2350_v8 }
 0x58f   :  { %2589 = vst [vmem:[#allocation2 + $0x40] sm:$0xff] %v2557_v32  ;;  %v2558_v1 = vadd.f32 %v5104_v46, %v2520_v38  ;;  %v2521_v2 = vmul.f32 %v5098_v22, %v2483_v55  ;;  %v2484_v33 = vmul.f32 %v3174_v54, %v4987_v14  ;;  %v2352_v57 = vpop.xlane.xlu1 %2351 }
 0x590   :  { %v3176_v59 = vpop.eup %3175  ;;  %3185 = vrsqrt.f32 %v2426_v47  ;;  %v2427_v26 = vadd.f32 1e-05, %v2395_v42  ;;  %v2396_v25 = vmul.f32 0.0078125, %v2352_v57 }
 0x591   :  { %2590 = vst [vmem:[#allocation2 + $0x48] sm:$0xff] %v2558_v1  ;;  %v2559_v21 = vadd.f32 %v5104_v46, %v2521_v2  ;;  %v2522_v56 = vmul.f32 %v5098_v22, %v2484_v33  ;;  %v2485_v51 = vmul.f32 %v3176_v59, %v4992_v48 }
 0x592   :  { %v3178_v62 = vpop.eup %3177  ;;  %3187 = vrsqrt.f32 %v2427_v26  ;;  %v2428_v4 = vadd.f32 1e-05, %v2396_v25 }
 0x593   :  { %2591 = vst [vmem:[#allocation2 + $0x50] sm:$0xff] %v2559_v21  ;;  %v2560_v28 = vadd.f32 %v5104_v46, %v2522_v56  ;;  %v2523_v14 = vmul.f32 %v5098_v22, %v2485_v51  ;;  %v2486_v41 = vmul.f32 %v3178_v62, %v4997_v35 }
 0x594   :  { %v3180_v0 = vpop.eup %3179  ;;  %3189 = vrsqrt.f32 %v2428_v4 }
 0x595   :  { %2592 = vst [vmem:[#allocation2 + $0x58] sm:$0xff] %v2560_v28  ;;  %v2561_v16 = vadd.f32 %v5104_v46, %v2523_v14  ;;  %v2524_v37 = vmul.f32 %v5098_v22, %v2486_v41  ;;  %v2487_v60 = vmul.f32 %v3180_v0, %v5002_v12 }
 0x596   :  { %v3182_v48 = vpop.eup %3181 }
 0x597   :  { %2593 = vst [vmem:[#allocation2 + $0x60] sm:$0xff] %v2561_v16  ;;  %v2562_v30 = vadd.f32 %v5104_v46, %v2524_v37  ;;  %v2525_v44 = vmul.f32 %v5098_v22, %v2487_v60  ;;  %v2488_v15 = vmul.f32 %v3182_v48, %v5007_v45 }
 0x598   :  { %v3184_v39 = vpop.eup %3183 }
 0x599   :  { %2594 = vst [vmem:[#allocation2 + $0x68] sm:$0xff] %v2562_v30  ;;  %v2563_v35 = vadd.f32 %v5104_v46, %v2525_v44  ;;  %v2526_v43 = vmul.f32 %v5098_v22, %v2488_v15  ;;  %v2489_v36 = vmul.f32 %v3184_v39, %v5012_v11 }
 0x59a   :  { %v3186_v10 = vpop.eup %3185 }
 0x59b   :  { %2595 = vst [vmem:[#allocation2 + $0x70] sm:$0xff] %v2563_v35  ;;  %v2564_v12 = vadd.f32 %v5104_v46, %v2526_v43  ;;  %v2527_v61 = vmul.f32 %v5098_v22, %v2489_v36  ;;  %v2490_v29 = vmul.f32 %v3186_v10, %v5017_v9 }
 0x59c   :  { %v3188_v6 = vpop.eup %3187 }
 0x59d   :  { %2596 = vst [vmem:[#allocation2 + $0x78] sm:$0xff] %v2564_v12  ;;  %v2565_v45 = vadd.f32 %v5104_v46, %v2527_v61  ;;  %v2528_v34 = vmul.f32 %v5098_v22, %v2490_v29  ;;  %v2491_v18 = vmul.f32 %v3188_v6, %v5022_v27 }
 0x59e   :  { %v3190_v3 = vpop.eup %3189 }
 0x59f   :  { %2597 = vst [vmem:[#allocation2 + $0x80] sm:$0xff] %v2565_v45  ;;  %v2566_v11 = vadd.f32 %v5104_v46, %v2528_v34  ;;  %v2529_v63 = vmul.f32 %v5098_v22, %v2491_v18  ;;  %v2492_v20 = vmul.f32 %v3190_v3, %v5027_v40 }
 0x5a1   :  { %2598 = vst [vmem:[#allocation2 + $0x88] sm:$0xff] %v2566_v11  ;;  %v2567_v23 = vadd.f32 %v5104_v46, %v2529_v63  ;;  %v2530_v9 = vmul.f32 %v5098_v22, %v2492_v20 }
 0x5a3   :  { %2599 = vst [vmem:[#allocation2 + $0x90] sm:$0xff] %v2567_v23  ;;  %v2568_v32 = vadd.f32 %v5104_v46, %v2530_v9 }
 0x5a5   :  { %2600 = vst [vmem:[#allocation2 + $0x98] sm:$0xff] %v2568_v32 }
 0x5ce   :  { %v2354_v38 = vpop.xlane.xlu0 %2353 }
 0x5cf   :  { %v2397_v55 = vmul.f32 0.0078125, %v2354_v38 }
 0x5d0   :  { %v2356_v27 = vpop.xlane.xlu1 %2355 }
 0x5d1   :  { %v2429_v8 = vadd.f32 1e-05, %v2397_v55  ;;  %v2398_v54 = vmul.f32 0.0078125, %v2356_v27 }
 0x5d3   :  { %3191 = vrsqrt.f32 %v2429_v8  ;;  %v2430_v47 = vadd.f32 1e-05, %v2398_v54 }
 0x5d5   :  { %3193 = vrsqrt.f32 %v2430_v47 }
 0x5d9   :  { %v2358_v42 = vpop.xlane.xlu0 %2357 }
 0x5da   :  { %v2399_v1 = vmul.f32 0.0078125, %v2358_v42 }
 0x5db   :  { %v2360_v40 = vpop.xlane.xlu1 %2359 }
 0x5dc   :  { %v2431_v2 = vadd.f32 1e-05, %v2399_v1  ;;  %v2400_v33 = vmul.f32 0.0078125, %v2360_v40 }
 0x5dd   :  { %v3192_v57 = vpop.eup %3191 }
 0x5de   :  { %v2493_v59 = vmul.f32 %v3192_v57, %v5036_v49  ;;  %3195 = vrsqrt.f32 %v2431_v2  ;;  %v2432_v26 = vadd.f32 1e-05, %v2400_v33 }
 0x5df   :  { %v3194_v25 = vpop.eup %3193 }
 0x5e0   :  { %v2531_v21 = vmul.f32 %v5098_v22, %v2493_v59  ;;  %v2494_v56 = vmul.f32 %v3194_v25, %v5039_v53  ;;  %3197 = vrsqrt.f32 %v2432_v26 }
 0x5e1   :  { %v2362_v51 = vpop.xlane.xlu0 %2361 }
 0x5e2   :  { %v2569_v62 = vadd.f32 %v5104_v46, %v2531_v21  ;;  %v2532_v4 = vmul.f32 %v5098_v22, %v2494_v56  ;;  %v2401_v28 = vmul.f32 0.0078125, %v2362_v51 }
 0x5e3   :  { %v2364_v14 = vpop.xlane.xlu1 %2363 }
 0x5e4   :  { %2601 = vst [vmem:[#allocation2 + $0xa0] sm:$0xff] %v2569_v62  ;;  %v2570_v41 = vadd.f32 %v5104_v46, %v2532_v4  ;;  %v2433_v0 = vadd.f32 1e-05, %v2401_v28  ;;  %v2402_v49 = vmul.f32 0.0078125, %v2364_v14 }
 0x5e6   :  { %2602 = vst [vmem:[#allocation2 + $0xa8] sm:$0xff] %v2570_v41  ;;  %3199 = vrsqrt.f32 %v2433_v0  ;;  %v2434_v16 = vadd.f32 1e-05, %v2402_v49 }
 0x5e8   :  { %v3196_v37 = vpop.eup %3195  ;;  %3201 = vrsqrt.f32 %v2434_v16 }
 0x5e9   :  { %v2495_v53 = vmul.f32 %v3196_v37, %v5046_v31  ;;  %v2366_v60 = vpop.xlane.xlu0 %2365 }
 0x5ea   :  { %v3198_v48 = vpop.eup %3197  ;;  %v2403_v30 = vmul.f32 0.0078125, %v2366_v60 }
 0x5eb   :  { %v2533_v44 = vmul.f32 %v5098_v22, %v2495_v53  ;;  %v2496_v15 = vmul.f32 %v3198_v48, %v5049_v5  ;;  %v2368_v39 = vpop.xlane.xlu1 %2367 }
 0x5ec   :  { %v2435_v35 = vadd.f32 1e-05, %v2403_v30  ;;  %v2404_v43 = vmul.f32 0.0078125, %v2368_v39 }
 0x5ed   :  { %v2571_v36 = vadd.f32 %v5104_v46, %v2533_v44  ;;  %v2534_v10 = vmul.f32 %v5098_v22, %v2496_v15 }
 0x5ee   :  { %3203 = vrsqrt.f32 %v2435_v35  ;;  %v2436_v12 = vadd.f32 1e-05, %v2404_v43 }
 0x5ef   :  { %2603 = vst [vmem:[#allocation2 + $0xb0] sm:$0xff] %v2571_v36  ;;  %v2572_v61 = vadd.f32 %v5104_v46, %v2534_v10 }
 0x5f0   :  { %v3200_v31 = vpop.eup %3199  ;;  %3205 = vrsqrt.f32 %v2436_v12 }
 0x5f1   :  { %2604 = vst [vmem:[#allocation2 + $0xb8] sm:$0xff] %v2572_v61  ;;  %v2497_v29 = vmul.f32 %v3200_v31, %v5056_v50  ;;  %v2370_v6 = vpop.xlane.xlu0 %2369 }
 0x5f2   :  { %v3202_v45 = vpop.eup %3201  ;;  %v2405_v5 = vmul.f32 0.0078125, %v2370_v6 }
 0x5f3   :  { %v2535_v34 = vmul.f32 %v5098_v22, %v2497_v29  ;;  %v2498_v18 = vmul.f32 %v3202_v45, %v5059_v52  ;;  %v2372_v3 = vpop.xlane.xlu1 %2371 }
 0x5f4   :  { %v2437_v11 = vadd.f32 1e-05, %v2405_v5  ;;  %v2406_v63 = vmul.f32 0.0078125, %v2372_v3 }
 0x5f5   :  { %v2573_v20 = vadd.f32 %v5104_v46, %v2535_v34  ;;  %v2536_v23 = vmul.f32 %v5098_v22, %v2498_v18 }
 0x5f6   :  { %3207 = vrsqrt.f32 %v2437_v11  ;;  %v2438_v9 = vadd.f32 1e-05, %v2406_v63 }
 0x5f7   :  { %2605 = vst [vmem:[#allocation2 + $0xc0] sm:$0xff] %v2573_v20  ;;  %v2574_v32 = vadd.f32 %v5104_v46, %v2536_v23 }
 0x5f8   :  { %v3204_v50 = vpop.eup %3203  ;;  %3209 = vrsqrt.f32 %v2438_v9 }
 0x5f9   :  { %2606 = vst [vmem:[#allocation2 + $0xc8] sm:$0xff] %v2574_v32  ;;  %v2499_v38 = vmul.f32 %v3204_v50, %v5066_v19  ;;  %v2374_v55 = vpop.xlane.xlu0 %2373 }
 0x5fa   :  { %v3206_v27 = vpop.eup %3205  ;;  %v2407_v52 = vmul.f32 0.0078125, %v2374_v55 }
 0x5fb   :  { %v2537_v8 = vmul.f32 %v5098_v22, %v2499_v38  ;;  %v2500_v54 = vmul.f32 %v3206_v27, %v5069_v24  ;;  %v2376_v47 = vpop.xlane.xlu1 %2375 }
 0x5fc   :  { %v2439_v42 = vadd.f32 1e-05, %v2407_v52  ;;  %v2408_v1 = vmul.f32 0.0078125, %v2376_v47 }
 0x5fd   :  { %v2575_v40 = vadd.f32 %v5104_v46, %v2537_v8  ;;  %v2538_v2 = vmul.f32 %v5098_v22, %v2500_v54 }
 0x5fe   :  { %3211 = vrsqrt.f32 %v2439_v42  ;;  %v2440_v33 = vadd.f32 1e-05, %v2408_v1 }
 0x5ff   :  { %2607 = vst [vmem:[#allocation2 + $0xd0] sm:$0xff] %v2575_v40  ;;  %v2576_v57 = vadd.f32 %v5104_v46, %v2538_v2 }
 0x600   :  { %v3208_v19 = vpop.eup %3207  ;;  %3213 = vrsqrt.f32 %v2440_v33 }
 0x601   :  { %2608 = vst [vmem:[#allocation2 + $0xd8] sm:$0xff] %v2576_v57  ;;  %v2501_v59 = vmul.f32 %v3208_v19, %v5076_v13 }
 0x602   :  { %v3210_v26 = vpop.eup %3209 }
 0x603   :  { %v2539_v24 = vmul.f32 %v5098_v22, %v2501_v59  ;;  %v2502_v25 = vmul.f32 %v3210_v26, %v5079_v7 }
 0x605   :  { %v2577_v21 = vadd.f32 %v5104_v46, %v2539_v24  ;;  %v2540_v56 = vmul.f32 %v5098_v22, %v2502_v25 }
 0x607   :  { %2609 = vst [vmem:[#allocation2 + $0xe0] sm:$0xff] %v2577_v21  ;;  %v2578_v51 = vadd.f32 %v5104_v46, %v2540_v56 }
 0x608   :  { %v3212_v62 = vpop.eup %3211 }
 0x609   :  { %2610 = vst [vmem:[#allocation2 + $0xe8] sm:$0xff] %v2578_v51  ;;  %v2503_v4 = vmul.f32 %v3212_v62, %v5086_v58 }
 0x60a   :  { %v3214_v28 = vpop.eup %3213 }
 0x60b   :  { %v2541_v14 = vmul.f32 %v5098_v22, %v2503_v4  ;;  %v2504_v13 = vmul.f32 %v3214_v28, %v5089_v17 }
 0x60d   :  { %v2579_v7 = vadd.f32 %v5104_v46, %v2541_v14  ;;  %v2542_v41 = vmul.f32 %v5098_v22, %v2504_v13 }
 0x60f   :  { %2611 = vst [vmem:[#allocation2 + $0xf0] sm:$0xff] %v2579_v7  ;;  %v2580_v0 = vadd.f32 %v5104_v46, %v2542_v41 }
 0x611   :  { %2612 = vst [vmem:[#allocation2 + $0xf8] sm:$0xff] %v2580_v0 }
 0x612   :  { %3226 = shalt.err (!%p3223_p4)
}
 0x613   :  { %s3227_s19 = scalar_lea.hbm %s5225_s12, 4096 }
 0x614   :  { %p3228_p5 = scmp.ne.s32.totalorder %s5225_s12, %s3227_s19  ;;  %p3231_p6 = scmp.lt.u32.totalorder %s3227_s19, %s5225_s12 }
 0x616   :  { %p3233_p7 = pnand %p3231_p6, %p3228_p5 }
 0x618   :  { %3236 = shalt.err (!%p3233_p7)
}
 0x619   :  { %s3241_s23 = smov 128   ;;  %s3242_s0 = smov 8  }
 0x61a   :  { %2624 = dma.vmem_to_hbm [thread:$0]  %s2619_s11, 4096, %s5225_s12, [#allocation3], %s3241_s23, %s3241_s23, %s3242_s0  }
 0x61b   :  { %3237 = dma.done.wait [#allocation3], 4096  }
 0x61c   :  { %3238 = vsyncadd [#allocation3], 4294963200 }
 0x61d   :  { %2628 = vsyncpa [#allocation3], 1 }

</bundles_post_ra>
